<compile_context>
chip_gen: v6e
topology: v6e:2x2x1
jax: 0.10.0
libtpu: 0.0.40
codegen_flags: <defaults>
</compile_context>

<pallas_src>
import functools
import inspect
import math

import jax
import jax.numpy as jnp
import numpy as np
from jax.experimental import pallas as pl
from jax.experimental.pallas import tpu as pltpu

_LANE = 128
_SUBLANE = 8


def _round_up(x, m):
    return ((x + m - 1) // m) * m


# Feature-detect pipeline_mode / Buffered so the single-buffering optimization
# degrades gracefully (default double-buffering) on jax versions without it.
try:
    _HAS_PIPELINE_MODE = (
        hasattr(pl, "Buffered")
        and "pipeline_mode" in inspect.signature(pl.BlockSpec).parameters
    )
except (TypeError, ValueError):
    _HAS_PIPELINE_MODE = False


def _block_spec(block_shape, index_map, *, single_buffer=False):
    if single_buffer and _HAS_PIPELINE_MODE:
        return pl.BlockSpec(block_shape, index_map, pipeline_mode=pl.Buffered(1))
    return pl.BlockSpec(block_shape, index_map)


def _pick_row_tile(ho, wo, cout_p):
    """Largest divisor of `ho` such that the per-step GEMM M (= trh*wo) stays
    within the accumulator budget (256 rows for 128-lane Cout, 128 otherwise)."""
    target_rows = 256 if cout_p <= 128 else 128
    best = 1
    for d in range(1, ho + 1):
        if ho % d == 0 and d * wo <= target_rows:
            best = d
    # NOTE: for very wide images this may return trh=1 with M = wo > target;
    # correctness is unaffected (no Wo tiling implemented).
    return best


def _make_conv_kernel(k, stride, trh, wo, cin, cout_p, activation):
    """Fused im2col (VMEM patch scratch) + single GEMM + bias + activation."""
    m_tile = trh * wo

    def kernel(x_ref, w_ref, b_ref, o_ref, patch_ref):
        # x_ref:     (Hp, Wp, Cin)      bf16  whole padded image (revisited over row tiles)
        # w_ref:     (k*k*Cin, Cout_p)  bf16  flattened conv weights
        # b_ref:     (1, Cout_p)        f32
        # o_ref:     (trh, Wo, Cout_p)  bf16
        # patch_ref: (trh*Wo, k*k*Cin)  bf16  VMEM scratch: fused im2col patch
        t = pl.program_id(1)
        row0 = t * (trh * stride)

        # Pack the k*k shifted windows into the patch (fused im2col).
        for i in range(k):
            for j in range(k):
                if stride == 1:
                    win = x_ref[pl.ds(row0 + i, trh), pl.ds(j, wo), :]
                else:
                    # Strided ref load: pulls only the needed rows/cols.
                    win = x_ref[pl.ds(row0 + i, trh, stride=stride),
                                pl.ds(j, wo, stride=stride), :]
                col0 = (i * k + j) * cin
                patch_ref[:, col0:col0 + cin] = win.reshape(m_tile, cin)

        # One GEMM over K = k*k*Cin, f32 accumulation on the MXU.
        acc = jnp.dot(patch_ref[...], w_ref[...],
                      preferred_element_type=jnp.float32)
        acc = acc + b_ref[...]  # (1, Cout_p) broadcast

        if activation == "relu":
            acc = jnp.maximum(acc, 0.0)
        elif activation == "lrelu":
            acc = jnp.where(acc > 0.0, acc, 0.2 * acc)
        elif activation == "prelu":
            # TODO(synk): PReLU slope is baked at its nn.PReLU init value (0.25),
            # i.e. not a learnable parameter here.
            acc = jnp.where(acc > 0.0, acc, 0.25 * acc)
        elif activation == "selu":
            scale, alpha = 1.0507009873554805, 1.6732632423543772
            acc = scale * jnp.where(acc > 0.0, acc, alpha * (jnp.exp(acc) - 1.0))
        elif activation == "tanh":
            acc = jnp.tanh(acc)
        elif activation == "none":
            pass
        else:
            raise NotImplementedError(f"activation {activation}")

        o_ref[...] = acc.astype(o_ref.dtype).reshape(trh, wo, cout_p)

    return kernel


def _vmem_limit_bytes(hp, wp, cin, trh, wo, cout_p, kk_cin):
    """Scoped-VMEM request derived from the layout-padded block footprint."""
    def tile(rows, cols, itemsize):
        return (_round_up(max(rows, 1), _SUBLANE)
                * _round_up(max(cols, 1), _LANE) * itemsize)

    img = 2 * hp * tile(wp, cin, 2)          # padded image block (<=2 buffers)
    outb = 2 * trh * tile(wo, cout_p, 2)     # bf16 output block (2 buffers)
    wgt = 2 * tile(kk_cin, cout_p, 2)        # flattened weights
    bias = 2 * tile(1, cout_p, 4)
    patch = tile(trh * wo, kk_cin, 2)        # im2col scratch
    acc = tile(trh * wo, cout_p, 4)          # f32 GEMM result headroom
    est = img + outb + wgt + bias + patch + acc
    # 2x slack for compiler-internal scratch; never below 32 MiB nor above
    # v7x's 64 MiB physical VMEM per TensorCore.
    return int(min(64 << 20, max(32 << 20, 2 * est + (4 << 20))))


def _conv_block_pallas(x_nhwc, w_flat, bias_row, *, kernel_size, stride, activation):
    """x_nhwc: (N, Hp, Wp, Cin) bf16 (already spatially padded),
       w_flat: (k*k*Cin, Cout_p) bf16, bias_row: (1, Cout_p) f32."""
    n, hp, wp, cin = x_nhwc.shape
    kk_cin, cout_p = w_flat.shape
    k = kernel_size
    ho = (hp - k) // stride + 1
    wo = (wp - k) // stride + 1

    trh = _pick_row_tile(ho, wo, cout_p)   # output rows per grid step (divides ho)
    ht = ho // trh

    kernel = _make_conv_kernel(k, stride, trh, wo, cin, cout_p, activation)

    out = pl.pallas_call(
        kernel,
        out_shape=jax.ShapeDtypeStruct((n, ho, wo, cout_p), jnp.bfloat16),
        grid=(n, ht),
        in_specs=[
            # Whole padded image per batch element; block index is constant
            # across the row-tile axis -> DMA'd once per image, single-buffered.
            _block_spec((None, hp, wp, cin), lambda b, t: (b, 0, 0, 0),
                        single_buffer=True),
            # Weights & bias: constant index map -> resident, single-buffered.
            _block_spec((kk_cin, cout_p), lambda b, t: (0, 0), single_buffer=True),
            _block_spec((1, cout_p), lambda b, t: (0, 0), single_buffer=True),
        ],
        out_specs=pl.BlockSpec((None, trh, wo, cout_p), lambda b, t: (b, t, 0, 0)),
        scratch_shapes=[pltpu.VMEM((trh * wo, kk_cin), jnp.bfloat16)],
        compiler_params=pltpu.CompilerParams(
            dimension_semantics=("parallel", "parallel"),
            vmem_limit_bytes=_vmem_limit_bytes(hp, wp, cin, trh, wo, cout_p, kk_cin),
        ),
    )(x_nhwc, w_flat, bias_row)
    return out


class Conv2dBlockPallas:
    """JAX/Pallas port of models/CNNDis.py::Conv2dBlock (forward only)."""

    def __init__(self, input_dim, output_dim, kernel_size, stride, padding=0,
                 norm="none", activation="relu", pad_type="zero",
                 key=jax.random.PRNGKey(0)):
        self.input_dim = input_dim
        self.output_dim = output_dim
        self.kernel_size = kernel_size
        self.stride = stride
        self.padding = padding
        self.pad_type = pad_type
        self.activation = activation

        if norm != "none":
            # TODO(synk): 'bn'/'in'/'sn' norm variants not implemented in the kernel.
            raise NotImplementedError(f"norm {norm}")
        self.norm = None

        # Deterministic init mimicking nn.Conv2d defaults (kaiming-uniform-ish).
        kw_key, kb_key = jax.random.split(key)
        fan_in = input_dim * kernel_size * kernel_size
        bound = 1.0 / math.sqrt(fan_in)
        # PyTorch conv weight layout: (Cout, Cin, kh, kw)
        self.weight = jax.random.uniform(
            kw_key, (output_dim, input_dim, kernel_size, kernel_size),
            minval=-bound, maxval=bound, dtype=jnp.float32)
        self.bias = jax.random.uniform(
            kb_key, (output_dim,), minval=-bound, maxval=bound, dtype=jnp.float32)

        # Kernel-ready params: weights flattened to (k*k*Cin, Cout_p) with the
        # row order (i*k + j)*Cin + c matching the kernel's im2col packing,
        # output channels zero-padded to a multiple of 128 (lane-dense stores).
        cout_p = max(_LANE, _round_up(output_dim, _LANE))
        self.cout_p = cout_p
        w_flat = jnp.transpose(self.weight, (2, 3, 1, 0)).reshape(
            kernel_size * kernel_size * input_dim, output_dim)
        self.w_flat = jnp.pad(
            w_flat, ((0, 0), (0, cout_p - output_dim))).astype(jnp.bfloat16)
        self.bias_row = jnp.pad(
            self.bias, (0, cout_p - output_dim)).reshape(1, cout_p).astype(jnp.float32)

    def _pad(self, x_nhwc):
        p = self.padding
        if p == 0:
            return x_nhwc
        pads = ((0, 0), (p, p), (p, p), (0, 0))
        if self.pad_type == "zero":
            return jnp.pad(x_nhwc, pads, mode="constant")
        elif self.pad_type == "reflect":
            return jnp.pad(x_nhwc, pads, mode="reflect")
        elif self.pad_type == "replicate":
            return jnp.pad(x_nhwc, pads, mode="edge")
        else:
            raise ValueError(f"Unsupported padding type: {self.pad_type}")

    @functools.partial(jax.jit, static_argnums=0)
    def __call__(self, x_nchw):
        # NCHW at the module boundary (PyTorch convention); NHWC/bf16 internally.
        x_nhwc = jnp.transpose(x_nchw, (0, 2, 3, 1)).astype(jnp.float32)
        x_nhwc = self._pad(x_nhwc).astype(jnp.bfloat16)
        out = _conv_block_pallas(
            x_nhwc, self.w_flat, self.bias_row,
            kernel_size=self.kernel_size, stride=self.stride,
            activation=self.activation)
        out = out[..., : self.output_dim]                   # drop lane padding
        # Module boundary: back to NCHW and the caller's compute dtype.
        return jnp.transpose(out, (0, 3, 1, 2)).astype(x_nchw.dtype)


if __name__ == "__main__":
    key = jax.random.PRNGKey(0)
    kx, kparam = jax.random.split(key)

    # Small shapes consistent with the module's forward (NCHW input).
    N, Cin, H, W = 2, 4, 16, 16
    Cout, ksize, stride, padding = 8, 3, 1, 1

    x = jax.random.normal(kx, (N, Cin, H, W), dtype=jnp.float32)

    block = Conv2dBlockPallas(Cin, Cout, ksize, stride, padding,
                              norm="none", activation="relu",
                              pad_type="zero", key=kparam)

    y = jax.block_until_ready(block(x))

    # Pure-JAX reference with matching bf16 operand precision, f32 accumulation.
    xb = x.astype(jnp.bfloat16)
    wb = block.weight.astype(jnp.bfloat16)
    ref = jax.lax.conv_general_dilated(
        xb, wb, window_strides=(stride, stride),
        padding=[(padding, padding), (padding, padding)],
        dimension_numbers=("NCHW", "OIHW", "NCHW"),
        preferred_element_type=jnp.float32)
    ref = jnp.maximum(ref + block.bias[None, :, None, None], 0.0)

    assert y.shape == (N, Cout, H, W), y.shape
    assert y.dtype == x.dtype, y.dtype
    y_np = np.asarray(y, dtype=np.float32)
    ref_np = np.asarray(ref, dtype=np.float32)
    err = float(np.max(np.abs(y_np - ref_np)))
    # Tolerance accounts for the kernel's bf16 output rounding.
    assert np.allclose(y_np, ref_np, atol=3e-2, rtol=3e-2), err

    print("KERNEL_OK")
</pallas_src>

<mosaic_0001>
module attributes {stable_mosaic.version = 11 : i64} {
  func.func @kernel(%arg0: i32, %arg1: i32, %arg2: memref<1x18x18x4xbf16, #tpu.memory_space<vmem>>, %arg3: memref<36x128xbf16, #tpu.memory_space<vmem>>, %arg4: memref<1x128xf32, #tpu.memory_space<vmem>>, %arg5: memref<1x16x16x128xbf16, #tpu.memory_space<vmem>>, %arg6: memref<256x36xbf16, #tpu.memory_space<vmem>>) attributes {dimension_semantics = [#tpu.dimension_semantics<parallel>, #tpu.dimension_semantics<parallel>], iteration_bounds = array<i64: 2, 1>, scalar_prefetch = 0 : i64, scratch_operands = 1 : i64, tpu.core_type = #tpu.core_type<tc>, window_params = [{pipeline_mode = #tpu.pipeline_mode<synchronous>, transform_indices = @transform_0, window_bounds = array<i64: 1, 18, 18, 4>}, {pipeline_mode = #tpu.pipeline_mode<synchronous>, transform_indices = @transform_1, window_bounds = array<i64: 36, 128>}, {pipeline_mode = #tpu.pipeline_mode<synchronous>, transform_indices = @transform_2, window_bounds = array<i64: 1, 128>}, {transform_indices = @transform_3, window_bounds = array<i64: 1, 16, 16, 128>}]} {
    %c16_i32 = arith.constant 16 : i32
    %0 = arith.muli %arg1, %c16_i32 : i32
    %c0_i32 = arith.constant 0 : i32
    %1 = arith.addi %0, %c0_i32 : i32
    %c0 = arith.constant 0 : index
    %2 = arith.index_cast %1 : i32 to index
    %c0_0 = arith.constant 0 : index
    %c0_1 = arith.constant 0 : index
    %3 = vector.load %arg2[%c0, %2, %c0_0, %c0_1] : memref<1x18x18x4xbf16, #tpu.memory_space<vmem>>, vector<1x16x16x4xbf16>
    %4 = vector.shape_cast %3 : vector<1x16x16x4xbf16> to vector<16x16x4xbf16>
    %5 = vector.shape_cast %4 : vector<16x16x4xbf16> to vector<256x4xbf16>
    %c0_2 = arith.constant 0 : index
    %c0_3 = arith.constant 0 : index
    %6 = vector.load %arg6[%c0_2, %c0_3] : memref<256x36xbf16, #tpu.memory_space<vmem>>, vector<256x4xbf16>
    tpu.vector_store %arg6[%c0_2, %c0_3], %5 {strides = array<i32>} : memref<256x36xbf16, #tpu.memory_space<vmem>>, vector<256x4xbf16>,
    %c0_i32_4 = arith.constant 0 : i32
    %7 = arith.addi %0, %c0_i32_4 : i32
    %c0_5 = arith.constant 0 : index
    %8 = arith.index_cast %7 : i32 to index
    %c1 = arith.constant 1 : index
    %c0_6 = arith.constant 0 : index
    %9 = vector.load %arg2[%c0_5, %8, %c1, %c0_6] : memref<1x18x18x4xbf16, #tpu.memory_space<vmem>>, vector<1x16x16x4xbf16>
    %10 = vector.shape_cast %9 : vector<1x16x16x4xbf16> to vector<16x16x4xbf16>
    %11 = vector.shape_cast %10 : vector<16x16x4xbf16> to vector<256x4xbf16>
    %c0_7 = arith.constant 0 : index
    %c4 = arith.constant 4 : index
    %12 = vector.load %arg6[%c0_7, %c4] : memref<256x36xbf16, #tpu.memory_space<vmem>>, vector<256x4xbf16>
    tpu.vector_store %arg6[%c0_7, %c4], %11 {strides = array<i32>} : memref<256x36xbf16, #tpu.memory_space<vmem>>, vector<256x4xbf16>,
    %c0_i32_8 = arith.constant 0 : i32
    %13 = arith.addi %0, %c0_i32_8 : i32
    %c0_9 = arith.constant 0 : index
    %14 = arith.index_cast %13 : i32 to index
    %c2 = arith.constant 2 : index
    %c0_10 = arith.constant 0 : index
    %15 = vector.load %arg2[%c0_9, %14, %c2, %c0_10] : memref<1x18x18x4xbf16, #tpu.memory_space<vmem>>, vector<1x16x16x4xbf16>
    %16 = vector.shape_cast %15 : vector<1x16x16x4xbf16> to vector<16x16x4xbf16>
    %17 = vector.shape_cast %16 : vector<16x16x4xbf16> to vector<256x4xbf16>
    %c0_11 = arith.constant 0 : index
    %c8 = arith.constant 8 : index
    %18 = vector.load %arg6[%c0_11, %c8] : memref<256x36xbf16, #tpu.memory_space<vmem>>, vector<256x4xbf16>
    tpu.vector_store %arg6[%c0_11, %c8], %17 {strides = array<i32>} : memref<256x36xbf16, #tpu.memory_space<vmem>>, vector<256x4xbf16>,
    %c1_i32 = arith.constant 1 : i32
    %19 = arith.addi %0, %c1_i32 : i32
    %c0_12 = arith.constant 0 : index
    %20 = arith.index_cast %19 : i32 to index
    %c0_13 = arith.constant 0 : index
    %c0_14 = arith.constant 0 : index
    %21 = vector.load %arg2[%c0_12, %20, %c0_13, %c0_14] : memref<1x18x18x4xbf16, #tpu.memory_space<vmem>>, vector<1x16x16x4xbf16>
    %22 = vector.shape_cast %21 : vector<1x16x16x4xbf16> to vector<16x16x4xbf16>
    %23 = vector.shape_cast %22 : vector<16x16x4xbf16> to vector<256x4xbf16>
    %c0_15 = arith.constant 0 : index
    %c12 = arith.constant 12 : index
    %24 = vector.load %arg6[%c0_15, %c12] : memref<256x36xbf16, #tpu.memory_space<vmem>>, vector<256x4xbf16>
    tpu.vector_store %arg6[%c0_15, %c12], %23 {strides = array<i32>} : memref<256x36xbf16, #tpu.memory_space<vmem>>, vector<256x4xbf16>,
    %c1_i32_16 = arith.constant 1 : i32
    %25 = arith.addi %0, %c1_i32_16 : i32
    %c0_17 = arith.constant 0 : index
    %26 = arith.index_cast %25 : i32 to index
    %c1_18 = arith.constant 1 : index
    %c0_19 = arith.constant 0 : index
    %27 = vector.load %arg2[%c0_17, %26, %c1_18, %c0_19] : memref<1x18x18x4xbf16, #tpu.memory_space<vmem>>, vector<1x16x16x4xbf16>
    %28 = vector.shape_cast %27 : vector<1x16x16x4xbf16> to vector<16x16x4xbf16>
    %29 = vector.shape_cast %28 : vector<16x16x4xbf16> to vector<256x4xbf16>
    %c0_20 = arith.constant 0 : index
    %c16 = arith.constant 16 : index
    %30 = vector.load %arg6[%c0_20, %c16] : memref<256x36xbf16, #tpu.memory_space<vmem>>, vector<256x4xbf16>
    tpu.vector_store %arg6[%c0_20, %c16], %29 {strides = array<i32>} : memref<256x36xbf16, #tpu.memory_space<vmem>>, vector<256x4xbf16>,
    %c1_i32_21 = arith.constant 1 : i32
    %31 = arith.addi %0, %c1_i32_21 : i32
    %c0_22 = arith.constant 0 : index
    %32 = arith.index_cast %31 : i32 to index
    %c2_23 = arith.constant 2 : index
    %c0_24 = arith.constant 0 : index
    %33 = vector.load %arg2[%c0_22, %32, %c2_23, %c0_24] : memref<1x18x18x4xbf16, #tpu.memory_space<vmem>>, vector<1x16x16x4xbf16>
    %34 = vector.shape_cast %33 : vector<1x16x16x4xbf16> to vector<16x16x4xbf16>
    %35 = vector.shape_cast %34 : vector<16x16x4xbf16> to vector<256x4xbf16>
    %c0_25 = arith.constant 0 : index
    %c20 = arith.constant 20 : index
    %36 = vector.load %arg6[%c0_25, %c20] : memref<256x36xbf16, #tpu.memory_space<vmem>>, vector<256x4xbf16>
    tpu.vector_store %arg6[%c0_25, %c20], %35 {strides = array<i32>} : memref<256x36xbf16, #tpu.memory_space<vmem>>, vector<256x4xbf16>,
    %c2_i32 = arith.constant 2 : i32
    %37 = arith.addi %0, %c2_i32 : i32
    %c0_26 = arith.constant 0 : index
    %38 = arith.index_cast %37 : i32 to index
    %c0_27 = arith.constant 0 : index
    %c0_28 = arith.constant 0 : index
    %39 = vector.load %arg2[%c0_26, %38, %c0_27, %c0_28] : memref<1x18x18x4xbf16, #tpu.memory_space<vmem>>, vector<1x16x16x4xbf16>
    %40 = vector.shape_cast %39 : vector<1x16x16x4xbf16> to vector<16x16x4xbf16>
    %41 = vector.shape_cast %40 : vector<16x16x4xbf16> to vector<256x4xbf16>
    %c0_29 = arith.constant 0 : index
    %c24 = arith.constant 24 : index
    %42 = vector.load %arg6[%c0_29, %c24] : memref<256x36xbf16, #tpu.memory_space<vmem>>, vector<256x4xbf16>
    tpu.vector_store %arg6[%c0_29, %c24], %41 {strides = array<i32>} : memref<256x36xbf16, #tpu.memory_space<vmem>>, vector<256x4xbf16>,
    %c2_i32_30 = arith.constant 2 : i32
    %43 = arith.addi %0, %c2_i32_30 : i32
    %c0_31 = arith.constant 0 : index
    %44 = arith.index_cast %43 : i32 to index
    %c1_32 = arith.constant 1 : index
    %c0_33 = arith.constant 0 : index
    %45 = vector.load %arg2[%c0_31, %44, %c1_32, %c0_33] : memref<1x18x18x4xbf16, #tpu.memory_space<vmem>>, vector<1x16x16x4xbf16>
    %46 = vector.shape_cast %45 : vector<1x16x16x4xbf16> to vector<16x16x4xbf16>
    %47 = vector.shape_cast %46 : vector<16x16x4xbf16> to vector<256x4xbf16>
    %c0_34 = arith.constant 0 : index
    %c28 = arith.constant 28 : index
    %48 = vector.load %arg6[%c0_34, %c28] : memref<256x36xbf16, #tpu.memory_space<vmem>>, vector<256x4xbf16>
    tpu.vector_store %arg6[%c0_34, %c28], %47 {strides = array<i32>} : memref<256x36xbf16, #tpu.memory_space<vmem>>, vector<256x4xbf16>,
    %c2_i32_35 = arith.constant 2 : i32
    %49 = arith.addi %0, %c2_i32_35 : i32
    %c0_36 = arith.constant 0 : index
    %50 = arith.index_cast %49 : i32 to index
    %c2_37 = arith.constant 2 : index
    %c0_38 = arith.constant 0 : index
    %51 = vector.load %arg2[%c0_36, %50, %c2_37, %c0_38] : memref<1x18x18x4xbf16, #tpu.memory_space<vmem>>, vector<1x16x16x4xbf16>
    %52 = vector.shape_cast %51 : vector<1x16x16x4xbf16> to vector<16x16x4xbf16>
    %53 = vector.shape_cast %52 : vector<16x16x4xbf16> to vector<256x4xbf16>
    %c0_39 = arith.constant 0 : index
    %c32 = arith.constant 32 : index
    %54 = vector.load %arg6[%c0_39, %c32] : memref<256x36xbf16, #tpu.memory_space<vmem>>, vector<256x4xbf16>
    tpu.vector_store %arg6[%c0_39, %c32], %53 {strides = array<i32>} : memref<256x36xbf16, #tpu.memory_space<vmem>>, vector<256x4xbf16>,
    %c0_40 = arith.constant 0 : index
    %c0_41 = arith.constant 0 : index
    %55 = vector.load %arg6[%c0_40, %c0_41] : memref<256x36xbf16, #tpu.memory_space<vmem>>, vector<256x36xbf16>
    %c0_42 = arith.constant 0 : index
    %c0_43 = arith.constant 0 : index
    %56 = vector.load %arg3[%c0_42, %c0_43] : memref<36x128xbf16, #tpu.memory_space<vmem>>, vector<36x128xbf16>
    %cst = arith.constant dense<0.000000e+00> : vector<256x128xf32>
    %57 = tpu.matmul %55, %56, %cst {dimension_numbers = #tpu.dot_dimension_numbers<[1], [0], [0], [1], [0, 0, 1, 1], [], []>} : vector<256x36xbf16>, vector<36x128xbf16>, vector<256x128xf32> -> vector<256x128xf32>
    %c0_44 = arith.constant 0 : index
    %c0_45 = arith.constant 0 : index
    %58 = vector.load %arg4[%c0_44, %c0_45] : memref<1x128xf32, #tpu.memory_space<vmem>>, vector<1x128xf32>
    %59 = vector.broadcast %58 : vector<1x128xf32> to vector<256x128xf32>
    %60 = arith.addf %57, %59 : vector<256x128xf32>
    %cst_46 = arith.constant 0.000000e+00 : f32
    %61 = vector.broadcast %cst_46 : f32 to vector<256x128xf32>
    %62 = arith.maximumf %60, %61 : vector<256x128xf32>
    %63 = arith.truncf %62 : vector<256x128xf32> to vector<256x128xbf16>
    %64 = vector.shape_cast %63 : vector<256x128xbf16> to vector<16x16x128xbf16>
    %c0_47 = arith.constant 0 : index
    %c0_48 = arith.constant 0 : index
    %c0_49 = arith.constant 0 : index
    %c0_50 = arith.constant 0 : index
    %65 = vector.load %arg5[%c0_47, %c0_48, %c0_49, %c0_50] : memref<1x16x16x128xbf16, #tpu.memory_space<vmem>>, vector<1x16x16x128xbf16>
    %66 = vector.shape_cast %65 : vector<1x16x16x128xbf16> to vector<16x16x128xbf16>
    %67 = vector.shape_cast %64 : vector<16x16x128xbf16> to vector<1x16x16x128xbf16>
    tpu.vector_store %arg5[%c0_47, %c0_48, %c0_49, %c0_50], %67 {strides = array<i32>} : memref<1x16x16x128xbf16, #tpu.memory_space<vmem>>, vector<1x16x16x128xbf16>,
    return
  }
  func.func @transform_0(%arg0: i32, %arg1: i32) -> (i32, i32, i32, i32) {
    %c0_i32 = arith.constant 0 : i32
    %c0_i32_0 = arith.constant 0 : i32
    %c0_i32_1 = arith.constant 0 : i32
    %c0_i32_2 = arith.constant 0 : i32
    return %arg0, %c0_i32, %c0_i32_0, %c0_i32_1 : i32, i32, i32, i32
  }
  func.func @transform_1(%arg0: i32, %arg1: i32) -> (i32, i32) {
    %c0_i32 = arith.constant 0 : i32
    %c0_i32_0 = arith.constant 0 : i32
    %c0_i32_1 = arith.constant 0 : i32
    return %c0_i32, %c0_i32_0 : i32, i32
  }
  func.func @transform_2(%arg0: i32, %arg1: i32) -> (i32, i32) {
    %c0_i32 = arith.constant 0 : i32
    %c0_i32_0 = arith.constant 0 : i32
    %c0_i32_1 = arith.constant 0 : i32
    return %c0_i32, %c0_i32_0 : i32, i32
  }
  func.func @transform_3(%arg0: i32, %arg1: i32) -> (i32, i32, i32, i32) {
    %c0_i32 = arith.constant 0 : i32
    %c0_i32_0 = arith.constant 0 : i32
    %c0_i32_1 = arith.constant 0 : i32
    return %arg0, %arg1, %c0_i32, %c0_i32_0 : i32, i32, i32, i32
  }
}

</mosaic_0001>

<bundles_post_ra>
// kernel: a_call__.1
= control target key start
LH: loop header
LB: loop body
LE: loop exit
PB: predicated region body
PF: predicated region fallthrough
CT: control target
= control target key end

     0   :  { %s4684_s12 = smov 0   ;;  %s4686_s13 = smov 0   ;;  %s6218_s0 = inlined_call_operand.vmem [shape: bf16[2,18,18,4], index: 0, kind: input, shape index: {}]   ;;  %s6219_s1 = inlined_call_operand.vmem [shape: bf16[36,128], index: 1, kind: input, shape index: {}]   ;;  %s6220_s2 = inlined_call_operand.vmem [shape: f32[1,128], index: 2, kind: input, shape index: {}]   ;;  %s6221_s3 = inlined_call_operand.vmem [shape: bf16[2,16,16,128], index: 3, kind: output, shape index: {}]  }
   0x1   :  { %s4688_s14 = smov 0  }
   0x2 LB: > { %s25_s15 = sadd.s32 1, %s4650_s13  ;;  %p4008_p0 = scmp.ge.s32.totalorder %s4654_s14, 1  ;;  %s4654_s14 = sphi %s4688_s14, %s13_s14   ;;  %s4650_s13 = sphi %s4686_s13, %s6227_s13   ;;  %s4646_s12 = sphi %s4684_s12, %s6226_s12  }
   0x3   : > { %p27_p1 = scmp.ge.s32.totalorder %s25_s15, 2  ;;  %p151_p2 = scmp.lt.s32.totalorder %s4654_s14, 3 }
   0x5   : > { %s6229_s15 = smov (%p27_p1, %s25_s15), 0  ;;  %p152_p3 = pnand %p4008_p0, %p151_p2 }
   0x6   : > { %p180_p4 = scmp.lt.s32.totalorder (!%p152_p3), %s4646_s12, 1  ;;  %s4656_s20 = smov (!%p152_p3), 4  }
   0x7   : > { %155 = sbr.rel (%p152_p3) target bundleno = 864 (0x360), region = 32  ;;  %s4657_s21 = smov (!%p152_p3), 8  }
   0x8   : > { %s4658_s22 = smov (!%p152_p3), 12   ;;  %s4659_s23 = smov (!%p152_p3), 16  }
   0x9   : > { %s4660_s24 = smov (!%p152_p3), 20   ;;  %s4661_s25 = smov (!%p152_p3), 24  }
   0xa   : > { %s4662_s26 = smov (!%p152_p3), 28   ;;  %s4663_s4 = smov (!%p152_p3), 32  }
   0xc   : > { %s6231_s12 = smov (!%p180_p4, %s4646_s12), 1  ;;  %vm314_vm0 = vsmask.f32 3328  ;;  %vm315_vm1 = vsmask.f32 7440  ;;  %vm233_vm3 = vcmask 27648  }
   0xd   : > { %s4579_s16 = smul.u32 216, %s6231_s12  ;;  %vm4719_vm2 = vmor %vm314_vm0, %vm315_vm1  ;;  %vm926_vm4 = vcmask 1042432   ;;  %vm927_vm5 = vcmask 1046532   ;;  %vm797_vm7 = vcmask 60448   ;;  %vm1137_vm8 = vcmask 93248   ;;  %s4386_s9 = sshll.u32 %s6231_s12, 7 }
   0xe   : > { %vm4863_vm6 = vmor %vm926_vm4, %vm927_vm5  ;;  %vm1334_vm9 = vcmask 126048   ;;  %vm3548_vm10 = vcmask 1041408   ;;  %vm1895_vm11 = vcmask 158848   ;;  %vm2232_vm12 = vcmask 191648  }
   0xf   : > { %s4708_s19 = scalar_lea.vmem %s6218_s0, %s4579_s16  ;;  %vm2429_vm13 = vcmask 224448   ;;  %vm2990_vm14 = vcmask 257248   ;;  %vm3327_vm15 = vcmask 290048   ;;  %vm3499_vm0 = vcmask 293888   ;;  %s6147_s16 = scalar_lea.vmem %s6221_s3, %s4386_s9 }
  0x10   : > { %v269_v0 = vld [vmem:[%s4708_s19 + $0xc] sm:$0xf]  ;;  %v270_v1 = vld [vmem:[%s4708_s19 + $0x10] sm:$0xf]  ;;  %v266_v2 = vld [vmem:[%s4708_s19] sm:$0xf] }
  0x11   : > { %v342_v3 = vshrl.u32 %v269_v0, 16  ;;  %v345_v4 = vshll.u32 %v269_v0, 16  ;;  %v351_v5 = vshll.u32 %v270_v1, 16  ;;  %v355_v6 = vshrl.u32 %v270_v1, 16  ;;  %v267_v7 = vld [vmem:[%s4708_s19 + $0x4] sm:$0xf] }
  0x12   : > { %v318_v8 = vshrl.u32 %v266_v2, 16  ;;  %v321_v9 = vshll.u32 %v266_v2, 16  ;;  %v327_v10 = vshll.u32 %v267_v7, 16  ;;  %v331_v11 = vshrl.u32 %v267_v7, 16  ;;  %v271_v12 = vld [vmem:[%s4708_s19 + $0x14] sm:$0x1] }
  0x13   : > { %v344_v13 = vrot.slane %v342_v3, 4  ;;  %v347_v14 = vrot.slane %v345_v4, 5  ;;  %v353_v15 = vrot.slane %v351_v5, 5  ;;  %v357_v16 = vrot.slane %v355_v6, 4  ;;  %v268_v17 = vld [vmem:[%s4708_s19 + $0x8] sm:$0x1] }
  0x14   : > { %v320_v18 = vrot.slane %v318_v8, 4  ;;  %v323_v19 = vrot.slane %v321_v9, 5  ;;  %v329_v20 = vrot.slane %v327_v10, 5  ;;  %v333_v21 = vrot.slane %v331_v11, 4  ;;  %v273_v22 = vld [vmem:[%s4708_s19 + $0x1c] sm:$0xf] }
  0x15   : > { %v348_v23 = vor.u32 %v347_v14, %v344_v13  ;;  %v358_v24 = vor.u32 %v357_v16, %v353_v15  ;;  %v361_v25 = vshll.u32 %v271_v12, 16  ;;  %v337_v26 = vshll.u32 %v268_v17, 16  ;;  %v274_v30 = vld [vmem:[%s4708_s19 + $0x20] sm:$0x1]  ;;  %v272_v33 = vld [vmem:[%s4708_s19 + $0x18] sm:$0xf] }
  0x16   : > { %v324_v28 = vor.u32 %v323_v19, %v320_v18  ;;  %v334_v29 = vor.u32 %v333_v21, %v329_v20  ;;  %v375_v31 = vshll.u32 %v273_v22, 16  ;;  %v379_v32 = vshrl.u32 %v273_v22, 16  ;;  %v276_v42 = vld [vmem:[%s4708_s19 + $0x28] sm:$0xf]  ;;  %v277_v47 = vld [vmem:[%s4708_s19 + $0x2c] sm:$0x1] }
  0x17   : > { %v349_v34 = vrot.slane %v348_v23, 4  ;;  %v359_v35 = vrot.slane %v358_v24, 4  ;;  %v363_v36 = vrot.slane %v361_v25, 5  ;;  %v339_v37 = vrot.slane %v337_v26, 5  ;;  %v275_v48 = vld [vmem:[%s4708_s19 + $0x24] sm:$0xf] }
  0x18   : > { %v325_v38 = vrot.slane %v324_v28, 4  ;;  %v335_v39 = vrot.slane %v334_v29, 4  ;;  %v377_v40 = vrot.slane %v375_v31, 5  ;;  %v381_v41 = vrot.slane %v379_v32, 4  ;;  %v279_v53 = vld [vmem:[%s4708_s19 + $0x34] sm:$0xf] }
  0x19   : > { %v354_v43 = vsel %vm4719_vm2, %v349_v34, %v353_v15  ;;  %v364_v44 = vsel %vm4719_vm2, %v359_v35, %v363_v36  ;;  %v385_v45 = vshll.u32 %v274_v30, 16  ;;  %v366_v46 = vshrl.u32 %v272_v33, 16  ;;  %v280_v62 = vld [vmem:[%s4708_s19 + $0x38] sm:$0x1]  ;;  %v278_v3 = vld [vmem:[%s4708_s19 + $0x30] sm:$0xf] }
  0x1a   : > { %705 = vrot.lane.b32.xlu1 %v354_v43, %s4656_s20  ;;  %v330_v49 = vsel %vm4719_vm2, %v325_v38, %v329_v20  ;;  %v340_v50 = vsel %vm4719_vm2, %v335_v39, %v339_v37  ;;  %v382_v51 = vor.u32 %v381_v41, %v377_v40  ;;  %v369_v52 = vshll.u32 %v272_v33, 16  ;;  %v282_v8 = vld [vmem:[%s4708_s19 + $0x40] sm:$0xf]  ;;  %v283_v17 = vld [vmem:[%s4708_s19 + $0x44] sm:$0x1] }
  0x1b   : > { %701 = vrot.lane.b32.xlu0 %v330_v49, %s4656_s20  ;;  %v387_v54 = vrot.slane %v385_v45, 5  ;;  %v368_v55 = vrot.slane %v366_v46, 4  ;;  %v399_v56 = vshll.u32 %v276_v42, 16  ;;  %v403_v57 = vshrl.u32 %v276_v42, 16  ;;  %v281_v22 = vld [vmem:[%s4708_s19 + $0x3c] sm:$0xf] }
  0x1c   : > { %v383_v58 = vrot.slane %v382_v51, 4  ;;  %v371_v59 = vrot.slane %v369_v52, 5  ;;  %v409_v60 = vshll.u32 %v277_v47, 16  ;;  %v390_v61 = vshrl.u32 %v275_v48, 16  ;;  %v285_v28 = vld [vmem:[%s4708_s19 + $0x4c] sm:$0xf] }
  0x1d   : > { %v401_v63 = vrot.slane %v399_v56, 5  ;;  %v405_v0 = vrot.slane %v403_v57, 4  ;;  %v393_v1 = vshll.u32 %v275_v48, 16  ;;  %v423_v2 = vshll.u32 %v279_v53, 16  ;;  %v286_v37 = vld [vmem:[%s4708_s19 + $0x50] sm:$0x1] }
  0x1e   : > { %707 = vrot.lane.b32.xlu1 %v364_v44, %s4656_s20  ;;  %v388_v4 = vsel %vm4719_vm2, %v383_v58, %v387_v54  ;;  %v372_v5 = vor.u32 %v371_v59, %v368_v55  ;;  %v411_v6 = vrot.slane %v409_v60, 5  ;;  %v392_v7 = vrot.slane %v390_v61, 4  ;;  %v284_v42 = vld [vmem:[%s4708_s19 + $0x48] sm:$0xf]  ;;  %v288_v47 = vld [vmem:[%s4708_s19 + $0x58] sm:$0xf] }
  0x1f   : > { %703 = vrot.lane.b32.xlu0 %v340_v50, %s4656_s20  ;;  %v406_v9 = vor.u32 %v405_v0, %v401_v63  ;;  %v395_v10 = vrot.slane %v393_v1, 5  ;;  %v425_v11 = vrot.slane %v423_v2, 5  ;;  %v427_v12 = vshrl.u32 %v279_v53, 16  ;;  %v289_v56 = vld [vmem:[%s4708_s19 + $0x5c] sm:$0x1] }
  0x20   : > { %v373_v13 = vrot.slane %v372_v5, 4  ;;  %v433_v14 = vshll.u32 %v280_v62, 16  ;;  %v414_v15 = vshrl.u32 %v278_v3, 16  ;;  %v417_v16 = vshll.u32 %v278_v3, 16  ;;  %v287_v61 = vld [vmem:[%s4708_s19 + $0x54] sm:$0xf] }
  0x21   : > { %v407_v18 = vrot.slane %v406_v9, 4  ;;  %v396_v19 = vor.u32 %v395_v10, %v392_v7  ;;  %v429_v20 = vrot.slane %v427_v12, 4  ;;  %v447_v21 = vshll.u32 %v282_v8, 16 }
  0x22   : > { %711 = vrot.lane.b32.xlu1 %v388_v4, %s4656_s20  ;;  %v378_v23 = vsel %vm4719_vm2, %v373_v13, %v377_v40  ;;  %v435_v24 = vrot.slane %v433_v14, 5  ;;  %v416_v25 = vrot.slane %v414_v15, 4  ;;  %v419_v26 = vrot.slane %v417_v16, 5  ;;  %v292_v15 = vld [vmem:[%s4708_s19 + $0x68] sm:$0x1] }
  0x23   : > { %709 = vrot.lane.b32.xlu0 %v378_v23, %s4656_s20  ;;  %v412_v29 = vsel %vm4719_vm2, %v407_v18, %v411_v6  ;;  %v397_v30 = vrot.slane %v396_v19, 4  ;;  %v430_v31 = vor.u32 %v429_v20, %v425_v11  ;;  %v449_v32 = vrot.slane %v447_v21, 5  ;;  %v291_v6 = vld [vmem:[%s4708_s19 + $0x64] sm:$0xf]  ;;  %v290_v16 = vld [vmem:[%s4708_s19 + $0x60] sm:$0xf] }
  0x24   : > { %v420_v33 = vor.u32 %v419_v26, %v416_v25  ;;  %v451_v34 = vshrl.u32 %v282_v8, 16  ;;  %v457_v35 = vshll.u32 %v283_v17, 16  ;;  %v438_v36 = vshrl.u32 %v281_v22, 16  ;;  %v294_v25 = vld [vmem:[%s4708_s19 + $0x70] sm:$0xf] }
  0x25   : > { %v402_v38 = vsel %vm4719_vm2, %v397_v30, %v401_v63  ;;  %v431_v39 = vrot.slane %v430_v31, 4  ;;  %v441_v40 = vshll.u32 %v281_v22, 16  ;;  %v471_v41 = vshll.u32 %v285_v28, 16 }
  0x26   : > { %715 = vrot.lane.b32.xlu1 %v412_v29, %s4656_s20  ;;  %v421_v43 = vrot.slane %v420_v33, 4  ;;  %v453_v44 = vrot.slane %v451_v34, 4  ;;  %v459_v45 = vrot.slane %v457_v35, 5  ;;  %v440_v46 = vrot.slane %v438_v36, 4  ;;  %v295_v35 = vld [vmem:[%s4708_s19 + $0x74] sm:$0x1] }
  0x27   : > { %713 = vrot.lane.b32.xlu0 %v402_v38, %s4656_s20  ;;  %v436_v48 = vsel %vm4719_vm2, %v431_v39, %v435_v24  ;;  %v443_v49 = vrot.slane %v441_v40, 5  ;;  %v473_v50 = vrot.slane %v471_v41, 5  ;;  %v475_v51 = vshrl.u32 %v285_v28, 16  ;;  %v293_v36 = vld [vmem:[%s4708_s19 + $0x6c] sm:$0xf] }
  0x28   : > { %v426_v52 = vsel %vm4719_vm2, %v421_v43, %v425_v11  ;;  %v454_v53 = vor.u32 %v453_v44, %v449_v32  ;;  %v481_v54 = vshll.u32 %v286_v37, 16  ;;  %v462_v55 = vshrl.u32 %v284_v42, 16 }
  0x29   : > { %v444_v57 = vor.u32 %v443_v49, %v440_v46  ;;  %v477_v58 = vrot.slane %v475_v51, 4  ;;  %v465_v59 = vshll.u32 %v284_v42, 16  ;;  %v495_v60 = vshll.u32 %v288_v47, 16 }
  0x2a   : > { %719 = vrot.lane.b32.xlu1 %v436_v48, %s4656_s20  ;;  %v455_v62 = vrot.slane %v454_v53, 4  ;;  %v483_v63 = vrot.slane %v481_v54, 5  ;;  %v464_v0 = vrot.slane %v462_v55, 4  ;;  %v499_v1 = vshrl.u32 %v288_v47, 16  ;;  %v298_v54 = vld [vmem:[%s4708_s19 + $0x80] sm:$0x1] }
  0x2b   : > { %717 = vrot.lane.b32.xlu0 %v426_v52, %s4656_s20  ;;  %v445_v2 = vrot.slane %v444_v57, 4  ;;  %v478_v3 = vor.u32 %v477_v58, %v473_v50  ;;  %v467_v4 = vrot.slane %v465_v59, 5  ;;  %v497_v5 = vrot.slane %v495_v60, 5  ;;  %v296_v55 = vld [vmem:[%s4708_s19 + $0x78] sm:$0xf] }
  0x2c   : > { %v460_v7 = vsel %vm4719_vm2, %v455_v62, %v459_v45  ;;  %v501_v8 = vrot.slane %v499_v1, 4  ;;  %v505_v9 = vshll.u32 %v289_v56, 16  ;;  %v486_v10 = vshrl.u32 %v287_v61, 16  ;;  %v297_v45 = vld [vmem:[%s4708_s19 + $0x7c] sm:$0xf] }
  0x2d   : > { %v450_v11 = vsel %vm4719_vm2, %v445_v2, %v449_v32  ;;  %v479_v12 = vrot.slane %v478_v3, 4  ;;  %v468_v13 = vor.u32 %v467_v4, %v464_v0  ;;  %v489_v14 = vshll.u32 %v287_v61, 16  ;;  %v300_v0 = vld [vmem:[%s4708_s19 + $0x88] sm:$0xf] }
  0x2e   : > { %723 = vrot.lane.b32.xlu1 %v460_v7, %s4656_s20  ;;  %v502_v17 = vor.u32 %v501_v8, %v497_v5  ;;  %v507_v18 = vrot.slane %v505_v9, 5  ;;  %v488_v19 = vrot.slane %v486_v10, 4  ;;  %v519_v20 = vshll.u32 %v291_v6, 16  ;;  %v299_v10 = vld [vmem:[%s4708_s19 + $0x84] sm:$0xf] }
  0x2f   : > { %721 = vrot.lane.b32.xlu0 %v450_v11, %s4656_s20  ;;  %v484_v21 = vsel %vm4719_vm2, %v479_v12, %v483_v63  ;;  %v469_v22 = vrot.slane %v468_v13, 4  ;;  %v491_v23 = vrot.slane %v489_v14, 5  ;;  %v523_v24 = vshrl.u32 %v291_v6, 16 }
  0x30   : > { %v503_v26 = vrot.slane %v502_v17, 4  ;;  %v521_v28 = vrot.slane %v519_v20, 5  ;;  %v529_v29 = vshll.u32 %v292_v15, 16  ;;  %v510_v30 = vshrl.u32 %v290_v16, 16 }
  0x31   : > { %v474_v31 = vsel %vm4719_vm2, %v469_v22, %v473_v50  ;;  %v492_v32 = vor.u32 %v491_v23, %v488_v19  ;;  %v525_v33 = vrot.slane %v523_v24, 4  ;;  %v513_v34 = vshll.u32 %v290_v16, 16  ;;  %v303_v19 = vld [vmem:[%s4708_s19 + $0x94] sm:$0xf]  ;;  %v304_v24 = vld [vmem:[%s4708_s19 + $0x98] sm:$0x1] }
  0x32   : > { %727 = vrot.lane.b32.xlu1 %v484_v21, %s4656_s20  ;;  %v508_v37 = vsel %vm4719_vm2, %v503_v26, %v507_v18  ;;  %v531_v38 = vrot.slane %v529_v29, 5  ;;  %v512_v39 = vrot.slane %v510_v30, 4  ;;  %v543_v40 = vshll.u32 %v294_v25, 16  ;;  %v302_v30 = vld [vmem:[%s4708_s19 + $0x90] sm:$0xf] }
  0x33   : > { %725 = vrot.lane.b32.xlu0 %v474_v31, %s4656_s20  ;;  %v493_v41 = vrot.slane %v492_v32, 4  ;;  %v526_v42 = vor.u32 %v525_v33, %v521_v28  ;;  %v515_v43 = vrot.slane %v513_v34, 5  ;;  %v547_v44 = vshrl.u32 %v294_v25, 16 }
  0x34   : > { %v545_v46 = vrot.slane %v543_v40, 5  ;;  %v553_v47 = vshll.u32 %v295_v35, 16  ;;  %v534_v48 = vshrl.u32 %v293_v36, 16  ;;  %v537_v49 = vshll.u32 %v293_v36, 16 }
  0x35   : > { %v498_v50 = vsel %vm4719_vm2, %v493_v41, %v497_v5  ;;  %v527_v51 = vrot.slane %v526_v42, 4  ;;  %v516_v52 = vor.u32 %v515_v43, %v512_v39  ;;  %v549_v53 = vrot.slane %v547_v44, 4  ;;  %v301_v5 = vld [vmem:[%s4708_s19 + $0x8c] sm:$0x1]  ;;  %v306_v39 = vld [vmem:[%s4708_s19 + $0xa0] sm:$0xf] }
  0x36   : > { %731 = vrot.lane.b32.xlu1 %v508_v37, %s4656_s20  ;;  %v555_v56 = vrot.slane %v553_v47, 5  ;;  %v536_v57 = vrot.slane %v534_v48, 4  ;;  %v539_v58 = vrot.slane %v537_v49, 5  ;;  %v567_v59 = vshll.u32 %v297_v45, 16  ;;  %v307_v48 = vld [vmem:[%s4708_s19 + $0xa4] sm:$0x1] }
  0x37   : > { %729 = vrot.lane.b32.xlu0 %v498_v50, %s4656_s20  ;;  %v532_v60 = vsel %vm4719_vm2, %v527_v51, %v531_v38  ;;  %v517_v61 = vrot.slane %v516_v52, 4  ;;  %v550_v62 = vor.u32 %v549_v53, %v545_v46  ;;  %v571_v63 = vshrl.u32 %v297_v45, 16  ;;  %v305_v49 = vld [vmem:[%s4708_s19 + $0x9c] sm:$0xf] }
  0x38   : > { %v540_v1 = vor.u32 %v539_v58, %v536_v57  ;;  %v569_v2 = vrot.slane %v567_v59, 5  ;;  %v577_v3 = vshll.u32 %v298_v54, 16  ;;  %v558_v4 = vshrl.u32 %v296_v55, 16  ;;  %v309_v58 = vld [vmem:[%s4708_s19 + $0xac] sm:$0xf] }
  0x39   : > { %v522_v6 = vsel %vm4719_vm2, %v517_v61, %v521_v28  ;;  %v551_v7 = vrot.slane %v550_v62, 4  ;;  %v573_v8 = vrot.slane %v571_v63, 4  ;;  %v561_v9 = vshll.u32 %v296_v55, 16 }
  0x3a   : > { %735 = vrot.lane.b32.xlu1 %v532_v60, %s4656_s20  ;;  %v541_v11 = vrot.slane %v540_v1, 4  ;;  %v579_v12 = vrot.slane %v577_v3, 5  ;;  %v560_v13 = vrot.slane %v558_v4, 4  ;;  %v591_v14 = vshll.u32 %v300_v0, 16  ;;  %v310_v3 = vld [vmem:[%s4708_s19 + $0xb0] sm:$0x1] }
  0x3b   : > { %733 = vrot.lane.b32.xlu0 %v522_v6, %s4656_s20  ;;  %v556_v15 = vsel %vm4719_vm2, %v551_v7, %v555_v56  ;;  %v574_v16 = vor.u32 %v573_v8, %v569_v2  ;;  %v563_v17 = vrot.slane %v561_v9, 5  ;;  %v595_v18 = vshrl.u32 %v300_v0, 16  ;;  %v308_v4 = vld [vmem:[%s4708_s19 + $0xa8] sm:$0xf] }
  0x3c   : > { %v546_v20 = vsel %vm4719_vm2, %v541_v11, %v545_v46  ;;  %v593_v21 = vrot.slane %v591_v14, 5  ;;  %v601_v22 = vshll.u32 %v301_v5, 16  ;;  %v582_v23 = vshrl.u32 %v299_v10, 16 }
  0x3d   : > { %v575_v25 = vrot.slane %v574_v16, 4  ;;  %v564_v26 = vor.u32 %v563_v17, %v560_v13  ;;  %v597_v28 = vrot.slane %v595_v18, 4  ;;  %v585_v29 = vshll.u32 %v299_v10, 16  ;;  %v312_v13 = vld [vmem:[%s4708_s19 + $0xb8] sm:$0xf] }
  0x3e   : > { %739 = vrot.lane.b32.xlu1 %v556_v15, %s4656_s20  ;;  %v603_v31 = vrot.slane %v601_v22, 5  ;;  %v584_v32 = vrot.slane %v582_v23, 4  ;;  %v615_v33 = vshll.u32 %v303_v19, 16  ;;  %v619_v34 = vshrl.u32 %v303_v19, 16  ;;  %v313_v22 = vld [vmem:[%s4708_s19 + $0xbc] sm:$0x1] }
  0x3f   : > { %737 = vrot.lane.b32.xlu0 %v546_v20, %s4656_s20  ;;  %v580_v35 = vsel %vm4719_vm2, %v575_v25, %v579_v12  ;;  %v565_v36 = vrot.slane %v564_v26, 4  ;;  %v598_v37 = vor.u32 %v597_v28, %v593_v21  ;;  %v587_v38 = vrot.slane %v585_v29, 5  ;;  %v311_v23 = vld [vmem:[%s4708_s19 + $0xb4] sm:$0xf] }
  0x40   : > { %v617_v40 = vrot.slane %v615_v33, 5  ;;  %v621_v41 = vrot.slane %v619_v34, 4  ;;  %v625_v42 = vshll.u32 %v304_v24, 16  ;;  %v606_v43 = vshrl.u32 %v302_v30, 16 }
  0x41   : > { %v570_v44 = vsel %vm4719_vm2, %v565_v36, %v569_v2  ;;  %v599_v45 = vrot.slane %v598_v37, 4  ;;  %v588_v46 = vor.u32 %v587_v38, %v584_v32  ;;  %v609_v47 = vshll.u32 %v302_v30, 16  ;;  %v831_v37 = vld [vmem:[%s4708_s19 + $0x4] sm:$0xf] }
  0x42   : > { %743 = vrot.lane.b32.xlu1 %v580_v35, %s4656_s20  ;;  %v622_v50 = vor.u32 %v621_v41, %v617_v40  ;;  %v627_v51 = vrot.slane %v625_v42, 5  ;;  %v608_v52 = vrot.slane %v606_v43, 4  ;;  %v639_v53 = vshll.u32 %v306_v39, 16 }
  0x43   : > { %741 = vrot.lane.b32.xlu0 %v570_v44, %s4656_s20  ;;  %v604_v54 = vsel %vm4719_vm2, %v599_v45, %v603_v31  ;;  %v589_v55 = vrot.slane %v588_v46, 4  ;;  %v611_v56 = vrot.slane %v609_v47, 5  ;;  %v643_v57 = vshrl.u32 %v306_v39, 16 }
  0x44   : > { %v623_v59 = vrot.slane %v622_v50, 4  ;;  %v641_v60 = vrot.slane %v639_v53, 5  ;;  %v649_v61 = vshll.u32 %v307_v48, 16  ;;  %v630_v62 = vshrl.u32 %v305_v49, 16  ;;  %v832_v48 = vld [vmem:[%s4708_s19 + $0x8] sm:$0x1] }
  0x45   : > { %v594_v63 = vsel %vm4719_vm2, %v589_v55, %v593_v21  ;;  %v612_v0 = vor.u32 %v611_v56, %v608_v52  ;;  %v645_v1 = vrot.slane %v643_v57, 4  ;;  %v633_v2 = vshll.u32 %v305_v49, 16  ;;  %v203_v56 = vld [vmem:[%s4708_s19 + $0xc] sm:$0xf] }
  0x46   : > { %747 = vrot.lane.b32.xlu1 %v604_v54, %s4656_s20  ;;  %v628_v5 = vsel %vm4719_vm2, %v623_v59, %v627_v51  ;;  %v651_v6 = vrot.slane %v649_v61, 5  ;;  %v632_v7 = vrot.slane %v630_v62, 4  ;;  %v663_v8 = vshll.u32 %v309_v58, 16  ;;  %v834_v51 = vld [vmem:[%s4708_s19 + $0x10] sm:$0xf] }
  0x47   : > { %745 = vrot.lane.b32.xlu0 %v594_v63, %s4656_s20  ;;  %v613_v9 = vrot.slane %v612_v0, 4  ;;  %v646_v10 = vor.u32 %v645_v1, %v641_v60  ;;  %v635_v11 = vrot.slane %v633_v2, 5  ;;  %v667_v12 = vshrl.u32 %v309_v58, 16  ;;  %v830_v54 = vld [vmem:[%s4708_s19] sm:$0xe] }
  0x48   : > { %v665_v14 = vrot.slane %v663_v8, 5  ;;  %v673_v15 = vshll.u32 %v310_v3, 16  ;;  %v654_v16 = vshrl.u32 %v308_v4, 16  ;;  %v657_v17 = vshll.u32 %v308_v4, 16  ;;  %236 = vst.msk [vmem:[#allocation2 + $0x8] sm:$0xf] %vm233_vm3, %v203_v56 }
  0x49   : > { %v618_v18 = vsel %vm4719_vm2, %v613_v9, %v617_v40  ;;  %v647_v19 = vrot.slane %v646_v10, 4  ;;  %v636_v20 = vor.u32 %v635_v11, %v632_v7  ;;  %v669_v21 = vrot.slane %v667_v12, 4  ;;  %v201_v61 = vld [vmem:[%s4708_s19] sm:$0xf]  ;;  %v835_v0 = vld [vmem:[%s4708_s19 + $0x14] sm:$0x1] }
  0x4a   : > { %751 = vrot.lane.b32.xlu1 %v628_v5, %s4656_s20  ;;  %v675_v24 = vrot.slane %v673_v15, 5  ;;  %v656_v25 = vrot.slane %v654_v16, 4  ;;  %v659_v26 = vrot.slane %v657_v17, 5  ;;  %v687_v28 = vshll.u32 %v312_v13, 16  ;;  %v837_v1 = vld [vmem:[%s4708_s19 + $0x1c] sm:$0xf] }
  0x4b   : > { %749 = vrot.lane.b32.xlu0 %v618_v18, %s4656_s20  ;;  %v652_v29 = vsel %vm4719_vm2, %v647_v19, %v651_v6  ;;  %v637_v30 = vrot.slane %v636_v20, 4  ;;  %v670_v31 = vor.u32 %v669_v21, %v665_v14  ;;  %v691_v32 = vshrl.u32 %v312_v13, 16  ;;  %234 = vst.msk [vmem:[#allocation2] sm:$0xf] %vm233_vm3, %v201_v61  ;;  %v833_v3 = vld [vmem:[%s4708_s19 + $0xc] sm:$0xe] }
  0x4c   : > { %v660_v33 = vor.u32 %v659_v26, %v656_v25  ;;  %v689_v34 = vrot.slane %v687_v28, 5  ;;  %v697_v35 = vshll.u32 %v313_v22, 16  ;;  %v678_v36 = vshrl.u32 %v311_v23, 16  ;;  %v204_v4 = vld [vmem:[%s4708_s19 + $0x10] sm:$0xf] }
  0x4d   : > { %v642_v38 = vsel %vm4719_vm2, %v637_v30, %v641_v60  ;;  %v671_v39 = vrot.slane %v670_v31, 4  ;;  %v693_v40 = vrot.slane %v691_v32, 4  ;;  %v681_v41 = vshll.u32 %v311_v23, 16  ;;  %v202_v5 = vld [vmem:[%s4708_s19 + $0x4] sm:$0xf] }
  0x4e   : > { %755 = vrot.lane.b32.xlu1 %v652_v29, %s4656_s20  ;;  %v661_v42 = vrot.slane %v660_v33, 4  ;;  %v699_v43 = vrot.slane %v697_v35, 5  ;;  %v680_v44 = vrot.slane %v678_v36, 4  ;;  %v931_v49 = vrot.slane %v831_v37, 5  ;;  %237 = vst.msk [vmem:[#allocation2 + $0xc] sm:$0xf] %vm233_vm3, %v204_v4 }
  0x4f   : > { %753 = vrot.lane.b32.xlu0 %v642_v38, %s4656_s20  ;;  %v676_v45 = vsel %vm4719_vm2, %v671_v39, %v675_v24  ;;  %v694_v46 = vor.u32 %v693_v40, %v689_v34  ;;  %v683_v47 = vrot.slane %v681_v41, 5  ;;  %v934_v55 = vrot.slane %v832_v48, 5  ;;  %235 = vst.msk [vmem:[#allocation2 + $0x4] sm:$0xf] %vm233_vm3, %v202_v5  ;;  %v838_v12 = vld [vmem:[%s4708_s19 + $0x20] sm:$0x1] }
  0x50   : > { %v666_v50 = vsel %vm4719_vm2, %v661_v42, %v665_v14  ;;  %v933_v59 = vrot.slane %v931_v49, 4  ;;  %v938_v60 = vrot.slane %v834_v51, 5  ;;  %v4012_v63 = vrot.slane %v830_v54, 9  ;;  %v840_v13 = vld [vmem:[%s4708_s19 + $0x28] sm:$0xf] }
  0x51   : > { %v695_v52 = vrot.slane %v694_v46, 4  ;;  %v684_v53 = vor.u32 %v683_v47, %v680_v44  ;;  %v941_v8 = vrot.slane %v835_v0, 5  ;;  %v945_v9 = vrot.slane %v837_v1, 5  ;;  %v836_v14 = vld [vmem:[%s4708_s19 + $0x18] sm:$0xe] }
  0x52   : > { %759 = vrot.lane.b32.xlu1 %v676_v45, %s4656_s20  ;;  %v935_v6 = vsel %vm4863_vm6, %v933_v59, %v934_v55  ;;  %v940_v7 = vrot.slane %v938_v60, 4  ;;  %v932_v10 = vsel %vm4863_vm6, %v4012_v63, %v931_v49  ;;  %v4013_v11 = vrot.slane %v833_v3, 9  ;;  %v206_v15 = vld [vmem:[%s4708_s19 + $0x1c] sm:$0xf]  ;;  %v205_v16 = vld [vmem:[%s4708_s19 + $0x18] sm:$0xf] }
  0x53   : > { %757 = vrot.lane.b32.xlu0 %v666_v50, %s4656_s20  ;;  %v700_v57 = vsel %vm4719_vm2, %v695_v52, %v699_v43  ;;  %v685_v58 = vrot.slane %v684_v53, 4  ;;  %239 = vst.msk [vmem:[#allocation2 + $0x14] sm:$0xf] %vm233_vm3, %v206_v15  ;;  %v947_v18 = vrot.slane %v945_v9, 4  ;;  %v948_v19 = vrot.slane %v838_v12, 5 }
  0x54   : > { %v942_v17 = vsel %vm4863_vm6, %v940_v7, %v941_v8  ;;  %v952_v20 = vrot.slane %v840_v13, 5  ;;  %238 = vst.msk [vmem:[#allocation2 + $0x10] sm:$0xf] %vm233_vm3, %v205_v16  ;;  %v939_v21 = vsel %vm4863_vm6, %v4013_v11, %v938_v60  ;;  %v4014_v22 = vrot.slane %v836_v14, 9  ;;  %v841_v23 = vld [vmem:[%s4708_s19 + $0x2c] sm:$0x1] }
  0x55   : > { %v690_v2 = vsel %vm4719_vm2, %v685_v58, %v689_v34  ;;  %v843_v24 = vld [vmem:[%s4708_s19 + $0x34] sm:$0xf]  ;;  %v839_v25 = vld [vmem:[%s4708_s19 + $0x24] sm:$0xe]  ;;  %v208_v26 = vld [vmem:[%s4708_s19 + $0x28] sm:$0xf]  ;;  %v949_v29 = vsel %vm4863_vm6, %v947_v18, %v948_v19 }
  0x56   : > { %763 = vrot.lane.b32.xlu1 %v700_v57, %s4656_s20  ;;  %241 = vst.msk [vmem:[#allocation2 + $0x1c] sm:$0xf] %vm233_vm3, %v208_v26  ;;  %v207_v28 = vld [vmem:[%s4708_s19 + $0x24] sm:$0xf]  ;;  %v954_v30 = vrot.slane %v952_v20, 4  ;;  %v955_v31 = vrot.slane %v841_v23, 5  ;;  %v946_v34 = vsel %vm4863_vm6, %v4014_v22, %v945_v9 }
  0x57   : > { %761 = vrot.lane.b32.xlu0 %v690_v2, %s4656_s20  ;;  %v844_v32 = vld [vmem:[%s4708_s19 + $0x38] sm:$0x1]  ;;  %v959_v33 = vrot.slane %v843_v24, 5  ;;  %240 = vst.msk [vmem:[#allocation2 + $0x18] sm:$0xf] %vm233_vm3, %v207_v28  ;;  %v4015_v35 = vrot.slane %v839_v25, 9 }
  0x58   : > { %v846_v36 = vld [vmem:[%s4708_s19 + $0x40] sm:$0xf]  ;;  %v210_v37 = vld [vmem:[%s4708_s19 + $0x34] sm:$0xf]  ;;  %v842_v38 = vld [vmem:[%s4708_s19 + $0x30] sm:$0xe]  ;;  %v956_v41 = vsel %vm4863_vm6, %v954_v30, %v955_v31 }
  0x59   : > { %243 = vst.msk [vmem:[#allocation2 + $0x24] sm:$0xf] %vm233_vm3, %v210_v37  ;;  %v209_v39 = vld [vmem:[%s4708_s19 + $0x30] sm:$0xf]  ;;  %v847_v40 = vld [vmem:[%s4708_s19 + $0x44] sm:$0x1]  ;;  %v953_v46 = vsel %vm4863_vm6, %v4015_v35, %v952_v20 }
  0x5a   : > { %1043 = vrot.lane.b32.xlu1 %v935_v6, %s4657_s21  ;;  %242 = vst.msk [vmem:[#allocation2 + $0x20] sm:$0xf] %vm233_vm3, %v209_v39  ;;  %v961_v42 = vrot.slane %v959_v33, 4  ;;  %v962_v43 = vrot.slane %v844_v32, 5  ;;  %v966_v44 = vrot.slane %v846_v36, 5  ;;  %v4016_v47 = vrot.slane %v842_v38, 9 }
  0x5b   : > { %1041 = vrot.lane.b32.xlu0 %v932_v10, %s4657_s21  ;;  %v212_v45 = vld [vmem:[%s4708_s19 + $0x40] sm:$0xf]  ;;  %v849_v48 = vld [vmem:[%s4708_s19 + $0x4c] sm:$0xf]  ;;  %v211_v49 = vld [vmem:[%s4708_s19 + $0x3c] sm:$0xf] }
  0x5c   : > { %245 = vst.msk [vmem:[#allocation2 + $0x2c] sm:$0xf] %vm233_vm3, %v212_v45  ;;  %v845_v50 = vld [vmem:[%s4708_s19 + $0x3c] sm:$0xe]  ;;  %244 = vst.msk [vmem:[#allocation2 + $0x28] sm:$0xf] %vm233_vm3, %v211_v49  ;;  %v963_v53 = vsel %vm4863_vm6, %v961_v42, %v962_v43  ;;  %v960_v58 = vsel %vm4863_vm6, %v4016_v47, %v959_v33 }
  0x5d   : > { %v850_v51 = vld [vmem:[%s4708_s19 + $0x50] sm:$0x1]  ;;  %v214_v52 = vld [vmem:[%s4708_s19 + $0x4c] sm:$0xf]  ;;  %v968_v54 = vrot.slane %v966_v44, 4  ;;  %v969_v55 = vrot.slane %v847_v40, 5 }
  0x5e   : > { %1047 = vrot.lane.b32.xlu1 %v942_v17, %s4657_s21  ;;  %v973_v56 = vrot.slane %v849_v48, 5  ;;  %247 = vst.msk [vmem:[#allocation2 + $0x34] sm:$0xf] %vm233_vm3, %v214_v52  ;;  %v213_v57 = vld [vmem:[%s4708_s19 + $0x48] sm:$0xf]  ;;  %v4017_v59 = vrot.slane %v845_v50, 9 }
  0x5f   : > { %1045 = vrot.lane.b32.xlu0 %v939_v21, %s4657_s21  ;;  %v4940_v60 = vld [vmem:[%s4708_s19 + $0x58] sm:$0xf]  ;;  %246 = vst.msk [vmem:[#allocation2 + $0x30] sm:$0xf] %vm233_vm3, %v213_v57  ;;  %v848_v63 = vld [vmem:[%s4708_s19 + $0x48] sm:$0xe]  ;;  %v970_v5 = vsel %vm4863_vm6, %v968_v54, %v969_v55 }
  0x60   : > { %v216_v61 = vld [vmem:[%s4708_s19 + $0x58] sm:$0xf]  ;;  %v853_v0 = vld [vmem:[%s4708_s19 + $0x5c] sm:$0x1]  ;;  %v215_v1 = vld [vmem:[%s4708_s19 + $0x54] sm:$0xf]  ;;  %v967_v10 = vsel %vm4863_vm6, %v4017_v59, %v966_v44 }
  0x61   : > { %249 = vst.msk [vmem:[#allocation2 + $0x3c] sm:$0xf] %vm233_vm3, %v216_v61  ;;  %v976_v2 = vrot.slane %v850_v51, 5  ;;  %248 = vst.msk [vmem:[#allocation2 + $0x38] sm:$0xf] %vm233_vm3, %v215_v1  ;;  %v975_v6 = vrot.slane %v973_v56, 4 }
  0x62   : > { %1051 = vrot.lane.b32.xlu1 %v949_v29, %s4657_s21  ;;  %v218_v3 = vld [vmem:[%s4708_s19 + $0x64] sm:$0xf]  ;;  %v217_v4 = vld [vmem:[%s4708_s19 + $0x60] sm:$0xf]  ;;  %v980_v7 = vrot.slane %v4940_v60, 5  ;;  %v4018_v11 = vrot.slane %v848_v63, 9 }
  0x63   : > { %1049 = vrot.lane.b32.xlu0 %v946_v34, %s4657_s21  ;;  %251 = vst.msk [vmem:[#allocation2 + $0x44] sm:$0xf] %vm233_vm3, %v218_v3  ;;  %250 = vst.msk [vmem:[#allocation2 + $0x40] sm:$0xf] %vm233_vm3, %v217_v4  ;;  %v220_v8 = vld [vmem:[%s4708_s19 + $0x70] sm:$0xf]  ;;  %v977_v20 = vsel %vm4863_vm6, %v975_v6, %v976_v2 }
  0x64   : > { %v219_v9 = vld [vmem:[%s4708_s19 + $0x6c] sm:$0xf]  ;;  %v855_v12 = vld [vmem:[%s4708_s19 + $0x64] sm:$0xf]  ;;  %253 = vst.msk [vmem:[#allocation2 + $0x4c] sm:$0xf] %vm233_vm3, %v220_v8  ;;  %v974_v25 = vsel %vm4863_vm6, %v4018_v11, %v973_v56 }
  0x65   : > { %252 = vst.msk [vmem:[#allocation2 + $0x48] sm:$0xf] %vm233_vm3, %v219_v9  ;;  %v222_v13 = vld [vmem:[%s4708_s19 + $0x7c] sm:$0xf]  ;;  %v851_v14 = vld [vmem:[%s4708_s19 + $0x54] sm:$0xe] }
  0x66   : > { %1055 = vrot.lane.b32.xlu1 %v956_v41, %s4657_s21  ;;  %v856_v15 = vld [vmem:[%s4708_s19 + $0x68] sm:$0x1]  ;;  %255 = vst.msk [vmem:[#allocation2 + $0x54] sm:$0xf] %vm233_vm3, %v222_v13  ;;  %v221_v16 = vld [vmem:[%s4708_s19 + $0x78] sm:$0xf] }
  0x67   : > { %1053 = vrot.lane.b32.xlu0 %v953_v46, %s4657_s21  ;;  %v983_v17 = vrot.slane %v853_v0, 5  ;;  %254 = vst.msk [vmem:[#allocation2 + $0x50] sm:$0xf] %vm233_vm3, %v221_v16  ;;  %v224_v18 = vld [vmem:[%s4708_s19 + $0x88] sm:$0xf]  ;;  %v982_v21 = vrot.slane %v980_v7, 4 }
  0x68   : > { %v223_v19 = vld [vmem:[%s4708_s19 + $0x84] sm:$0xf]  ;;  %v987_v22 = vrot.slane %v855_v12, 5  ;;  %257 = vst.msk [vmem:[#allocation2 + $0x5c] sm:$0xf] %vm233_vm3, %v224_v18  ;;  %v4019_v26 = vrot.slane %v851_v14, 9 }
  0x69   : > { %256 = vst.msk [vmem:[#allocation2 + $0x58] sm:$0xf] %vm233_vm3, %v223_v19  ;;  %v226_v23 = vld [vmem:[%s4708_s19 + $0x94] sm:$0xf]  ;;  %v225_v24 = vld [vmem:[%s4708_s19 + $0x90] sm:$0xf]  ;;  %v984_v35 = vsel %vm4863_vm6, %v982_v21, %v983_v17 }
  0x6a   : > { %1059 = vrot.lane.b32.xlu1 %v963_v53, %s4657_s21  ;;  %v858_v28 = vld [vmem:[%s4708_s19 + $0x70] sm:$0xf]  ;;  %259 = vst.msk [vmem:[#allocation2 + $0x64] sm:$0xf] %vm233_vm3, %v226_v23  ;;  %258 = vst.msk [vmem:[#allocation2 + $0x60] sm:$0xf] %vm233_vm3, %v225_v24  ;;  %v981_v40 = vsel %vm4863_vm6, %v4019_v26, %v980_v7 }
  0x6b   : > { %1057 = vrot.lane.b32.xlu0 %v960_v58, %s4657_s21  ;;  %v228_v29 = vld [vmem:[%s4708_s19 + $0xa0] sm:$0xf]  ;;  %v227_v31 = vld [vmem:[%s4708_s19 + $0x9c] sm:$0xf]  ;;  %v990_v32 = vrot.slane %v856_v15, 5  ;;  %v989_v36 = vrot.slane %v987_v22, 4 }
  0x6c   : > { %v854_v30 = vld [vmem:[%s4708_s19 + $0x60] sm:$0xe]  ;;  %261 = vst.msk [vmem:[#allocation2 + $0x6c] sm:$0xf] %vm233_vm3, %v228_v29  ;;  %260 = vst.msk [vmem:[#allocation2 + $0x68] sm:$0xf] %vm233_vm3, %v227_v31 }
  0x6d   : > { %v230_v33 = vld [vmem:[%s4708_s19 + $0xac] sm:$0xf]  ;;  %v229_v34 = vld [vmem:[%s4708_s19 + $0xa8] sm:$0xf]  ;;  %v994_v37 = vrot.slane %v858_v28, 5  ;;  %v4020_v41 = vrot.slane %v854_v30, 9  ;;  %v991_v45 = vsel %vm4863_vm6, %v989_v36, %v990_v32 }
  0x6e   : > { %1063 = vrot.lane.b32.xlu1 %v970_v5, %s4657_s21  ;;  %263 = vst.msk [vmem:[#allocation2 + $0x74] sm:$0xf] %vm233_vm3, %v230_v33  ;;  %262 = vst.msk [vmem:[#allocation2 + $0x70] sm:$0xf] %vm233_vm3, %v229_v34  ;;  %v232_v38 = vld [vmem:[%s4708_s19 + $0xb8] sm:$0xf] }
  0x6f   : > { %1061 = vrot.lane.b32.xlu0 %v967_v10, %s4657_s21  ;;  %v231_v39 = vld [vmem:[%s4708_s19 + $0xb4] sm:$0xf]  ;;  %v861_v43 = vld [vmem:[%s4708_s19 + $0x7c] sm:$0xf]  ;;  %265 = vst.msk [vmem:[#allocation2 + $0x7c] sm:$0xf] %vm233_vm3, %v232_v38  ;;  %v988_v49 = vsel %vm4863_vm6, %v4020_v41, %v987_v22 }
  0x70   : > { %v859_v42 = vld [vmem:[%s4708_s19 + $0x74] sm:$0x1]  ;;  %264 = vst.msk [vmem:[#allocation2 + $0x78] sm:$0xf] %vm233_vm3, %v231_v39  ;;  %v857_v44 = vld [vmem:[%s4708_s19 + $0x6c] sm:$0xe] }
  0x71   : > { %v996_v46 = vrot.slane %v994_v37, 4  ;;  %v997_v47 = vrot.slane %v859_v42, 5  ;;  %v1001_v48 = vrot.slane %v861_v43, 5  ;;  %v4021_v50 = vrot.slane %v857_v44, 9  ;;  %v862_v51 = vld [vmem:[%s4708_s19 + $0x80] sm:$0x1] }
  0x72   : > { %1067 = vrot.lane.b32.xlu1 %v977_v20, %s4657_s21  ;;  %v864_v52 = vld [vmem:[%s4708_s19 + $0x88] sm:$0xf]  ;;  %v860_v53 = vld [vmem:[%s4708_s19 + $0x78] sm:$0xe]  ;;  %v1004_v56 = vrot.slane %v862_v51, 5 }
  0x73   : > { %1065 = vrot.lane.b32.xlu0 %v974_v25, %s4657_s21  ;;  %v998_v54 = vsel %vm4863_vm6, %v996_v46, %v997_v47  ;;  %v1003_v55 = vrot.slane %v1001_v48, 4  ;;  %v1008_v57 = vrot.slane %v864_v52, 5  ;;  %v995_v58 = vsel %vm4863_vm6, %v4021_v50, %v994_v37  ;;  %v865_v60 = vld [vmem:[%s4708_s19 + $0x8c] sm:$0x1]  ;;  %v867_v61 = vld [vmem:[%s4708_s19 + $0x94] sm:$0xf] }
  0x74   : > { %v4022_v59 = vrot.slane %v860_v53, 9  ;;  %v863_v63 = vld [vmem:[%s4708_s19 + $0x84] sm:$0xe]  ;;  %v1011_v2 = vrot.slane %v865_v60, 5  ;;  %v1015_v3 = vrot.slane %v867_v61, 5 }
  0x75   : > { %v1005_v0 = vsel %vm4863_vm6, %v1003_v55, %v1004_v56  ;;  %v1010_v1 = vrot.slane %v1008_v57, 4  ;;  %v4023_v5 = vrot.slane %v863_v63, 9  ;;  %v868_v6 = vld [vmem:[%s4708_s19 + $0x98] sm:$0x1]  ;;  %v870_v7 = vld [vmem:[%s4708_s19 + $0xa0] sm:$0xf] }
  0x76   : > { %1071 = vrot.lane.b32.xlu1 %v984_v35, %s4657_s21  ;;  %v1002_v4 = vsel %vm4863_vm6, %v4022_v59, %v1001_v48  ;;  %v866_v8 = vld [vmem:[%s4708_s19 + $0x90] sm:$0xe]  ;;  %v1017_v10 = vrot.slane %v1015_v3, 4  ;;  %v1018_v11 = vrot.slane %v868_v6, 5  ;;  %v1022_v12 = vrot.slane %v870_v7, 5 }
  0x77   : > { %1069 = vrot.lane.b32.xlu0 %v981_v40, %s4657_s21  ;;  %v1012_v9 = vsel %vm4863_vm6, %v1010_v1, %v1011_v2  ;;  %v1009_v13 = vsel %vm4863_vm6, %v4023_v5, %v1008_v57  ;;  %v4024_v14 = vrot.slane %v866_v8, 9  ;;  %v871_v15 = vld [vmem:[%s4708_s19 + $0xa4] sm:$0x1]  ;;  %v873_v16 = vld [vmem:[%s4708_s19 + $0xac] sm:$0xf] }
  0x78   : > { %v869_v17 = vld [vmem:[%s4708_s19 + $0x9c] sm:$0xe]  ;;  %v1019_v18 = vsel %vm4863_vm6, %v1017_v10, %v1018_v11  ;;  %v1024_v19 = vrot.slane %v1022_v12, 4  ;;  %v1025_v20 = vrot.slane %v871_v15, 5  ;;  %v1029_v21 = vrot.slane %v873_v16, 5 }
  0x79   : > { %v1016_v22 = vsel %vm4863_vm6, %v4024_v14, %v1015_v3  ;;  %v4025_v23 = vrot.slane %v869_v17, 9  ;;  %v874_v24 = vld [vmem:[%s4708_s19 + $0xb0] sm:$0x1]  ;;  %v876_v25 = vld [vmem:[%s4708_s19 + $0xb8] sm:$0xf] }
  0x7a   : > { %1075 = vrot.lane.b32.xlu1 %v991_v45, %s4657_s21  ;;  %v872_v26 = vld [vmem:[%s4708_s19 + $0xa8] sm:$0xe]  ;;  %v1026_v28 = vsel %vm4863_vm6, %v1024_v19, %v1025_v20  ;;  %v1031_v29 = vrot.slane %v1029_v21, 4  ;;  %v1032_v30 = vrot.slane %v874_v24, 5  ;;  %v1036_v31 = vrot.slane %v876_v25, 5 }
  0x7b   : > { %1073 = vrot.lane.b32.xlu0 %v988_v49, %s4657_s21  ;;  %v1023_v33 = vsel %vm4863_vm6, %v4025_v23, %v1022_v12  ;;  %v4026_v34 = vrot.slane %v872_v26, 9  ;;  %v877_v35 = vld [vmem:[%s4708_s19 + $0xbc] sm:$0x1]  ;;  %v875_v37 = vld [vmem:[%s4708_s19 + $0xb4] sm:$0xe] }
  0x7c   : > { %v1033_v38 = vsel %vm4863_vm6, %v1031_v29, %v1032_v30  ;;  %v1038_v39 = vrot.slane %v1036_v31, 4  ;;  %v1039_v40 = vrot.slane %v877_v35, 5  ;;  %v4027_v43 = vrot.slane %v875_v37, 9  ;;  %v4029_v49 = vld [vmem:[%s4708_s19 + $0x10] sm:$0xf] }
  0x7d   : > { %v1030_v42 = vsel %vm4863_vm6, %v4026_v34, %v1029_v21  ;;  %v4028_v51 = vld [vmem:[%s4708_s19 + $0xc] sm:$0xf]  ;;  %v4031_v53 = vld [vmem:[%s4708_s19 + $0x1c] sm:$0xf]  ;;  %v4030_v55 = vld [vmem:[%s4708_s19 + $0x18] sm:$0xf] }
  0x7e   : > { %1079 = vrot.lane.b32.xlu1 %v998_v54, %s4657_s21  ;;  %v1040_v45 = vsel %vm4863_vm6, %v1038_v39, %v1039_v40  ;;  %v1037_v47 = vsel %vm4863_vm6, %v4027_v43, %v1036_v31  ;;  %v4033_v57 = vld [vmem:[%s4708_s19 + $0x28] sm:$0xf]  ;;  %v4032_v59 = vld [vmem:[%s4708_s19 + $0x24] sm:$0xf]  ;;  %v4035_v61 = vld [vmem:[%s4708_s19 + $0x34] sm:$0xf] }
  0x7f   : > { %1077 = vrot.lane.b32.xlu0 %v995_v58, %s4657_s21  ;;  %v4037_v2 = vld [vmem:[%s4708_s19 + $0x40] sm:$0xf]  ;;  %v4039_v6 = vld [vmem:[%s4708_s19 + $0x4c] sm:$0xf]  ;;  %v4038_v8 = vld [vmem:[%s4708_s19 + $0x48] sm:$0xf] }
  0x80   : > { %v4041_v10 = vld [vmem:[%s4708_s19 + $0x58] sm:$0xf]  ;;  %v4040_v12 = vld [vmem:[%s4708_s19 + $0x54] sm:$0xf]  ;;  %v4043_v14 = vld [vmem:[%s4708_s19 + $0x64] sm:$0xf] }
  0x81   : > { %v4042_v16 = vld [vmem:[%s4708_s19 + $0x60] sm:$0xf]  ;;  %v4044_v20 = vld [vmem:[%s4708_s19 + $0x6c] sm:$0xf]  ;;  %v4046_v24 = vld [vmem:[%s4708_s19 + $0x78] sm:$0xf] }
  0x82   : > { %1083 = vrot.lane.b32.xlu1 %v1005_v0, %s4657_s21  ;;  %v4034_v0 = vld [vmem:[%s4708_s19 + $0x30] sm:$0xf]  ;;  %v4049_v26 = vld [vmem:[%s4708_s19 + $0x88] sm:$0xf]  ;;  %v4048_v29 = vld [vmem:[%s4708_s19 + $0x84] sm:$0xf] }
  0x83   : > { %1081 = vrot.lane.b32.xlu0 %v1002_v4, %s4657_s21  ;;  %v4036_v4 = vld [vmem:[%s4708_s19 + $0x3c] sm:$0xf]  ;;  %v4051_v31 = vld [vmem:[%s4708_s19 + $0x94] sm:$0xf]  ;;  %v4061_v34 = vld [vmem:[%s4708_s19 + $0x10] sm:$0xf] }
  0x84   : > { %v4060_v35 = vld [vmem:[%s4708_s19 + $0xc] sm:$0xf]  ;;  %v4064_v37 = vld [vmem:[%s4708_s19 + $0x1c] sm:$0xf]  ;;  %v1425_v39 = vshll.u32 %v4061_v34, 16  ;;  %v1429_v40 = vshrl.u32 %v4061_v34, 16 }
  0x86   : > { %1087 = vrot.lane.b32.xlu1 %v1012_v9, %s4657_s21 }
  0x87   : > { %1085 = vrot.lane.b32.xlu0 %v1009_v13, %s4657_s21 }
  0x8a   : > { %1091 = vrot.lane.b32.xlu1 %v1019_v18, %s4657_s21  ;;  %v4045_v18 = vld [vmem:[%s4708_s19 + $0x70] sm:$0xf] }
  0x8b   : > { %1089 = vrot.lane.b32.xlu0 %v1016_v22, %s4657_s21  ;;  %v4047_v22 = vld [vmem:[%s4708_s19 + $0x7c] sm:$0xf] }
  0x8c   : > { %v706_v32 = vpop.permute.xlu1 %705 }
  0x8d   : > { %800 = vst.msk [vmem:[#allocation2 + $0x8] sm:$0xf] %vm797_vm7, %v706_v32  ;;  %v702_v36 = vpop.permute.xlu0 %701 }
  0x8e   : > { %798 = vst.msk [vmem:[#allocation2] sm:$0xf] %vm797_vm7, %v702_v36  ;;  %1095 = vrot.lane.b32.xlu1 %v1026_v28, %s4657_s21 }
  0x8f   : > { %1093 = vrot.lane.b32.xlu0 %v1023_v33, %s4657_s21  ;;  %v4050_v33 = vld [vmem:[%s4708_s19 + $0x90] sm:$0xf] }
  0x90   : > { %v708_v41 = vpop.permute.xlu1 %707 }
  0x91   : > { %801 = vst.msk [vmem:[#allocation2 + $0xc] sm:$0xf] %vm797_vm7, %v708_v41  ;;  %v704_v44 = vpop.permute.xlu0 %703  ;;  %v1416_v41 = vshrl.u32 %v4060_v35, 16 }
  0x92   : > { %799 = vst.msk [vmem:[#allocation2 + $0x4] sm:$0xf] %vm797_vm7, %v704_v44  ;;  %1099 = vrot.lane.b32.xlu1 %v1033_v38, %s4657_s21  ;;  %v4053_v38 = vld [vmem:[%s4708_s19 + $0xa0] sm:$0xf]  ;;  %v4052_v44 = vld [vmem:[%s4708_s19 + $0x9c] sm:$0xf] }
  0x93   : > { %1097 = vrot.lane.b32.xlu0 %v1030_v42, %s4657_s21  ;;  %v1419_v42 = vshll.u32 %v4060_v35, 16 }
  0x94   : > { %v712_v46 = vpop.permute.xlu1 %711 }
  0x95   : > { %803 = vst.msk [vmem:[#allocation2 + $0x14] sm:$0xf] %vm797_vm7, %v712_v46  ;;  %v710_v48 = vpop.permute.xlu0 %709  ;;  %v1453_v46 = vshrl.u32 %v4064_v37, 16 }
  0x96   : > { %802 = vst.msk [vmem:[#allocation2 + $0x10] sm:$0xf] %vm797_vm7, %v710_v48  ;;  %1103 = vrot.lane.b32.xlu1 %v1040_v45, %s4657_s21  ;;  %v1449_v45 = vshll.u32 %v4064_v37, 16  ;;  %v4055_v48 = vld [vmem:[%s4708_s19 + $0xac] sm:$0xf] }
  0x97   : > { %1101 = vrot.lane.b32.xlu0 %v1037_v47, %s4657_s21  ;;  %v4084_v37 = vld [vmem:[%s4708_s19 + $0x6c] sm:$0xf] }
  0x98   : > { %v716_v50 = vpop.permute.xlu1 %715 }
  0x99   : > { %805 = vst.msk [vmem:[#allocation2 + $0x1c] sm:$0xf] %vm797_vm7, %v716_v50  ;;  %v714_v52 = vpop.permute.xlu0 %713  ;;  %v4054_v50 = vld [vmem:[%s4708_s19 + $0xa8] sm:$0xf] }
  0x9a   : > { %804 = vst.msk [vmem:[#allocation2 + $0x18] sm:$0xf] %vm797_vm7, %v714_v52  ;;  %1240 = vrot.lane.b32.xlu1 %v4029_v49, %s4658_s22  ;;  %v4063_v49 = vld [vmem:[%s4708_s19 + $0x18] sm:$0xf]  ;;  %v4066_v52 = vld [vmem:[%s4708_s19 + $0x24] sm:$0xf] }
  0x9b   : > { %1238 = vrot.lane.b32.xlu0 %v4028_v51, %s4658_s22  ;;  %v4067_v51 = vld [vmem:[%s4708_s19 + $0x28] sm:$0xf] }
  0x9c   : > { %v720_v54 = vpop.permute.xlu1 %719 }
  0x9d   : > { %807 = vst.msk [vmem:[#allocation2 + $0x24] sm:$0xf] %vm797_vm7, %v720_v54  ;;  %v718_v56 = vpop.permute.xlu0 %717  ;;  %v5168_v54 = vrot.slane %v1425_v39, 5 }
  0x9e   : > { %806 = vst.msk [vmem:[#allocation2 + $0x20] sm:$0xf] %vm797_vm7, %v718_v56  ;;  %1244 = vrot.lane.b32.xlu1 %v4031_v53, %s4658_s22  ;;  %v4062_v53 = vld [vmem:[%s4708_s19 + $0x14] sm:$0x1]  ;;  %v1418_v56 = vrot.slane %v1416_v41, 4 }
  0x9f   : > { %1242 = vrot.lane.b32.xlu0 %v4030_v55, %s4658_s22  ;;  %v1431_v55 = vrot.slane %v1429_v40, 4 }
  0xa0   : > { %v724_v58 = vpop.permute.xlu1 %723 }
  0xa1   : > { %809 = vst.msk [vmem:[#allocation2 + $0x2c] sm:$0xf] %vm797_vm7, %v724_v58  ;;  %v722_v60 = vpop.permute.xlu0 %721 }
  0xa2   : > { %808 = vst.msk [vmem:[#allocation2 + $0x28] sm:$0xf] %vm797_vm7, %v722_v60  ;;  %1248 = vrot.lane.b32.xlu1 %v4033_v57, %s4658_s22  ;;  %v1421_v57 = vrot.slane %v1419_v42, 5  ;;  %v5171_v60 = vrot.slane %v1449_v45, 5  ;;  %v4071_v45 = vld [vmem:[%s4708_s19 + $0x38] sm:$0x1] }
  0xa3   : > { %1246 = vrot.lane.b32.xlu0 %v4032_v59, %s4658_s22  ;;  %v4065_v59 = vld [vmem:[%s4708_s19 + $0x20] sm:$0x1] }
  0xa4   : > { %v728_v63 = vpop.permute.xlu1 %727 }
  0xa5   : > { %811 = vst.msk [vmem:[#allocation2 + $0x34] sm:$0xf] %vm797_vm7, %v728_v63  ;;  %v726_v1 = vpop.permute.xlu0 %725  ;;  %v1440_v63 = vshrl.u32 %v4063_v49, 16 }
  0xa6   : > { %810 = vst.msk [vmem:[#allocation2 + $0x30] sm:$0xf] %vm797_vm7, %v726_v1  ;;  %1252 = vrot.lane.b32.xlu1 %v4035_v61, %s4658_s22  ;;  %v1455_v61 = vrot.slane %v1453_v46, 4 }
  0xa7   : > { %1250 = vrot.lane.b32.xlu0 %v4034_v0, %s4658_s22  ;;  %v1443_v0 = vshll.u32 %v4063_v49, 16 }
  0xa8   : > { %v732_v3 = vpop.permute.xlu1 %731 }
  0xa9   : > { %813 = vst.msk [vmem:[#allocation2 + $0x3c] sm:$0xf] %vm797_vm7, %v732_v3  ;;  %v730_v5 = vpop.permute.xlu0 %729  ;;  %v1477_v3 = vshrl.u32 %v4067_v51, 16 }
  0xaa   : > { %812 = vst.msk [vmem:[#allocation2 + $0x38] sm:$0xf] %vm797_vm7, %v730_v5  ;;  %1256 = vrot.lane.b32.xlu1 %v4037_v2, %s4658_s22  ;;  %v1473_v2 = vshll.u32 %v4067_v51, 16  ;;  %v1467_v5 = vshll.u32 %v4066_v52, 16  ;;  %v1608_v51 = vshrl.u32 %v4084_v37, 16 }
  0xab   : > { %1254 = vrot.lane.b32.xlu0 %v4036_v4, %s4658_s22  ;;  %v1464_v4 = vshrl.u32 %v4066_v52, 16  ;;  %v1611_v52 = vshll.u32 %v4084_v37, 16 }
  0xac   : > { %v736_v7 = vpop.permute.xlu1 %735 }
  0xad   : > { %815 = vst.msk [vmem:[#allocation2 + $0x44] sm:$0xf] %vm797_vm7, %v736_v7  ;;  %v734_v9 = vpop.permute.xlu0 %733  ;;  %v4057_v7 = vld [vmem:[%s4708_s19 + $0xb8] sm:$0xf] }
  0xae   : > { %814 = vst.msk [vmem:[#allocation2 + $0x40] sm:$0xf] %vm797_vm7, %v734_v9  ;;  %1260 = vrot.lane.b32.xlu1 %v4039_v6, %s4658_s22  ;;  %v4070_v6 = vld [vmem:[%s4708_s19 + $0x34] sm:$0xf]  ;;  %v1435_v9 = vshll.u32 %v4062_v53, 16 }
  0xaf   : > { %1258 = vrot.lane.b32.xlu0 %v4038_v8, %s4658_s22  ;;  %v1432_v8 = vor.u32 %v1431_v55, %v5168_v54 }
  0xb0   : > { %v740_v11 = vpop.permute.xlu1 %739 }
  0xb1   : > { %817 = vst.msk [vmem:[#allocation2 + $0x4c] sm:$0xf] %vm797_vm7, %v740_v11  ;;  %v738_v13 = vpop.permute.xlu0 %737  ;;  %v4069_v11 = vld [vmem:[%s4708_s19 + $0x30] sm:$0xf] }
  0xb2   : > { %816 = vst.msk [vmem:[#allocation2 + $0x48] sm:$0xf] %vm797_vm7, %v738_v13  ;;  %1264 = vrot.lane.b32.xlu1 %v4041_v10, %s4658_s22  ;;  %v1459_v10 = vshll.u32 %v4065_v59, 16  ;;  %v4056_v13 = vld [vmem:[%s4708_s19 + $0xb4] sm:$0xf] }
  0xb3   : > { %1262 = vrot.lane.b32.xlu0 %v4040_v12, %s4658_s22  ;;  %v4087_v59 = vld [vmem:[%s4708_s19 + $0x78] sm:$0xf] }
  0xb4   : > { %v744_v15 = vpop.permute.xlu1 %743  ;;  %v1461_v35 = vrot.slane %v1459_v10, 5 }
  0xb5   : > { %819 = vst.msk [vmem:[#allocation2 + $0x54] sm:$0xf] %vm797_vm7, %v744_v15  ;;  %v742_v17 = vpop.permute.xlu0 %741  ;;  %v1456_v15 = vor.u32 %v1455_v61, %v5171_v60 }
  0xb6   : > { %818 = vst.msk [vmem:[#allocation2 + $0x50] sm:$0xf] %vm797_vm7, %v742_v17  ;;  %1268 = vrot.lane.b32.xlu1 %v4043_v14, %s4658_s22  ;;  %v1422_v14 = vor.u32 %v1421_v57, %v1418_v56  ;;  %v1445_v17 = vrot.slane %v1443_v0, 5 }
  0xb7   : > { %1266 = vrot.lane.b32.xlu0 %v4042_v16, %s4658_s22  ;;  %v1442_v16 = vrot.slane %v1440_v63, 4  ;;  %v1457_v39 = vrot.slane %v1456_v15, 4 }
  0xb8   : > { %v748_v19 = vpop.permute.xlu1 %747  ;;  %v1423_v34 = vrot.slane %v1422_v14, 4 }
  0xb9   : > { %821 = vst.msk [vmem:[#allocation2 + $0x5c] sm:$0xf] %vm797_vm7, %v748_v19  ;;  %v746_v21 = vpop.permute.xlu0 %745  ;;  %v5184_v19 = vrot.slane %v1473_v2, 5  ;;  %v1462_v63 = vsel %vm4719_vm2, %v1457_v39, %v1461_v35  ;;  %v1507_v2 = vshll.u32 %v4071_v45, 16 }
  0xba   : > { %820 = vst.msk [vmem:[#allocation2 + $0x58] sm:$0xf] %vm797_vm7, %v746_v21  ;;  %1272 = vrot.lane.b32.xlu1 %v4045_v18, %s4658_s22  ;;  %v1466_v21 = vrot.slane %v1464_v4, 4  ;;  %v1428_v55 = vsel %vm4719_vm2, %v1423_v34, %v5168_v54 }
  0xbb   : > { %1270 = vrot.lane.b32.xlu0 %v4044_v20, %s4658_s22  ;;  %v1479_v20 = vrot.slane %v1477_v3, 4 }
  0xbc   : > { %v752_v23 = vpop.permute.xlu1 %751 }
  0xbd   : > { %823 = vst.msk [vmem:[#allocation2 + $0x64] sm:$0xf] %vm797_vm7, %v752_v23  ;;  %v750_v25 = vpop.permute.xlu0 %749  ;;  %v4068_v23 = vld [vmem:[%s4708_s19 + $0x2c] sm:$0x1]  ;;  %v1480_v40 = vor.u32 %v1479_v20, %v5184_v19  ;;  %v4088_v20 = vld [vmem:[%s4708_s19 + $0x7c] sm:$0xf] }
  0xbe   : > { %822 = vst.msk [vmem:[#allocation2 + $0x60] sm:$0xf] %vm797_vm7, %v750_v25  ;;  %1276 = vrot.lane.b32.xlu1 %v4047_v22, %s4658_s22  ;;  %v1497_v22 = vshll.u32 %v4070_v6, 16  ;;  %v1501_v25 = vshrl.u32 %v4070_v6, 16  ;;  %v1483_v41 = vshll.u32 %v4068_v23, 16  ;;  %v1610_v6 = vrot.slane %v1608_v51, 4 }
  0xbf   : > { %1274 = vrot.lane.b32.xlu0 %v4046_v24, %s4658_s22  ;;  %v1469_v24 = vrot.slane %v1467_v5, 5  ;;  %v1481_v0 = vrot.slane %v1480_v40, 4 }
  0xc0   : > { %v756_v28 = vpop.permute.xlu1 %755  ;;  %v5195_v42 = vrot.slane %v1497_v22, 5  ;;  %v1503_v46 = vrot.slane %v1501_v25, 4 }
  0xc1   : > { %825 = vst.msk [vmem:[#allocation2 + $0x6c] sm:$0xf] %vm797_vm7, %v756_v28  ;;  %v754_v30 = vpop.permute.xlu0 %753  ;;  %v1491_v28 = vshll.u32 %v4069_v11, 16 }
  0xc2   : > { %824 = vst.msk [vmem:[#allocation2 + $0x68] sm:$0xf] %vm797_vm7, %v754_v30  ;;  %1280 = vrot.lane.b32.xlu1 %v4049_v26, %s4658_s22  ;;  %v1488_v26 = vshrl.u32 %v4069_v11, 16  ;;  %v1433_v30 = vrot.slane %v1432_v8, 4  ;;  %v1504_v3 = vor.u32 %v1503_v46, %v5195_v42  ;;  %v1632_v8 = vshrl.u32 %v4087_v59, 16 }
  0xc3   : > { %1278 = vrot.lane.b32.xlu0 %v4048_v29, %s4658_s22  ;;  %v4059_v29 = vld [vmem:[%s4708_s19 + $0xc4] sm:$0xf] }
  0xc4   : > { %v760_v32 = vpop.permute.xlu1 %759 }
  0xc5   : > { %827 = vst.msk [vmem:[#allocation2 + $0x74] sm:$0xf] %vm797_vm7, %v760_v32  ;;  %v758_v36 = vpop.permute.xlu0 %757 }
  0xc6   : > { %826 = vst.msk [vmem:[#allocation2 + $0x70] sm:$0xf] %vm797_vm7, %v758_v36  ;;  %1284 = vrot.lane.b32.xlu1 %v4051_v31, %s4658_s22  ;;  %v1437_v31 = vrot.slane %v1435_v9, 5  ;;  %v1446_v36 = vor.u32 %v1445_v17, %v1442_v16  ;;  %v1635_v9 = vshll.u32 %v4087_v59, 16 }
  0xc7   : > { %1282 = vrot.lane.b32.xlu0 %v4050_v33, %s4658_s22  ;;  %v4058_v33 = vld [vmem:[%s4708_s19 + $0xc0] sm:$0xf] }
  0xc8   : > { %v764_v43 = vpop.permute.xlu1 %763  ;;  %v1438_v49 = vsel %vm4719_vm2, %v1433_v30, %v1437_v31  ;;  %v1447_v56 = vrot.slane %v1446_v36, 4  ;;  %v1641_v31 = vshll.u32 %v4088_v20, 16 }
  0xc9   : > { %829 = vst.msk [vmem:[#allocation2 + $0x7c] sm:$0xf] %vm797_vm7, %v764_v43  ;;  %v762_v47 = vpop.permute.xlu0 %761  ;;  %v4072_v43 = vld [vmem:[%s4708_s19 + $0x3c] sm:$0xf] }
  0xca   : > { %828 = vst.msk [vmem:[#allocation2 + $0x78] sm:$0xf] %vm797_vm7, %v762_v47  ;;  %1288 = vrot.lane.b32.xlu1 %v4053_v38, %s4658_s22  ;;  %v1490_v47 = vrot.slane %v1488_v26, 4  ;;  %v1512_v57 = vshrl.u32 %v4072_v43, 16  ;;  %v1452_v11 = vsel %vm4719_vm2, %v1447_v56, %v5171_v60  ;;  %v1634_v26 = vrot.slane %v1632_v8, 4 }
  0xcb   : > { %1286 = vrot.lane.b32.xlu0 %v4052_v44, %s4658_s22  ;;  %v1470_v44 = vor.u32 %v1469_v24, %v1466_v21  ;;  %v1505_v21 = vrot.slane %v1504_v3, 4  ;;  %v4109_v56 = vld [vmem:[%s4708_s19 + $0x10] sm:$0xf] }
  0xcc   : > { %v1044_v58 = vpop.permute.xlu1 %1043  ;;  %v1514_v14 = vrot.slane %v1512_v57, 4 }
  0xcd   : > { %1139 = vst.msk [vmem:[#allocation2 + $0x4] sm:$0xf] %vm1137_vm8, %v1044_v58  ;;  %v1042_v1 = vpop.permute.xlu0 %1041  ;;  %v1515_v58 = vshll.u32 %v4072_v43, 16  ;;  %v1471_v54 = vrot.slane %v1470_v44, 4  ;;  %v1643_v44 = vrot.slane %v1641_v31, 5 }
  0xce   : > { %1138 = vst.msk [vmem:[#allocation2] sm:$0xf] %vm1137_vm8, %v1042_v1  ;;  %1292 = vrot.lane.b32.xlu1 %v4055_v48, %s4658_s22  ;;  %v1493_v48 = vrot.slane %v1491_v28, 5  ;;  %v1485_v1 = vrot.slane %v1483_v41, 5  ;;  %v1637_v28 = vrot.slane %v1635_v9, 5 }
  0xcf   : > { %1290 = vrot.lane.b32.xlu0 %v4054_v50, %s4658_s22  ;;  %v4085_v50 = vld [vmem:[%s4708_s19 + $0x70] sm:$0xf]  ;;  %v1517_v15 = vrot.slane %v1515_v58, 5  ;;  %v1476_v60 = vsel %vm4719_vm2, %v1471_v54, %v5184_v19 }
  0xd0   : > { %v1048_v12 = vpop.permute.xlu1 %1047  ;;  %v1494_v4 = vor.u32 %v1493_v48, %v1490_v47  ;;  %v1617_v5 = vshll.u32 %v4085_v50, 16  ;;  %v1486_v17 = vsel %vm4719_vm2, %v1481_v0, %v1485_v1  ;;  %v1638_v39 = vor.u32 %v1637_v28, %v1634_v26  ;;  %v4089_v48 = vld [vmem:[%s4708_s19 + $0x80] sm:$0x1]  ;;  %v4135_v26 = vld [vmem:[%s4708_s19 + $0x78] sm:$0xe] }
  0xd1   : > { %1141 = vst.msk [vmem:[#allocation2 + $0xc] sm:$0xf] %vm1137_vm8, %v1048_v12  ;;  %v1046_v18 = vpop.permute.xlu0 %1045  ;;  %v1621_v12 = vshrl.u32 %v4085_v50, 16  ;;  %v1518_v30 = vor.u32 %v1517_v15, %v1514_v14  ;;  %v1651_v58 = vshll.u32 %v4089_v48, 16  ;;  %v2026_v0 = vrot.slane %v4109_v56, 5 }
  0xd2   : > { %1140 = vst.msk [vmem:[#allocation2 + $0x8] sm:$0xf] %vm1137_vm8, %v1046_v18  ;;  %1296 = vrot.lane.b32.xlu1 %v4057_v7, %s4658_s22  ;;  %v1613_v7 = vrot.slane %v1611_v52, 5  ;;  %v1509_v18 = vrot.slane %v1507_v2, 5  ;;  %v1495_v22 = vrot.slane %v1494_v4, 4  ;;  %v1619_v23 = vrot.slane %v1617_v5, 5 }
  0xd3   : > { %1294 = vrot.lane.b32.xlu0 %v4056_v13, %s4658_s22  ;;  %v4073_v13 = vld [vmem:[%s4708_s19 + $0x40] sm:$0xf]  ;;  %v1623_v34 = vrot.slane %v1621_v12, 4  ;;  %v1519_v43 = vrot.slane %v1518_v30, 4  ;;  %v1653_v3 = vrot.slane %v1651_v58, 5 }
  0xd4   : > { %v1052_v32 = vpop.permute.xlu1 %1051  ;;  %v1614_v24 = vor.u32 %v1613_v7, %v1610_v6  ;;  %v1521_v25 = vshll.u32 %v4073_v13, 16  ;;  %v1510_v19 = vsel %vm4719_vm2, %v1505_v21, %v1509_v18  ;;  %v1500_v36 = vsel %vm4719_vm2, %v1495_v22, %v5195_v42  ;;  %v4132_v4 = vld [vmem:[%s4708_s19 + $0x6c] sm:$0xe]  ;;  %v4133_v5 = vld [vmem:[%s4708_s19 + $0x70] sm:$0xf] }
  0xd5   : > { %1143 = vst.msk [vmem:[#allocation2 + $0x14] sm:$0xf] %vm1137_vm8, %v1052_v32  ;;  %v1050_v38 = vpop.permute.xlu0 %1049  ;;  %v1645_v32 = vshrl.u32 %v4088_v20, 16  ;;  %v1624_v45 = vor.u32 %v1623_v34, %v1619_v23  ;;  %v4110_v7 = vld [vmem:[%s4708_s19 + $0x14] sm:$0x1]  ;;  %v4164_v9 = vrot.slane %v4132_v4, 9 }
  0xd6   : > { %1142 = vst.msk [vmem:[#allocation2 + $0x10] sm:$0xf] %vm1137_vm8, %v1050_v38  ;;  %1300 = vrot.lane.b32.xlu1 %v4059_v29, %s4658_s22  ;;  %v1615_v37 = vrot.slane %v1614_v24, 4  ;;  %v5240_v38 = vrot.slane %v1521_v25, 5  ;;  %v2028_v13 = vrot.slane %v2026_v0, 4  ;;  %v2029_v14 = vrot.slane %v4110_v7, 5 }
  0xd7   : > { %1298 = vrot.lane.b32.xlu0 %v4058_v33, %s4658_s22  ;;  %v4086_v33 = vld [vmem:[%s4708_s19 + $0x74] sm:$0x1]  ;;  %v1647_v46 = vrot.slane %v1645_v32, 4  ;;  %v4111_v15 = vld [vmem:[%s4708_s19 + $0x18] sm:$0xe]  ;;  %v4165_v32 = vrot.slane %v4135_v26, 9 }
  0xd8   : > { %v1056_v53 = vpop.permute.xlu1 %1055  ;;  %v1627_v40 = vshll.u32 %v4086_v33, 16  ;;  %v1620_v42 = vsel %vm4719_vm2, %v1615_v37, %v1619_v23  ;;  %v1524_v52 = vsel %vm4719_vm2, %v1519_v43, %v5240_v38  ;;  %v4134_v18 = vld [vmem:[%s4708_s19 + $0x74] sm:$0x1]  ;;  %v2030_v23 = vsel %vm4863_vm6, %v2028_v13, %v2029_v14  ;;  %v4136_v28 = vld [vmem:[%s4708_s19 + $0x7c] sm:$0xf] }
  0xd9   : > { %1145 = vst.msk [vmem:[#allocation2 + $0x1c] sm:$0xf] %vm1137_vm8, %v1056_v53  ;;  %v1054_v61 = vpop.permute.xlu0 %1053  ;;  %v1625_v53 = vrot.slane %v1624_v45, 4  ;;  %v1648_v57 = vor.u32 %v1647_v46, %v1643_v44  ;;  %v2085_v25 = vrot.slane %v4134_v18, 5  ;;  %v4113_v30 = vld [vmem:[%s4708_s19 + $0x20] sm:$0x1] }
  0xda   : > { %1144 = vst.msk [vmem:[#allocation2 + $0x18] sm:$0xf] %vm1137_vm8, %v1054_v61  ;;  %1801 = vrot.lane.b32.xlu1 %v1438_v49, %s4659_s23  ;;  %v1639_v49 = vrot.slane %v1638_v39, 4  ;;  %v1629_v50 = vrot.slane %v1627_v40, 5  ;;  %v2089_v33 = vrot.slane %v4136_v28, 5 }
  0xdb   : > { %1799 = vrot.lane.b32.xlu0 %v1428_v55, %s4659_s23  ;;  %v4108_v55 = vld [vmem:[%s4708_s19 + $0xc] sm:$0xe]  ;;  %v1649_v54 = vrot.slane %v1648_v57, 4  ;;  %v4137_v39 = vld [vmem:[%s4708_s19 + $0x80] sm:$0x1] }
  0xdc   : > { %v1060_v10 = vpop.permute.xlu1 %1059  ;;  %v1644_v61 = vsel %vm4719_vm2, %v1639_v49, %v1643_v44  ;;  %v1630_v2 = vsel %vm4719_vm2, %v1625_v53, %v1629_v50  ;;  %v2090_v40 = vsel %vm4863_vm6, %v4165_v32, %v2089_v33  ;;  %v2091_v45 = vrot.slane %v2089_v33, 4  ;;  %v4205_v48 = vld [vmem:[%s4708_s19 + $0x1c] sm:$0xf]  ;;  %v4228_v50 = vld [vmem:[%s4708_s19 + $0x78] sm:$0xf] }
  0xdd   : > { %1147 = vst.msk [vmem:[#allocation2 + $0x24] sm:$0xf] %vm1137_vm8, %v1060_v10  ;;  %v1058_v16 = vpop.permute.xlu0 %1057  ;;  %v2082_v10 = vrot.slane %v4133_v5, 5  ;;  %v1654_v12 = vsel %vm4719_vm2, %v1649_v54, %v1653_v3  ;;  %v2092_v46 = vrot.slane %v4137_v39, 5  ;;  %v2520_v56 = vshll.u32 %v4205_v48, 16 }
  0xde   : > { %1146 = vst.msk [vmem:[#allocation2 + $0x20] sm:$0xf] %vm1137_vm8, %v1058_v16  ;;  %1805 = vrot.lane.b32.xlu1 %v1462_v63, %s4659_s23  ;;  %v4156_v63 = vrot.slane %v4108_v55, 9  ;;  %v4112_v16 = vld [vmem:[%s4708_s19 + $0x1c] sm:$0xf]  ;;  %v2703_v57 = vshrl.u32 %v4228_v50, 16 }
  0xdf   : > { %1803 = vrot.lane.b32.xlu0 %v1452_v11, %s4659_s23  ;;  %v2083_v20 = vsel %vm4863_vm6, %v4164_v9, %v2082_v10  ;;  %v2033_v21 = vrot.slane %v4112_v16, 5  ;;  %v2084_v24 = vrot.slane %v2082_v10, 4  ;;  %v2093_v53 = vsel %vm4863_vm6, %v2091_v45, %v2092_v46  ;;  %v4173_v3 = vld [vmem:[%s4708_s19 + $0x1c] sm:$0xf]  ;;  %v4206_v10 = vld [vmem:[%s4708_s19 + $0x20] sm:$0x1] }
  0xe0   : > { %v1064_v29 = vpop.permute.xlu1 %1063  ;;  %v2027_v8 = vsel %vm4863_vm6, %v4156_v63, %v2026_v0  ;;  %v4229_v63 = vld [vmem:[%s4708_s19 + $0x7c] sm:$0xf]  ;;  %v2706_v0 = vshll.u32 %v4228_v50, 16  ;;  %v5323_v5 = vrot.slane %v2520_v56, 5  ;;  %v4174_v13 = vld [vmem:[%s4708_s19 + $0x24] sm:$0xf] }
  0xe1   : > { %1149 = vst.msk [vmem:[#allocation2 + $0x2c] sm:$0xf] %vm1137_vm8, %v1064_v29  ;;  %v1062_v35 = vpop.permute.xlu0 %1061  ;;  %v2712_v7 = vshll.u32 %v4229_v63, 16  ;;  %v2716_v14 = vshrl.u32 %v4229_v63, 16  ;;  %v4231_v18 = vld [vmem:[%s4708_s19 + $0x84] sm:$0xf] }
  0xe2   : > { %1148 = vst.msk [vmem:[#allocation2 + $0x28] sm:$0xf] %vm1137_vm8, %v1062_v35  ;;  %1809 = vrot.lane.b32.xlu1 %v1486_v17, %s4659_s23  ;;  %v2086_v35 = vsel %vm4863_vm6, %v2084_v24, %v2085_v25  ;;  %v2708_v9 = vrot.slane %v2706_v0, 5  ;;  %v2727_v32 = vshrl.u32 %v4231_v18, 16  ;;  %v2730_v33 = vshll.u32 %v4231_v18, 16 }
  0xe3   : > { %1807 = vrot.lane.b32.xlu0 %v1476_v60, %s4659_s23  ;;  %v4157_v60 = vrot.slane %v4111_v15, 9  ;;  %v4191_v50 = vld [vmem:[%s4708_s19 + $0x88] sm:$0xf] }
  0xe4   : > { %v1068_v41 = vpop.permute.xlu1 %1067 }
  0xe5   : > { %1151 = vst.msk [vmem:[#allocation2 + $0x34] sm:$0xf] %vm1137_vm8, %v1068_v41  ;;  %v1066_v47 = vpop.permute.xlu0 %1065  ;;  %v2034_v31 = vsel %vm4863_vm6, %v4157_v60, %v2033_v21  ;;  %v4204_v41 = vld [vmem:[%s4708_s19 + $0x18] sm:$0xf]  ;;  %v5333_v60 = vrot.slane %v2712_v7, 5 }
  0xe6   : > { %1150 = vst.msk [vmem:[#allocation2 + $0x30] sm:$0xf] %vm1137_vm8, %v1066_v47  ;;  %1813 = vrot.lane.b32.xlu1 %v1510_v19, %s4659_s23  ;;  %v2035_v19 = vrot.slane %v2033_v21, 4  ;;  %v2514_v49 = vshll.u32 %v4204_v41, 16  ;;  %v2530_v21 = vshll.u32 %v4206_v10, 16 }
  0xe7   : > { %1811 = vrot.lane.b32.xlu0 %v1500_v36, %s4659_s23  ;;  %v2036_v36 = vrot.slane %v4113_v30, 5  ;;  %v4230_v30 = vld [vmem:[%s4708_s19 + $0x80] sm:$0x1]  ;;  %v4233_v7 = vld [vmem:[%s4708_s19 + $0x8c] sm:$0x1] }
  0xe8   : > { %v1072_v51 = vpop.permute.xlu1 %1071  ;;  %v2532_v39 = vrot.slane %v2530_v21, 5  ;;  %v2722_v45 = vshll.u32 %v4230_v30, 16 }
  0xe9   : > { %1153 = vst.msk [vmem:[#allocation2 + $0x3c] sm:$0xf] %vm1137_vm8, %v1072_v51  ;;  %v1070_v59 = vpop.permute.xlu0 %1069  ;;  %v2037_v44 = vsel %vm4863_vm6, %v2035_v19, %v2036_v36  ;;  %v4172_v51 = vld [vmem:[%s4708_s19 + $0x18] sm:$0xf] }
  0xea   : > { %1152 = vst.msk [vmem:[#allocation2 + $0x38] sm:$0xf] %vm1137_vm8, %v1070_v59  ;;  %1831 = vrot.lane.b32.xlu1 %v1620_v42, %s4659_s23  ;;  %v2511_v42 = vshrl.u32 %v4204_v41, 16  ;;  %v2516_v59 = vrot.slane %v2514_v49, 5  ;;  %v2724_v0 = vrot.slane %v2722_v45, 5 }
  0xeb   : > { %1815 = vrot.lane.b32.xlu0 %v1524_v52, %s4659_s23 }
  0xec   : > { %v1076_v1 = vpop.permute.xlu1 %1075  ;;  %v2513_v58 = vrot.slane %v2511_v42, 4  ;;  %v2732_v42 = vrot.slane %v2730_v33, 5  ;;  %v4612_v33 = vld [vmem:[%s6219_s1 + $0x10] ss:$0 sps:$4 sm:$0x33]  }
  0xed   : > { %1155 = vst.msk [vmem:[#allocation2 + $0x44] sm:$0xf] %vm1137_vm8, %v1076_v1  ;;  %v1074_v6 = vpop.permute.xlu0 %1073  ;;  %v4188_v1 = vld [vmem:[%s4708_s19 + $0x78] sm:$0xf]  ;;  %4577 = vmatprep.subr.msk.bf16.mxu0 %vm3548_vm10, %v4612_v33  ;;  %4578 = vmatprep.subr.msk.bf16.mxu1 %vm3548_vm10, %v4612_v33 }
  0xee   : > { %1154 = vst.msk [vmem:[#allocation2 + $0x40] sm:$0xf] %vm1137_vm8, %v1074_v6  ;;  %1835 = vrot.lane.b32.xlu1 %v1644_v61, %s4659_s23  ;;  %v2524_v61 = vshrl.u32 %v4205_v48, 16  ;;  %v2705_v6 = vrot.slane %v2703_v57, 4  ;;  %v2729_v48 = vrot.slane %v2727_v32, 4 }
  0xef   : > { %1833 = vrot.lane.b32.xlu0 %v1630_v2, %s4659_s23  ;;  %v4207_v2 = vld [vmem:[%s4708_s19 + $0x24] sm:$0xf]  ;;  %v4209_v57 = vld [vmem:[%s4708_s19 + $0x2c] sm:$0x1]  ;;  %v4254_v32 = vld [vmem:[%s4708_s19 + $0x20] sm:$0x1] }
  0xf0   : > { %v1080_v11 = vpop.permute.xlu1 %1079  ;;  %v2538_v15 = vshll.u32 %v4207_v2, 16  ;;  %v2709_v25 = vor.u32 %v2708_v9, %v2705_v6 }
  0xf1   : > { %1157 = vst.msk [vmem:[#allocation2 + $0x4c] sm:$0xf] %vm1137_vm8, %v1080_v11  ;;  %v1078_v17 = vpop.permute.xlu0 %1077  ;;  %v2526_v11 = vrot.slane %v2524_v61, 4 }
  0xf2   : > { %1156 = vst.msk [vmem:[#allocation2 + $0x48] sm:$0xf] %vm1137_vm8, %v1078_v17  ;;  %2136 = vrot.lane.b32.xlu1 %v2027_v8, %s4660_s24  ;;  %v2517_v8 = vor.u32 %v2516_v59, %v2513_v58  ;;  %v4189_v17 = vld [vmem:[%s4708_s19 + $0x7c] sm:$0xf] }
  0xf3   : > { %1837 = vrot.lane.b32.xlu0 %v1654_v12, %s4659_s23  ;;  %v2535_v12 = vshrl.u32 %v4207_v2, 16  ;;  %v2527_v26 = vor.u32 %v2526_v11, %v5323_v5  ;;  %v4252_v11 = vld [vmem:[%s4708_s19 + $0x18] sm:$0xe] }
  0xf4   : > { %v1084_v22 = vpop.permute.xlu1 %1083  ;;  %v2518_v24 = vrot.slane %v2517_v8, 4  ;;  %v4300_v21 = vrot.slane %v4252_v11, 9 }
  0xf5   : > { %1159 = vst.msk [vmem:[#allocation2 + $0x54] sm:$0xf] %vm1137_vm8, %v1084_v22  ;;  %v1082_v29 = vpop.permute.xlu0 %1081  ;;  %v4208_v22 = vld [vmem:[%s4708_s19 + $0x28] sm:$0xf]  ;;  %v2537_v28 = vrot.slane %v2535_v12, 4 }
  0xf6   : > { %1158 = vst.msk [vmem:[#allocation2 + $0x50] sm:$0xf] %vm1137_vm8, %v1082_v29  ;;  %2168 = vrot.lane.b32.xlu1 %v2083_v20, %s4660_s24  ;;  %v2540_v29 = vrot.slane %v2538_v15, 5  ;;  %v2544_v19 = vshll.u32 %v4208_v22, 16  ;;  %v2548_v36 = vshrl.u32 %v4208_v22, 16  ;;  %v2523_v41 = vsel %vm4719_vm2, %v2518_v24, %v5323_v5 }
  0xf7   : > { %2138 = vrot.lane.b32.xlu0 %v2030_v23, %s4660_s24  ;;  %v4190_v23 = vld [vmem:[%s4708_s19 + $0x84] sm:$0xf]  ;;  %v4253_v15 = vld [vmem:[%s4708_s19 + $0x1c] sm:$0xf] }
  0xf8   : > { %v1088_v34 = vpop.permute.xlu1 %1087  ;;  %v2541_v46 = vor.u32 %v2540_v29, %v2537_v28  ;;  %v3121_v22 = vrot.slane %v4253_v15, 5  ;;  %v4090_v29 = vld [vmem:[%s4708_s19 + $0x84] sm:$0xf] }
  0xf9   : > { %1161 = vst.msk [vmem:[#allocation2 + $0x5c] sm:$0xf] %vm1137_vm8, %v1088_v34  ;;  %v1086_v37 = vpop.permute.xlu0 %1085 }
  0xfa   : > { %1160 = vst.msk [vmem:[#allocation2 + $0x58] sm:$0xf] %vm1137_vm8, %v1086_v37  ;;  %2140 = vrot.lane.b32.xlu1 %v2034_v31, %s4660_s24  ;;  %v2718_v31 = vrot.slane %v2716_v14, 4  ;;  %v2542_v61 = vrot.slane %v2541_v46, 4  ;;  %v3123_v45 = vrot.slane %v3121_v22, 4  ;;  %v3124_v46 = vrot.slane %v4254_v32, 5 }
  0xfb   : > { %2170 = vrot.lane.b32.xlu0 %v2086_v35, %s4660_s24  ;;  %v4175_v35 = vld [vmem:[%s4708_s19 + $0x28] sm:$0xf] }
  0xfc   : > { %v1092_v43 = vpop.permute.xlu1 %1091 }
  0xfd   : > { %1163 = vst.msk [vmem:[#allocation2 + $0x64] sm:$0xf] %vm1137_vm8, %v1092_v43  ;;  %v1090_v47 = vpop.permute.xlu0 %1089  ;;  %v2710_v43 = vrot.slane %v2709_v25, 4 }
  0xfe   : > { %1162 = vst.msk [vmem:[#allocation2 + $0x60] sm:$0xf] %vm1137_vm8, %v1090_v47  ;;  %2172 = vrot.lane.b32.xlu1 %v2090_v40, %s4660_s24  ;;  %v4232_v40 = vld [vmem:[%s4708_s19 + $0x88] sm:$0xf]  ;;  %v2719_v47 = vor.u32 %v2718_v31, %v5333_v60 }
  0xff   : > { %2142 = vrot.lane.b32.xlu0 %v2037_v44, %s4660_s24  ;;  %v2528_v44 = vrot.slane %v2527_v26, 4  ;;  %v2715_v58 = vsel %vm4719_vm2, %v2710_v43, %v5333_v60 }
 0x100   : > { %v1096_v52 = vpop.permute.xlu1 %1095  ;;  %v2720_v63 = vrot.slane %v2719_v47, 4  ;;  %v4093_v47 = vld [vmem:[%s4708_s19 + $0x90] sm:$0xf] }
 0x101   : > { %1165 = vst.msk [vmem:[#allocation2 + $0x6c] sm:$0xf] %vm1137_vm8, %v1096_v52  ;;  %v1094_v55 = vpop.permute.xlu0 %1093  ;;  %v2736_v52 = vshll.u32 %v4232_v40, 16  ;;  %v2533_v59 = vsel %vm4719_vm2, %v2528_v44, %v2532_v39  ;;  %v1656_v39 = vshrl.u32 %v4090_v29, 16 }
 0x102   : > { %1164 = vst.msk [vmem:[#allocation2 + $0x68] sm:$0xf] %vm1137_vm8, %v1094_v55  ;;  %2333 = vrot.lane.b32.xlu1 %v4172_v51, %s4661_s25  ;;  %v2546_v51 = vrot.slane %v2544_v19, 5  ;;  %v2550_v55 = vrot.slane %v2548_v36, 4  ;;  %v2725_v9 = vsel %vm4719_vm2, %v2720_v63, %v2724_v0  ;;  %v4256_v19 = vld [vmem:[%s4708_s19 + $0x28] sm:$0xf]  ;;  %v3122_v36 = vsel %vm4863_vm6, %v4300_v21, %v3121_v22 }
 0x103   : > { %2174 = vrot.lane.b32.xlu0 %v2093_v53, %s4660_s24  ;;  %v2740_v53 = vshrl.u32 %v4232_v40, 16  ;;  %v1659_v40 = vshll.u32 %v4090_v29, 16  ;;  %v1680_v63 = vshrl.u32 %v4093_v47, 16  ;;  %v1683_v0 = vshll.u32 %v4093_v47, 16 }
 0x104   : > { %v1100_v54 = vpop.permute.xlu1 %1099  ;;  %v2547_v8 = vsel %vm4719_vm2, %v2542_v61, %v2546_v51 }
 0x105   : > { %1167 = vst.msk [vmem:[#allocation2 + $0x74] sm:$0xf] %vm1137_vm8, %v1100_v54  ;;  %v1098_v4 = vpop.permute.xlu0 %1097  ;;  %v2738_v54 = vrot.slane %v2736_v52, 5  ;;  %v2742_v5 = vrot.slane %v2740_v53, 4  ;;  %v1661_v61 = vrot.slane %v1659_v40, 5  ;;  %v1685_v15 = vrot.slane %v1683_v0, 5 }
 0x106   : > { %1166 = vst.msk [vmem:[#allocation2 + $0x70] sm:$0xf] %vm1137_vm8, %v1098_v4  ;;  %2365 = vrot.lane.b32.xlu1 %v4188_v1, %s4661_s25  ;;  %v2733_v1 = vor.u32 %v2732_v42, %v2729_v48  ;;  %v2554_v4 = vshll.u32 %v4209_v57, 16  ;;  %v4280_v57 = vld [vmem:[%s4708_s19 + $0x88] sm:$0xf] }
 0x107   : > { %2335 = vrot.lane.b32.xlu0 %v4173_v3, %s4661_s25  ;;  %v2551_v3 = vor.u32 %v2550_v55, %v2546_v51  ;;  %v4613_v51 = vld [vmem:[%s6219_s1 + $0x8] sm:$0xff]  }
 0x108   : > { %v1104_v16 = vpop.permute.xlu1 %1103  ;;  %v2734_v10 = vrot.slane %v2733_v1, 4  ;;  %v2556_v14 = vrot.slane %v2554_v4, 5 }
 0x109   : > { %1169 = vst.msk [vmem:[#allocation2 + $0x7c] sm:$0xf] %vm1137_vm8, %v1104_v16  ;;  %v1102_v20 = vpop.permute.xlu0 %1101  ;;  %v2743_v16 = vor.u32 %v2742_v5, %v2738_v54 }
 0x10a   : > { %1168 = vst.msk [vmem:[#allocation2 + $0x78] sm:$0xf] %vm1137_vm8, %v1102_v20  ;;  %2337 = vrot.lane.b32.xlu1 %v4174_v13, %s4661_s25  ;;  %v2552_v13 = vrot.slane %v2551_v3, 4  ;;  %v4276_v20 = vld [vmem:[%s4708_s19 + $0x78] sm:$0xe]  ;;  %v2739_v60 = vsel %vm4719_vm2, %v2734_v10, %v2738_v54 }
 0x10b   : > { %2367 = vrot.lane.b32.xlu0 %v4189_v17, %s4661_s25  ;;  %v2746_v17 = vshll.u32 %v4233_v7, 16  ;;  %v2744_v26 = vrot.slane %v2743_v16, 4  ;;  %v4308_v31 = vrot.slane %v4276_v20, 9  ;;  %v4615_v7 = vld [vmem:[%s6219_s1] sm:$0xff]  }
 0x10c   : > { %v1241_v34 = vpop.permute.xlu1 %1240  ;;  %v2557_v25 = vsel %vm4719_vm2, %v2552_v13, %v2556_v14  ;;  %v1682_v14 = vrot.slane %v1680_v63, 4 }
 0x10d   : > { %1336 = vst.msk [vmem:[#allocation2 + $0x4] sm:$0xf] %vm1334_vm9, %v1241_v34  ;;  %v1239_v37 = vpop.permute.xlu0 %1238  ;;  %v2748_v28 = vrot.slane %v2746_v17, 5 }
 0x10e   : > { %1335 = vst.msk [vmem:[#allocation2] sm:$0xf] %vm1334_vm9, %v1239_v37  ;;  %2369 = vrot.lane.b32.xlu1 %v4190_v23, %s4661_s25  ;;  %v4277_v23 = vld [vmem:[%s4708_s19 + $0x7c] sm:$0xf]  ;;  %v4278_v37 = vld [vmem:[%s4708_s19 + $0x80] sm:$0x1]  ;;  %v1686_v29 = vor.u32 %v1685_v15, %v1682_v14 }
 0x10f   : > { %2339 = vrot.lane.b32.xlu0 %v4175_v35, %s4661_s25  ;;  %v3177_v34 = vrot.slane %v4277_v23, 5  ;;  %v4255_v35 = vld [vmem:[%s4708_s19 + $0x24] sm:$0xe]  ;;  %v2749_v44 = vsel %vm4719_vm2, %v2744_v26, %v2748_v28  ;;  %v3180_v55 = vrot.slane %v4278_v37, 5  ;;  %v4281_v23 = vld [vmem:[%s4708_s19 + $0x8c] sm:$0x1] }
 0x110   : > { %v1245_v49 = vpop.permute.xlu1 %1244  ;;  %v4301_v42 = vrot.slane %v4255_v35, 9  ;;  %v3187_v32 = vrot.slane %v4281_v23, 5 }
 0x111   : > { %1338 = vst.msk [vmem:[#allocation2 + $0xc] sm:$0xf] %vm1334_vm9, %v1245_v49  ;;  %v1243_v56 = vpop.permute.xlu0 %1242  ;;  %v3128_v49 = vrot.slane %v4256_v19, 5  ;;  %v3178_v52 = vsel %vm4863_vm6, %v4308_v31, %v3177_v34  ;;  %v3179_v53 = vrot.slane %v3177_v34, 4 }
 0x112   : > { %1337 = vst.msk [vmem:[#allocation2 + $0x8] sm:$0xf] %vm1334_vm9, %v1243_v56  ;;  %2894 = vrot.lane.b32.xlu1 %v2523_v41, %s4662_s26  ;;  %v3550_v41 = vsel %vm3548_vm10, %v4612_v33, 0  ;;  %v4279_v56 = vld [vmem:[%s4708_s19 + $0x84] sm:$0xe] }
 0x113   : > { %2371 = vrot.lane.b32.xlu0 %v4191_v50, %s4661_s25  ;;  %4534 = vmatpush3.bf16.msra.mxu0 %v3550_v41  ;;  %v4091_v50 = vld [vmem:[%s4708_s19 + $0x88] sm:$0xf]  ;;  %v3129_v5 = vsel %vm4863_vm6, %v4301_v42, %v3128_v49  ;;  %v3130_v10 = vrot.slane %v3128_v49, 4 }
 0x114   : > { %v1249_v2 = vpop.permute.xlu1 %1248  ;;  %4574 = vmatpush3.bf16.msra.mxu1 %v3550_v41  ;;  %4535 = vmatprep.subr.bf16.mxu0 %v4613_v51  ;;  %v1665_v54 = vshll.u32 %v4091_v50, 16  ;;  %v1669_v3 = vshrl.u32 %v4091_v50, 16 }
 0x115   : > { %1340 = vst.msk [vmem:[#allocation2 + $0x14] sm:$0xf] %vm1334_vm9, %v1249_v2  ;;  %v1247_v6 = vpop.permute.xlu0 %1246  ;;  %v3125_v2 = vsel %vm4863_vm6, %v3123_v45, %v3124_v46  ;;  %4572 = vmatprep.subr.bf16.mxu1 %v4613_v51  ;;  %v4114_v45 = vld [vmem:[%s4708_s19 + $0x24] sm:$0xe]  ;;  %v4115_v46 = vld [vmem:[%s4708_s19 + $0x28] sm:$0xf] }
 0x116   : > { %1339 = vst.msk [vmem:[#allocation2 + $0x10] sm:$0xf] %vm1334_vm9, %v1247_v6  ;;  %2926 = vrot.lane.b32.xlu1 %v2715_v58, %s4662_s26  ;;  %v4257_v58 = vld [vmem:[%s4708_s19 + $0x2c] sm:$0x1]  ;;  %v4094_v6 = vld [vmem:[%s4708_s19 + $0x94] sm:$0xf] }
 0x117   : > { %2896 = vrot.lane.b32.xlu0 %v2533_v59, %s4662_s26  ;;  %v1658_v59 = vrot.slane %v1656_v39, 4  ;;  %4536 = vmatpush3.bf16.msra.mxu0 %v4613_v51  ;;  %v3131_v11 = vrot.slane %v4257_v58, 5  ;;  %v1667_v17 = vrot.slane %v1665_v54, 5  ;;  %v1693_v20 = vshrl.u32 %v4094_v6, 16  ;;  %v4139_v58 = vld [vmem:[%s4708_s19 + $0x88] sm:$0xf] }
 0x118   : > { %v1253_v12 = vpop.permute.xlu1 %1252  ;;  %4575 = vmatpush3.bf16.msra.mxu1 %v4613_v51  ;;  %4537 = vmatprep.subr.bf16.mxu0 %v4615_v7  ;;  %v1671_v21 = vrot.slane %v1669_v3, 4  ;;  %v1687_v39 = vrot.slane %v1686_v29, 4  ;;  %v4158_v50 = vrot.slane %v4114_v45, 9  ;;  %v2040_v51 = vrot.slane %v4115_v46, 5  ;;  %v4143_v29 = vld [vmem:[%s4708_s19 + $0x98] sm:$0x1] }
 0x119   : > { %1342 = vst.msk [vmem:[#allocation2 + $0x1c] sm:$0xf] %vm1334_vm9, %v1253_v12  ;;  %v1251_v18 = vpop.permute.xlu0 %1250  ;;  %v3181_v12 = vsel %vm4863_vm6, %v3179_v53, %v3180_v55  ;;  %v1662_v13 = vor.u32 %v1661_v61, %v1658_v59  ;;  %4573 = vmatprep.subr.bf16.mxu1 %v4615_v7  ;;  %v1695_v35 = vrot.slane %v1693_v20, 4  ;;  %v4116_v61 = vld [vmem:[%s4708_s19 + $0x2c] sm:$0x1] }
 0x11a   : > { %1341 = vst.msk [vmem:[#allocation2 + $0x18] sm:$0xf] %vm1334_vm9, %v1251_v18  ;;  %2898 = vrot.lane.b32.xlu1 %v2547_v8, %s4662_s26  ;;  %v4309_v8 = vrot.slane %v4279_v56, 9  ;;  %v1689_v18 = vshll.u32 %v4094_v6, 16  ;;  %v1672_v34 = vor.u32 %v1671_v21, %v1667_v17  ;;  %v2041_v63 = vsel %vm4863_vm6, %v4158_v50, %v2040_v51  ;;  %v4118_v6 = vld [vmem:[%s4708_s19 + $0x34] sm:$0xf] }
 0x11b   : > { %2928 = vrot.lane.b32.xlu0 %v2725_v9, %s4662_s26  ;;  %v3184_v9 = vrot.slane %v4280_v57, 5  ;;  %4538 = vmatpush3.bf16.msra.mxu0 %v4615_v7  ;;  %v1663_v26 = vrot.slane %v1662_v13, 4  ;;  %v4138_v57 = vld [vmem:[%s4708_s19 + $0x84] sm:$0xe]  ;;  %v2042_v3 = vrot.slane %v2040_v51, 4 }
 0x11c   : > { %v1257_v24 = vpop.permute.xlu1 %1256  ;;  %4576 = vmatpush3.bf16.msra.mxu1 %v4615_v7  ;;  %v1691_v33 = vrot.slane %v1689_v18, 5  ;;  %v4166_v0 = vrot.slane %v4138_v57, 9  ;;  %v4119_v20 = vld [vmem:[%s4708_s19 + $0x38] sm:$0x1]  ;;  %v4192_v51 = vld [vmem:[%s4708_s19 + $0x90] sm:$0xf] }
 0x11d   : > { %1344 = vst.msk [vmem:[#allocation2 + $0x24] sm:$0xf] %vm1334_vm9, %v1257_v24  ;;  %v1255_v30 = vpop.permute.xlu0 %1254  ;;  %v3185_v24 = vsel %vm4863_vm6, %v4309_v8, %v3184_v9  ;;  %v3186_v28 = vrot.slane %v3184_v9, 4  ;;  %v1668_v37 = vsel %vm4719_vm2, %v1663_v26, %v1667_v17  ;;  %v4140_v8 = vld [vmem:[%s4708_s19 + $0x8c] sm:$0x1]  ;;  %v2050_v26 = vrot.slane %v4119_v20, 5 }
 0x11e   : > { %1343 = vst.msk [vmem:[#allocation2 + $0x20] sm:$0xf] %vm1334_vm9, %v1255_v30  ;;  %2930 = vrot.lane.b32.xlu1 %v2739_v60, %s4662_s26  ;;  %v4092_v60 = vld [vmem:[%s4708_s19 + $0x8c] sm:$0x1]  ;;  %v1696_v47 = vor.u32 %v1695_v35, %v1691_v33  ;;  %v1692_v49 = vsel %vm4719_vm2, %v1687_v39, %v1691_v33  ;;  %v2099_v15 = vrot.slane %v4140_v8, 5  ;;  %v2106_v35 = vrot.slane %v4143_v29, 5 }
 0x11f   : > { %2900 = vrot.lane.b32.xlu0 %v2557_v25, %s4662_s26  ;;  %v3132_v25 = vsel %vm4863_vm6, %v3130_v10, %v3131_v11  ;;  %v1675_v30 = vshll.u32 %v4092_v60, 16  ;;  %v2047_v11 = vrot.slane %v4118_v6, 5  ;;  %v4142_v17 = vld [vmem:[%s4708_s19 + $0x94] sm:$0xf]  ;;  %v4237_v8 = vld [vmem:[%s4708_s19 + $0x9c] sm:$0xf] }
 0x120   : > { %v1261_v43 = vpop.permute.xlu1 %1260  ;;  %v1697_v55 = vrot.slane %v1696_v47, 4  ;;  %v4211_v39 = vld [vmem:[%s4708_s19 + $0x34] sm:$0xf] }
 0x121   : > { %1346 = vst.msk [vmem:[#allocation2 + $0x2c] sm:$0xf] %vm1334_vm9, %v1261_v43  ;;  %v1259_v48 = vpop.permute.xlu0 %1258  ;;  %v1677_v40 = vrot.slane %v1675_v30, 5  ;;  %v3188_v43 = vsel %vm4863_vm6, %v3186_v28, %v3187_v32  ;;  %v4210_v30 = vld [vmem:[%s4708_s19 + $0x30] sm:$0xf] }
 0x122   : > { %1345 = vst.msk [vmem:[#allocation2 + $0x28] sm:$0xf] %vm1334_vm9, %v1259_v48  ;;  %3231 = vrot.lane.b32.xlu1 %v3122_v36, %s4663_s4  ;;  %v4095_v36 = vld [vmem:[%s4708_s19 + $0x98] sm:$0x1] }
 0x123   : > { %2932 = vrot.lane.b32.xlu0 %v2749_v44, %s4662_s26  ;;  %v1673_v44 = vrot.slane %v1672_v34, 4  ;;  %v1699_v48 = vshll.u32 %v4095_v36, 16  ;;  %v2559_v36 = vshrl.u32 %v4210_v30, 16 }
 0x124   : > { %v1265_v1 = vpop.permute.xlu1 %1264 }
 0x125   : > { %1348 = vst.msk [vmem:[#allocation2 + $0x34] sm:$0xf] %vm1334_vm9, %v1265_v1  ;;  %v1263_v4 = vpop.permute.xlu0 %1262  ;;  %v1678_v53 = vsel %vm4719_vm2, %v1673_v44, %v1677_v40  ;;  %v1701_v56 = vrot.slane %v1699_v48, 5  ;;  %v2096_v1 = vrot.slane %v4139_v58, 5  ;;  %v4176_v40 = vld [vmem:[%s4708_s19 + $0x30] sm:$0xf] }
 0x126   : > { %1347 = vst.msk [vmem:[#allocation2 + $0x30] sm:$0xf] %vm1334_vm9, %v1263_v4  ;;  %3263 = vrot.lane.b32.xlu1 %v3178_v52, %s4663_s4  ;;  %v2043_v4 = vrot.slane %v4116_v61, 5  ;;  %v2561_v46 = vrot.slane %v2559_v36, 4  ;;  %v2568_v48 = vshll.u32 %v4211_v39, 16 }
 0x127   : > { %3233 = vrot.lane.b32.xlu0 %v3125_v2, %s4663_s4  ;;  %v1702_v54 = vsel %vm4719_vm2, %v1697_v55, %v1701_v56  ;;  %v2097_v9 = vsel %vm4863_vm6, %v4166_v0, %v2096_v1  ;;  %v2098_v14 = vrot.slane %v2096_v1, 4  ;;  %v4177_v55 = vld [vmem:[%s4708_s19 + $0x34] sm:$0xf]  ;;  %v4213_v56 = vld [vmem:[%s4708_s19 + $0x3c] sm:$0xf] }
 0x128   : > { %v1269_v16 = vpop.permute.xlu1 %1268  ;;  %v2044_v13 = vsel %vm4863_vm6, %v2042_v3, %v2043_v4  ;;  %v4212_v3 = vld [vmem:[%s4708_s19 + $0x38] sm:$0x1]  ;;  %v2583_v4 = vshrl.u32 %v4213_v56, 16 }
 0x129   : > { %1350 = vst.msk [vmem:[#allocation2 + $0x3c] sm:$0xf] %vm1334_vm9, %v1269_v16  ;;  %v1267_v22 = vpop.permute.xlu0 %1266  ;;  %v4141_v16 = vld [vmem:[%s4708_s19 + $0x90] sm:$0xe] }
 0x12a   : > { %1349 = vst.msk [vmem:[#allocation2 + $0x38] sm:$0xf] %vm1334_vm9, %v1267_v22  ;;  %3235 = vrot.lane.b32.xlu1 %v3129_v5, %s4663_s4  ;;  %v4117_v5 = vld [vmem:[%s4708_s19 + $0x30] sm:$0xe]  ;;  %v4167_v21 = vrot.slane %v4141_v16, 9  ;;  %v2103_v22 = vrot.slane %v4142_v17, 5 }
 0x12b   : > { %3265 = vrot.lane.b32.xlu0 %v3181_v12, %s4663_s4  ;;  %v4159_v10 = vrot.slane %v4117_v5, 9  ;;  %v2586_v5 = vshll.u32 %v4213_v56, 16  ;;  %v4194_v17 = vld [vmem:[%s4708_s19 + $0x9c] sm:$0xf] }
 0x12c   : > { %v1273_v31 = vpop.permute.xlu1 %1272  ;;  %v2105_v34 = vrot.slane %v2103_v22, 4 }
 0x12d   : > { %1352 = vst.msk [vmem:[#allocation2 + $0x44] sm:$0xf] %vm1334_vm9, %v1273_v31  ;;  %v1271_v19 = vpop.permute.xlu0 %1270  ;;  %v2048_v60 = vsel %vm4863_vm6, %v4159_v10, %v2047_v11  ;;  %v2104_v31 = vsel %vm4863_vm6, %v4167_v21, %v2103_v22  ;;  %v2588_v20 = vrot.slane %v2586_v5, 5  ;;  %v2778_v21 = vshll.u32 %v4237_v8, 16  ;;  %v4259_v5 = vld [vmem:[%s4708_s19 + $0x34] sm:$0xf] }
 0x12e   : > { %1351 = vst.msk [vmem:[#allocation2 + $0x40] sm:$0xf] %vm1334_vm9, %v1271_v19  ;;  %3267 = vrot.lane.b32.xlu1 %v3185_v24, %s4663_s4  ;;  %v2100_v24 = vsel %vm4863_vm6, %v2098_v14, %v2099_v15  ;;  %v2107_v44 = vsel %vm4863_vm6, %v2105_v34, %v2106_v35  ;;  %v2578_v15 = vshll.u32 %v4212_v3, 16  ;;  %v4195_v35 = vld [vmem:[%s4708_s19 + $0xa0] sm:$0xf] }
 0x12f   : > { %3237 = vrot.lane.b32.xlu0 %v3132_v25, %s4663_s4  ;;  %v2049_v25 = vrot.slane %v2047_v11, 4 }
 0x130   : > { %v1277_v41 = vpop.permute.xlu1 %1276 }
 0x131   : > { %1354 = vst.msk [vmem:[#allocation2 + $0x4c] sm:$0xf] %vm1334_vm9, %v1277_v41  ;;  %v1275_v42 = vpop.permute.xlu0 %1274  ;;  %v2051_v33 = vsel %vm4863_vm6, %v2049_v25, %v2050_v26  ;;  %v4234_v41 = vld [vmem:[%s4708_s19 + $0x90] sm:$0xf]  ;;  %v4236_v26 = vld [vmem:[%s4708_s19 + $0x98] sm:$0x1] }
 0x132   : > { %1353 = vst.msk [vmem:[#allocation2 + $0x48] sm:$0xf] %vm1334_vm9, %v1275_v42  ;;  %1839 = vrot.lane.b32.xlu1 %v1668_v37, %s4659_s23  ;;  %v2562_v37 = vshll.u32 %v4210_v30, 16  ;;  %v2572_v42 = vshrl.u32 %v4211_v39, 16  ;;  %v2754_v50 = vshll.u32 %v4234_v41, 16  ;;  %v2770_v36 = vshll.u32 %v4236_v26, 16 }
 0x133   : > { %3269 = vrot.lane.b32.xlu0 %v3188_v43, %s4663_s4  ;;  %v4238_v30 = vld [vmem:[%s4708_s19 + $0xa0] sm:$0xf]  ;;  %v2780_v39 = vrot.slane %v2778_v21, 5 }
 0x134   : > { %v1281_v52 = vpop.permute.xlu1 %1280  ;;  %v2564_v47 = vrot.slane %v2562_v37, 5  ;;  %v2574_v61 = vrot.slane %v2572_v42, 4  ;;  %v2756_v0 = vrot.slane %v2754_v50, 5 }
 0x135   : > { %1356 = vst.msk [vmem:[#allocation2 + $0x54] sm:$0xf] %vm1334_vm9, %v1281_v52  ;;  %v1279_v59 = vpop.permute.xlu0 %1278  ;;  %v4235_v52 = vld [vmem:[%s4708_s19 + $0x94] sm:$0xf] }
 0x136   : > { %1355 = vst.msk [vmem:[#allocation2 + $0x50] sm:$0xf] %vm1334_vm9, %v1279_v59  ;;  %1843 = vrot.lane.b32.xlu1 %v1692_v49, %s4659_s23  ;;  %v2751_v49 = vshrl.u32 %v4234_v41, 16  ;;  %v2565_v58 = vor.u32 %v2564_v47, %v2561_v46  ;;  %v5518_v59 = vrot.slane %v2568_v48, 5  ;;  %v2760_v1 = vshll.u32 %v4235_v52, 16 }
 0x137   : > { %1841 = vrot.lane.b32.xlu0 %v1678_v53, %s4659_s23 }
 0x138   : > { %v1285_v2 = vpop.permute.xlu1 %1284  ;;  %v2566_v10 = vrot.slane %v2565_v58, 4  ;;  %v2575_v11 = vor.u32 %v2574_v61, %v5518_v59  ;;  %v2762_v14 = vrot.slane %v2760_v1, 5  ;;  %v4239_v61 = vld [vmem:[%s4708_s19 + $0xa4] sm:$0x1] }
 0x139   : > { %1358 = vst.msk [vmem:[#allocation2 + $0x5c] sm:$0xf] %vm1334_vm9, %v1285_v2  ;;  %v1283_v7 = vpop.permute.xlu0 %1282  ;;  %v2764_v2 = vshrl.u32 %v4235_v52, 16 }
 0x13a   : > { %1357 = vst.msk [vmem:[#allocation2 + $0x58] sm:$0xf] %vm1334_vm9, %v1283_v7  ;;  %2144 = vrot.lane.b32.xlu1 %v2041_v63, %s4660_s24  ;;  %v2753_v63 = vrot.slane %v2751_v49, 4  ;;  %v4193_v7 = vld [vmem:[%s4708_s19 + $0x94] sm:$0xf]  ;;  %v2571_v29 = vsel %vm4719_vm2, %v2566_v10, %v5518_v59 }
 0x13b   : > { %1845 = vrot.lane.b32.xlu0 %v1702_v54, %s4659_s23  ;;  %v4178_v54 = vld [vmem:[%s4708_s19 + $0x3c] sm:$0xf]  ;;  %v2766_v16 = vrot.slane %v2764_v2, 4  ;;  %v4283_v10 = vld [vmem:[%s4708_s19 + $0x94] sm:$0xf] }
 0x13c   : > { %v1289_v12 = vpop.permute.xlu1 %1288 }
 0x13d   : > { %1360 = vst.msk [vmem:[#allocation2 + $0x64] sm:$0xf] %vm1334_vm9, %v1289_v12  ;;  %v1287_v18 = vpop.permute.xlu0 %1286  ;;  %v4214_v12 = vld [vmem:[%s4708_s19 + $0x40] sm:$0xf]  ;;  %v2767_v34 = vor.u32 %v2766_v16, %v2762_v14 }
 0x13e   : > { %1359 = vst.msk [vmem:[#allocation2 + $0x60] sm:$0xf] %vm1334_vm9, %v1287_v18  ;;  %2176 = vrot.lane.b32.xlu1 %v2097_v9, %s4660_s24  ;;  %v2585_v18 = vrot.slane %v2583_v4, 4  ;;  %v2596_v25 = vshrl.u32 %v4214_v12, 16  ;;  %v4258_v4 = vld [vmem:[%s4708_s19 + $0x30] sm:$0xe] }
 0x13f   : > { %2146 = vrot.lane.b32.xlu0 %v2044_v13, %s4660_s24  ;;  %v2757_v13 = vor.u32 %v2756_v0, %v2753_v63  ;;  %v2768_v50 = vrot.slane %v2767_v34, 4  ;;  %v4284_v34 = vld [vmem:[%s4708_s19 + $0x98] sm:$0x1] }
 0x140   : > { %v1293_v23 = vpop.permute.xlu1 %1292  ;;  %v2598_v46 = vrot.slane %v2596_v25, 4 }
 0x141   : > { %1362 = vst.msk [vmem:[#allocation2 + $0x6c] sm:$0xf] %vm1334_vm9, %v1293_v23  ;;  %v1291_v28 = vpop.permute.xlu0 %1290  ;;  %v4179_v23 = vld [vmem:[%s4708_s19 + $0x40] sm:$0xf] }
 0x142   : > { %1361 = vst.msk [vmem:[#allocation2 + $0x68] sm:$0xf] %vm1334_vm9, %v1291_v28  ;;  %2148 = vrot.lane.b32.xlu1 %v2048_v60, %s4660_s24  ;;  %v2775_v60 = vshrl.u32 %v4237_v8, 16 }
 0x143   : > { %2178 = vrot.lane.b32.xlu0 %v2100_v24, %s4660_s24  ;;  %v2592_v24 = vshll.u32 %v4214_v12, 16  ;;  %v4302_v12 = vrot.slane %v4258_v4, 9  ;;  %v4287_v4 = vld [vmem:[%s4708_s19 + $0xa4] sm:$0x1] }
 0x144   : > { %v1297_v32 = vpop.permute.xlu1 %1296  ;;  %v2777_v37 = vrot.slane %v2775_v60, 4 }
 0x145   : > { %1364 = vst.msk [vmem:[#allocation2 + $0x74] sm:$0xf] %vm1334_vm9, %v1297_v32  ;;  %v1295_v19 = vpop.permute.xlu0 %1294  ;;  %v2576_v32 = vrot.slane %v2575_v11, 4  ;;  %v2594_v41 = vrot.slane %v2592_v24, 5 }
 0x146   : > { %1363 = vst.msk [vmem:[#allocation2 + $0x70] sm:$0xf] %vm1334_vm9, %v1295_v19  ;;  %2180 = vrot.lane.b32.xlu1 %v2104_v31, %s4660_s24  ;;  %v2758_v31 = vrot.slane %v2757_v13, 4  ;;  %v2589_v19 = vor.u32 %v2588_v20, %v2585_v18  ;;  %v3135_v13 = vrot.slane %v4259_v5, 5  ;;  %v4631_v20 = vld [vmem:[%s4708_s19 + $0x40] sm:$0xf] }
 0x147   : > { %2150 = vrot.lane.b32.xlu0 %v2051_v33, %s4660_s24  ;;  %v2580_v33 = vrot.slane %v2578_v15, 5  ;;  %v1525_v60 = vshrl.u32 %v4631_v20, 16  ;;  %v4098_v5 = vld [vmem:[%s4708_s19 + $0xa4] sm:$0x1]  ;;  %v3201_v20 = vrot.slane %v4287_v4, 5 }
 0x148   : > { %v1301_v43 = vpop.permute.xlu1 %1300  ;;  %v2763_v48 = vsel %vm4719_vm2, %v2758_v31, %v2762_v14  ;;  %v2590_v49 = vrot.slane %v2589_v19, 4  ;;  %v4260_v14 = vld [vmem:[%s4708_s19 + $0x38] sm:$0x1]  ;;  %v3137_v24 = vrot.slane %v3135_v13, 4  ;;  %v3136_v26 = vsel %vm4863_vm6, %v4302_v12, %v3135_v13  ;;  %v4100_v12 = vld [vmem:[%s4708_s19 + $0xac] sm:$0xf] }
 0x149   : > { %1366 = vst.msk [vmem:[#allocation2 + $0x7c] sm:$0xf] %vm1334_vm9, %v1301_v43  ;;  %v1299_v45 = vpop.permute.xlu0 %1298  ;;  %v2784_v43 = vshll.u32 %v4238_v30, 16  ;;  %v2581_v42 = vsel %vm4719_vm2, %v2576_v32, %v2580_v33  ;;  %v3138_v25 = vrot.slane %v4260_v14, 5  ;;  %v4262_v33 = vld [vmem:[%s4708_s19 + $0x40] sm:$0xf] }
 0x14a   : > { %1365 = vst.msk [vmem:[#allocation2 + $0x78] sm:$0xf] %vm1334_vm9, %v1299_v45  ;;  %2341 = vrot.lane.b32.xlu1 %v4176_v40, %s4661_s25  ;;  %v4215_v45 = vld [vmem:[%s4708_s19 + $0x44] sm:$0x1]  ;;  %v2595_v63 = vsel %vm4719_vm2, %v2590_v49, %v2594_v41  ;;  %v3194_v49 = vrot.slane %v4284_v34, 5 }
 0x14b   : > { %2182 = vrot.lane.b32.xlu0 %v2107_v44, %s4660_s24  ;;  %v2788_v44 = vshrl.u32 %v4238_v30, 16  ;;  %v2602_v52 = vshll.u32 %v4215_v45, 16  ;;  %v2786_v56 = vrot.slane %v2784_v43, 5  ;;  %v4096_v30 = vld [vmem:[%s4708_s19 + $0x9c] sm:$0xf] }
 0x14c   : > { %v1802_v53 = vpop.permute.xlu1 %1801  ;;  %v1704_v45 = vshrl.u32 %v4096_v30, 16 }
 0x14d   : > { %1897 = vst.msk [vmem:[#allocation2 + $0x4] sm:$0xf] %vm1895_vm11, %v1802_v53  ;;  %v1800_v57 = vpop.permute.xlu0 %1799  ;;  %v2790_v58 = vrot.slane %v2788_v44, 4  ;;  %v2604_v1 = vrot.slane %v2602_v52, 5 }
 0x14e   : > { %1896 = vst.msk [vmem:[#allocation2] sm:$0xf] %vm1895_vm11, %v1800_v57  ;;  %2373 = vrot.lane.b32.xlu1 %v4192_v51, %s4661_s25  ;;  %v2781_v51 = vor.u32 %v2780_v39, %v2777_v37  ;;  %v2599_v57 = vor.u32 %v2598_v46, %v2594_v41  ;;  %v4286_v37 = vld [vmem:[%s4708_s19 + $0xa0] sm:$0xf]  ;;  %v4263_v39 = vld [vmem:[%s4708_s19 + $0x44] sm:$0x1] }
 0x14f   : > { %2343 = vrot.lane.b32.xlu0 %v4177_v55, %s4661_s25  ;;  %v2772_v55 = vrot.slane %v2770_v36, 5  ;;  %v4074_v41 = vld [vmem:[%s4708_s19 + $0x44] sm:$0x1]  ;;  %v1707_v46 = vshll.u32 %v4096_v30, 16 }
 0x150   : > { %v1806_v6 = vpop.permute.xlu1 %1805  ;;  %v2782_v0 = vrot.slane %v2781_v51, 4  ;;  %v2600_v3 = vrot.slane %v2599_v57, 4  ;;  %v3139_v51 = vsel %vm4863_vm6, %v3137_v24, %v3138_v25  ;;  %v1737_v25 = vshll.u32 %v4100_v12, 16 }
 0x151   : > { %1899 = vst.msk [vmem:[#allocation2 + $0xc] sm:$0xf] %vm1895_vm11, %v1806_v6  ;;  %v1804_v9 = vpop.permute.xlu0 %1803  ;;  %v2791_v6 = vor.u32 %v2790_v58, %v2786_v56  ;;  %v3145_v58 = vrot.slane %v4263_v39, 5 }
 0x152   : > { %1898 = vst.msk [vmem:[#allocation2 + $0x8] sm:$0xf] %vm1895_vm11, %v1804_v9  ;;  %2345 = vrot.lane.b32.xlu1 %v4178_v54, %s4661_s25  ;;  %v2773_v54 = vsel %vm4719_vm2, %v2768_v50, %v2772_v55  ;;  %v4282_v9 = vld [vmem:[%s4708_s19 + $0x90] sm:$0xe]  ;;  %v2787_v11 = vsel %vm4719_vm2, %v2782_v0, %v2786_v56  ;;  %v2605_v16 = vsel %vm4719_vm2, %v2600_v3, %v2604_v1  ;;  %v4076_v55 = vld [vmem:[%s4708_s19 + $0x4c] sm:$0xf] }
 0x153   : > { %2375 = vrot.lane.b32.xlu0 %v4193_v7, %s4661_s25  ;;  %v2794_v7 = vshll.u32 %v4239_v61, 16  ;;  %v1531_v61 = vshll.u32 %v4074_v41, 16  ;;  %v1739_v41 = vrot.slane %v1737_v25, 5 }
 0x154   : > { %v1810_v22 = vpop.permute.xlu1 %1809 }
 0x155   : > { %1901 = vst.msk [vmem:[#allocation2 + $0x14] sm:$0xf] %vm1895_vm11, %v1810_v22  ;;  %v1808_v28 = vpop.permute.xlu0 %1807  ;;  %v2796_v18 = vrot.slane %v2794_v7, 5  ;;  %v4310_v22 = vrot.slane %v4282_v9, 9  ;;  %v1549_v7 = vshrl.u32 %v4076_v55, 16 }
 0x156   : > { %1900 = vst.msk [vmem:[#allocation2 + $0x10] sm:$0xf] %vm1895_vm11, %v1808_v28  ;;  %2377 = vrot.lane.b32.xlu1 %v4194_v17, %s4661_s25  ;;  %v2792_v17 = vrot.slane %v2791_v6, 4  ;;  %v4261_v28 = vld [vmem:[%s4708_s19 + $0x3c] sm:$0xe]  ;;  %v1545_v6 = vshll.u32 %v4076_v55, 16 }
 0x157   : > { %2347 = vrot.lane.b32.xlu0 %v4179_v23, %s4661_s25  ;;  %v3191_v23 = vrot.slane %v4283_v10, 5  ;;  %v1551_v24 = vrot.slane %v1549_v7, 4 }
 0x158   : > { %v1814_v40 = vpop.permute.xlu1 %1813  ;;  %v2797_v32 = vsel %vm4719_vm2, %v2792_v17, %v2796_v18  ;;  %v4099_v18 = vld [vmem:[%s4708_s19 + $0xa8] sm:$0xf] }
 0x159   : > { %1903 = vst.msk [vmem:[#allocation2 + $0x1c] sm:$0xf] %vm1895_vm11, %v1814_v40  ;;  %v1812_v47 = vpop.permute.xlu0 %1811  ;;  %v3192_v36 = vsel %vm4863_vm6, %v4310_v22, %v3191_v23  ;;  %v1527_v40 = vrot.slane %v1525_v60, 4 }
 0x15a   : > { %1902 = vst.msk [vmem:[#allocation2 + $0x18] sm:$0xf] %vm1895_vm11, %v1812_v47  ;;  %2902 = vrot.lane.b32.xlu1 %v2571_v29, %s4662_s26  ;;  %v4097_v29 = vld [vmem:[%s4708_s19 + $0xa0] sm:$0xf]  ;;  %v4303_v47 = vrot.slane %v4261_v28, 9 }
 0x15b   : > { %2379 = vrot.lane.b32.xlu0 %v4195_v35, %s4661_s25  ;;  %v4285_v35 = vld [vmem:[%s4708_s19 + $0x9c] sm:$0xe]  ;;  %v1713_v43 = vshll.u32 %v4097_v29, 16  ;;  %v1717_v44 = vshrl.u32 %v4097_v29, 16  ;;  %v4077_v29 = vld [vmem:[%s4708_s19 + $0x50] sm:$0x1] }
 0x15c   : > { %v1832_v53 = vpop.permute.xlu1 %1831  ;;  %v4311_v52 = vrot.slane %v4285_v35, 9 }
 0x15d   : > { %1912 = vst.msk [vmem:[#allocation2 + $0x40] sm:$0xf] %vm1895_vm11, %v1832_v53  ;;  %v1816_v59 = vpop.permute.xlu0 %1815  ;;  %v3198_v53 = vrot.slane %v4286_v37, 5  ;;  %v5608_v0 = vrot.slane %v1713_v43, 5  ;;  %v1719_v1 = vrot.slane %v1717_v44, 4 }
 0x15e   : > { %1904 = vst.msk [vmem:[#allocation2 + $0x20] sm:$0xf] %vm1895_vm11, %v1816_v59  ;;  %2934 = vrot.lane.b32.xlu1 %v2763_v48, %s4662_s26  ;;  %v3142_v48 = vrot.slane %v4262_v33, 5  ;;  %v1528_v59 = vor.u32 %v1527_v40, %v5240_v38  ;;  %v1731_v33 = vshll.u32 %v4099_v18, 16  ;;  %v1555_v40 = vshll.u32 %v4077_v29, 16 }
 0x15f   : > { %2904 = vrot.lane.b32.xlu0 %v2581_v42, %s4662_s26  ;;  %v3193_v42 = vrot.slane %v3191_v23, 4  ;;  %v3199_v9 = vsel %vm4863_vm6, %v4311_v52, %v3198_v53  ;;  %v3200_v17 = vrot.slane %v3198_v53, 4  ;;  %v1720_v60 = vor.u32 %v1719_v1, %v5608_v0  ;;  %v4148_v29 = vld [vmem:[%s4708_s19 + $0xac] sm:$0xf] }
 0x160   : > { %v1836_v2 = vpop.permute.xlu1 %1835  ;;  %v3144_v57 = vrot.slane %v3142_v48, 4  ;;  %v3143_v3 = vsel %vm4863_vm6, %v4303_v47, %v3142_v48  ;;  %v5628_v23 = vrot.slane %v1545_v6, 5  ;;  %v4101_v47 = vld [vmem:[%s4708_s19 + $0xb0] sm:$0x1]  ;;  %v1557_v52 = vrot.slane %v1555_v40, 5 }
 0x161   : > { %1914 = vst.msk [vmem:[#allocation2 + $0x48] sm:$0xf] %vm1895_vm11, %v1836_v2  ;;  %v1834_v8 = vpop.permute.xlu0 %1833  ;;  %v1706_v2 = vrot.slane %v1704_v45, 4  ;;  %v3195_v38 = vsel %vm4863_vm6, %v3193_v42, %v3194_v49  ;;  %v1733_v42 = vrot.slane %v1731_v33, 5  ;;  %v1747_v55 = vshll.u32 %v4101_v47, 16 }
 0x162   : > { %1913 = vst.msk [vmem:[#allocation2 + $0x44] sm:$0xf] %vm1895_vm11, %v1834_v8  ;;  %2906 = vrot.lane.b32.xlu1 %v2595_v63, %s4662_s26  ;;  %v4075_v63 = vld [vmem:[%s4708_s19 + $0x48] sm:$0xf]  ;;  %v3146_v14 = vsel %vm4863_vm6, %v3144_v57, %v3145_v58  ;;  %v1552_v39 = vor.u32 %v1551_v24, %v5628_v23  ;;  %v4145_v6 = vld [vmem:[%s4708_s19 + $0xa0] sm:$0xf] }
 0x163   : > { %2936 = vrot.lane.b32.xlu0 %v2773_v54, %s4662_s26  ;;  %v1709_v54 = vrot.slane %v1707_v46, 5  ;;  %v1536_v10 = vshrl.u32 %v4075_v63, 16 }
 0x164   : > { %v2137_v15 = vpop.permute.xlu1 %2136 }
 0x165   : > { %2233 = vst.msk [vmem:[#allocation2] sm:$0xf] %vm2232_vm12, %v2137_v15  ;;  %v1838_v21 = vpop.permute.xlu0 %1837  ;;  %v1529_v15 = vrot.slane %v1528_v59, 4  ;;  %v1710_v22 = vor.u32 %v1709_v54, %v1706_v2  ;;  %v1538_v30 = vrot.slane %v1536_v10, 4 }
 0x166   : > { %1915 = vst.msk [vmem:[#allocation2 + $0x4c] sm:$0xf] %vm1895_vm11, %v1838_v21  ;;  %2938 = vrot.lane.b32.xlu1 %v2787_v11, %s4662_s26  ;;  %v1539_v11 = vshll.u32 %v4075_v63, 16  ;;  %v1723_v21 = vshll.u32 %v4098_v5, 16  ;;  %v4122_v5 = vld [vmem:[%s4708_s19 + $0x44] sm:$0x1] }
 0x167   : > { %2908 = vrot.lane.b32.xlu0 %v2605_v16, %s4662_s26  ;;  %v1533_v16 = vrot.slane %v1531_v61, 5  ;;  %v1711_v45 = vrot.slane %v1710_v22, 4  ;;  %v4121_v61 = vld [vmem:[%s4708_s19 + $0x40] sm:$0xf] }
 0x168   : > { %v2169_v31 = vpop.permute.xlu1 %2168  ;;  %v1725_v37 = vrot.slane %v1723_v21, 5  ;;  %v2054_v54 = vrot.slane %v4121_v61, 5  ;;  %v4181_v61 = vld [vmem:[%s4708_s19 + $0x4c] sm:$0xf] }
 0x169   : > { %2249 = vst.msk [vmem:[#allocation2 + $0x40] sm:$0xf] %vm2232_vm12, %v2169_v31  ;;  %v2139_v19 = vpop.permute.xlu0 %2138  ;;  %v1541_v31 = vrot.slane %v1539_v11, 5  ;;  %v1534_v35 = vsel %vm4719_vm2, %v1529_v15, %v1533_v16  ;;  %v1716_v57 = vsel %vm4719_vm2, %v1711_v45, %v5608_v0  ;;  %v1749_v0 = vrot.slane %v1747_v55, 5  ;;  %v4146_v16 = vld [vmem:[%s4708_s19 + $0xa4] sm:$0x1] }
 0x16a   : > { %2234 = vst.msk [vmem:[#allocation2 + $0x4] sm:$0xf] %vm2232_vm12, %v2139_v19  ;;  %3239 = vrot.lane.b32.xlu1 %v3136_v26, %s4663_s4  ;;  %v1741_v26 = vshrl.u32 %v4100_v12, 16  ;;  %v3202_v19 = vsel %vm4863_vm6, %v3200_v17, %v3201_v20  ;;  %v2056_v10 = vrot.slane %v2054_v54, 4  ;;  %v2057_v11 = vrot.slane %v4122_v5, 5 }
 0x16b   : > { %2940 = vrot.lane.b32.xlu0 %v2797_v32, %s4662_s26  ;;  %v1728_v32 = vshrl.u32 %v4099_v18, 16  ;;  %v1542_v46 = vor.u32 %v1541_v31, %v1538_v30  ;;  %v2110_v12 = vrot.slane %v4145_v6, 5  ;;  %v4124_v17 = vld [vmem:[%s4708_s19 + $0x4c] sm:$0xf]  ;;  %v4144_v20 = vld [vmem:[%s4708_s19 + $0x9c] sm:$0xe] }
 0x16c   : > { %v2141_v50 = vpop.permute.xlu1 %2140  ;;  %v1743_v43 = vrot.slane %v1741_v26, 4  ;;  %v2113_v22 = vrot.slane %v4146_v16, 5  ;;  %v4168_v26 = vrot.slane %v4144_v20, 9  ;;  %v4123_v31 = vld [vmem:[%s4708_s19 + $0x48] sm:$0xe] }
 0x16d   : > { %2235 = vst.msk [vmem:[#allocation2 + $0x8] sm:$0xf] %vm2232_vm12, %v2141_v50  ;;  %v2171_v56 = vpop.permute.xlu0 %2170  ;;  %v1730_v48 = vrot.slane %v1728_v32, 4  ;;  %v1543_v58 = vrot.slane %v1542_v46, 4  ;;  %v2112_v21 = vrot.slane %v2110_v12, 4 }
 0x16e   : > { %2250 = vst.msk [vmem:[#allocation2 + $0x44] sm:$0xf] %vm2232_vm12, %v2171_v56  ;;  %3271 = vrot.lane.b32.xlu1 %v3192_v36, %s4663_s4  ;;  %v1721_v36 = vrot.slane %v1720_v60, 4  ;;  %v1744_v53 = vor.u32 %v1743_v43, %v1739_v41  ;;  %v2058_v60 = vsel %vm4863_vm6, %v2056_v10, %v2057_v11  ;;  %v4197_v11 = vld [vmem:[%s4708_s19 + $0xac] sm:$0xf] }
 0x16f   : > { %3241 = vrot.lane.b32.xlu0 %v3139_v51, %s4663_s4  ;;  %v1553_v51 = vrot.slane %v1552_v39, 4  ;;  %v1734_v59 = vor.u32 %v1733_v42, %v1730_v48  ;;  %v2114_v32 = vsel %vm4863_vm6, %v2112_v21, %v2113_v22  ;;  %v4149_v39 = vld [vmem:[%s4708_s19 + $0xb0] sm:$0x1]  ;;  %v4182_v21 = vld [vmem:[%s4708_s19 + $0x54] sm:$0xf] }
 0x170   : > { %v2173_v8 = vpop.permute.xlu1 %2172  ;;  %v1726_v50 = vsel %vm4719_vm2, %v1721_v36, %v1725_v37  ;;  %v1745_v2 = vrot.slane %v1744_v53, 4  ;;  %v2111_v36 = vsel %vm4863_vm6, %v4168_v26, %v2110_v12  ;;  %v4161_v37 = vrot.slane %v4123_v31, 9 }
 0x171   : > { %2251 = vst.msk [vmem:[#allocation2 + $0x48] sm:$0xf] %vm2232_vm12, %v2173_v8  ;;  %v2143_v13 = vpop.permute.xlu0 %2142  ;;  %v1558_v1 = vsel %vm4719_vm2, %v1553_v51, %v1557_v52  ;;  %v1735_v4 = vrot.slane %v1734_v59, 4  ;;  %v4120_v8 = vld [vmem:[%s4708_s19 + $0x3c] sm:$0xe]  ;;  %v2120_v45 = vrot.slane %v4149_v39, 5 }
 0x172   : > { %2236 = vst.msk [vmem:[#allocation2 + $0xc] sm:$0xf] %vm2232_vm12, %v2143_v13  ;;  %3243 = vrot.lane.b32.xlu1 %v3143_v3, %s4663_s4  ;;  %v4160_v15 = vrot.slane %v4120_v8, 9  ;;  %v4199_v39 = vld [vmem:[%s4708_s19 + $0xb8] sm:$0xf] }
 0x173   : > { %3273 = vrot.lane.b32.xlu0 %v3195_v38, %s4663_s4  ;;  %v1548_v38 = vsel %vm4719_vm2, %v1543_v58, %v5628_v23  ;;  %v2061_v23 = vrot.slane %v4124_v17, 5  ;;  %v4183_v17 = vld [vmem:[%s4708_s19 + $0x58] sm:$0xf] }
 0x174   : > { %v2334_v28 = vpop.permute.xlu1 %2333  ;;  %v2055_v25 = vsel %vm4863_vm6, %v4160_v15, %v2054_v54  ;;  %v4218_v54 = vld [vmem:[%s4708_s19 + $0x50] sm:$0x1]  ;;  %v4220_v15 = vld [vmem:[%s4708_s19 + $0x58] sm:$0xf] }
 0x175   : > { %2430 = vst.msk [vmem:[#allocation2] sm:$0xf] %vm2429_vm13, %v2334_v28  ;;  %v2175_v34 = vpop.permute.xlu0 %2174  ;;  %v4125_v28 = vld [vmem:[%s4708_s19 + $0x50] sm:$0x1]  ;;  %v2063_v33 = vrot.slane %v2061_v23, 4  ;;  %v2062_v47 = vsel %vm4863_vm6, %v4161_v37, %v2061_v23  ;;  %v2626_v12 = vshll.u32 %v4218_v54, 16 }
 0x176   : > { %2252 = vst.msk [vmem:[#allocation2 + $0x4c] sm:$0xf] %vm2232_vm12, %v2175_v34  ;;  %3275 = vrot.lane.b32.xlu1 %v3199_v9, %s4663_s4  ;;  %v1750_v9 = vsel %vm4719_vm2, %v1745_v2, %v1749_v0  ;;  %v2064_v34 = vrot.slane %v4125_v28, 5  ;;  %v4180_v0 = vld [vmem:[%s4708_s19 + $0x48] sm:$0xf] }
 0x177   : > { %3245 = vrot.lane.b32.xlu0 %v3146_v14, %s4663_s4  ;;  %v1740_v14 = vsel %vm4719_vm2, %v1735_v4, %v1739_v41  ;;  %v4147_v41 = vld [vmem:[%s4708_s19 + $0xa8] sm:$0xe]  ;;  %v2628_v26 = vrot.slane %v2626_v12, 5  ;;  %v4242_v28 = vld [vmem:[%s4708_s19 + $0xb0] sm:$0x1] }
 0x178   : > { %v2366_v44 = vpop.permute.xlu1 %2365  ;;  %v2065_v43 = vsel %vm4863_vm6, %v2063_v33, %v2064_v34  ;;  %v4169_v48 = vrot.slane %v4147_v41, 9  ;;  %v4244_v34 = vld [vmem:[%s4708_s19 + $0xb8] sm:$0xf]  ;;  %v4243_v37 = vld [vmem:[%s4708_s19 + $0xb4] sm:$0xf] }
 0x179   : > { %2446 = vst.msk [vmem:[#allocation2 + $0x40] sm:$0xf] %vm2429_vm13, %v2366_v44  ;;  %v2336_v49 = vpop.permute.xlu0 %2335 }
 0x17a   : > { %2431 = vst.msk [vmem:[#allocation2 + $0x4] sm:$0xf] %vm2429_vm13, %v2336_v49  ;;  %1817 = vrot.lane.b32.xlu1 %v1534_v35, %s4659_s23  ;;  %v2117_v35 = vrot.slane %v4148_v29, 5  ;;  %v4217_v49 = vld [vmem:[%s4708_s19 + $0x4c] sm:$0xf]  ;;  %v2640_v29 = vshll.u32 %v4220_v15, 16 }
 0x17b   : > { %3277 = vrot.lane.b32.xlu0 %v3202_v19, %s4663_s4 }
 0x17c   : > { %v2338_v56 = vpop.permute.xlu1 %2337  ;;  %v2119_v44 = vrot.slane %v2117_v35, 4  ;;  %v2118_v53 = vsel %vm4863_vm6, %v4169_v48, %v2117_v35 }
 0x17d   : > { %2432 = vst.msk [vmem:[#allocation2 + $0x8] sm:$0xf] %vm2429_vm13, %v2338_v56  ;;  %v2368_v63 = vpop.permute.xlu0 %2367  ;;  %v2616_v56 = vshll.u32 %v4217_v49, 16 }
 0x17e   : > { %2447 = vst.msk [vmem:[#allocation2 + $0x44] sm:$0xf] %vm2429_vm13, %v2368_v63  ;;  %1849 = vrot.lane.b32.xlu1 %v1726_v50, %s4659_s23  ;;  %v4216_v50 = vld [vmem:[%s4708_s19 + $0x48] sm:$0xf]  ;;  %v2121_v51 = vsel %vm4863_vm6, %v2119_v44, %v2120_v45  ;;  %v4241_v63 = vld [vmem:[%s4708_s19 + $0xac] sm:$0xf] }
 0x17f   : > { %1847 = vrot.lane.b32.xlu0 %v1716_v57, %s4659_s23  ;;  %v2620_v57 = vshrl.u32 %v4217_v49, 16  ;;  %v2607_v58 = vshrl.u32 %v4216_v50, 16  ;;  %v2610_v59 = vshll.u32 %v4216_v50, 16  ;;  %v2812_v8 = vshrl.u32 %v4241_v63, 16 }
 0x180   : > { %v2370_v3 = vpop.permute.xlu1 %2369  ;;  %v2818_v44 = vshll.u32 %v4242_v28, 16  ;;  %v2836_v49 = vshrl.u32 %v4244_v34, 16 }
 0x181   : > { %2448 = vst.msk [vmem:[#allocation2 + $0x48] sm:$0xf] %vm2429_vm13, %v2370_v3  ;;  %v2340_v7 = vpop.permute.xlu0 %2339  ;;  %v2622_v4 = vrot.slane %v2620_v57, 4  ;;  %v2609_v5 = vrot.slane %v2607_v58, 4  ;;  %v2612_v6 = vrot.slane %v2610_v59, 5  ;;  %v2814_v23 = vrot.slane %v2812_v8, 4 }
 0x182   : > { %2433 = vst.msk [vmem:[#allocation2 + $0xc] sm:$0xf] %vm2429_vm13, %v2340_v7  ;;  %1821 = vrot.lane.b32.xlu1 %v1558_v1, %s4659_s23  ;;  %v4240_v1 = vld [vmem:[%s4708_s19 + $0xa8] sm:$0xf]  ;;  %v2808_v7 = vshll.u32 %v4241_v63, 16  ;;  %v2838_v54 = vrot.slane %v2836_v49, 4 }
 0x183   : > { %1819 = vrot.lane.b32.xlu0 %v1548_v38, %s4659_s23  ;;  %v5723_v38 = vrot.slane %v2616_v56, 5  ;;  %v2802_v10 = vshll.u32 %v4240_v1, 16  ;;  %v2613_v20 = vor.u32 %v2612_v6, %v2609_v5  ;;  %v4245_v6 = vld [vmem:[%s4708_s19 + $0xbc] sm:$0x1] }
 0x184   : > { %v2895_v13 = vpop.permute.xlu1 %2894  ;;  %v5738_v22 = vrot.slane %v2808_v7, 5 }
 0x185   : > { %2991 = vst.msk [vmem:[#allocation2] sm:$0xf] %vm2990_vm14, %v2895_v13  ;;  %v2372_v18 = vpop.permute.xlu0 %2371  ;;  %v2614_v41 = vrot.slane %v2613_v20, 4  ;;  %v4265_v20 = vld [vmem:[%s4708_s19 + $0x4c] sm:$0xf] }
 0x186   : > { %2449 = vst.msk [vmem:[#allocation2 + $0x4c] sm:$0xf] %vm2429_vm13, %v2372_v18  ;;  %1853 = vrot.lane.b32.xlu1 %v1750_v9, %s4659_s23  ;;  %v2799_v9 = vshrl.u32 %v4240_v1, 16  ;;  %v2623_v18 = vor.u32 %v2622_v4, %v5723_v38 }
 0x187   : > { %1851 = vrot.lane.b32.xlu0 %v1740_v14, %s4659_s23  ;;  %v4196_v14 = vld [vmem:[%s4708_s19 + $0xa8] sm:$0xf]  ;;  %v2619_v4 = vsel %vm4719_vm2, %v2614_v41, %v5723_v38  ;;  %v5807_v41 = vld [vmem:[%s4708_s19 + $0x58] sm:$0xf] }
 0x188   : > { %v2927_v24 = vpop.permute.xlu1 %2926 }
 0x189   : > { %3007 = vst.msk [vmem:[#allocation2 + $0x40] sm:$0xf] %vm2990_vm14, %v2927_v24  ;;  %v2897_v30 = vpop.permute.xlu0 %2896  ;;  %v2801_v24 = vrot.slane %v2799_v9, 4 }
 0x18a   : > { %2992 = vst.msk [vmem:[#allocation2 + $0x4] sm:$0xf] %vm2990_vm14, %v2897_v30  ;;  %2154 = vrot.lane.b32.xlu1 %v2058_v60, %s4660_s24  ;;  %v4219_v60 = vld [vmem:[%s4708_s19 + $0x54] sm:$0xf]  ;;  %v2644_v30 = vshrl.u32 %v4220_v15, 16 }
 0x18b   : > { %2152 = vrot.lane.b32.xlu0 %v2055_v25, %s4660_s24  ;;  %v2804_v25 = vrot.slane %v2802_v10, 5  ;;  %v2634_v33 = vshll.u32 %v4219_v60, 16 }
 0x18c   : > { %v2899_v19 = vpop.permute.xlu1 %2898  ;;  %v2646_v48 = vrot.slane %v2644_v30, 4 }
 0x18d   : > { %2993 = vst.msk [vmem:[#allocation2 + $0x8] sm:$0xf] %vm2990_vm14, %v2899_v19  ;;  %v2929_v40 = vpop.permute.xlu0 %2928  ;;  %v2805_v45 = vor.u32 %v2804_v25, %v2801_v24  ;;  %v3149_v25 = vrot.slane %v4265_v20, 5 }
 0x18e   : > { %3008 = vst.msk [vmem:[#allocation2 + $0x44] sm:$0xf] %vm2990_vm14, %v2929_v40  ;;  %2186 = vrot.lane.b32.xlu1 %v2114_v32, %s4660_s24  ;;  %v2631_v32 = vshrl.u32 %v4219_v60, 16  ;;  %v4198_v40 = vld [vmem:[%s4708_s19 + $0xb4] sm:$0xf] }
 0x18f   : > { %2184 = vrot.lane.b32.xlu0 %v2111_v36, %s4660_s24  ;;  %v2624_v36 = vrot.slane %v2623_v18, 4  ;;  %v2806_v1 = vrot.slane %v2805_v45, 4 }
 0x190   : > { %v2931_v46 = vpop.permute.xlu1 %2930 }
 0x191   : > { %3009 = vst.msk [vmem:[#allocation2 + $0x48] sm:$0xf] %vm2990_vm14, %v2931_v46  ;;  %v2901_v42 = vpop.permute.xlu0 %2900  ;;  %v4221_v46 = vld [vmem:[%s4708_s19 + $0x5c] sm:$0x1]  ;;  %v2629_v58 = vsel %vm4719_vm2, %v2624_v36, %v2628_v26  ;;  %v5789_v26 = vld [vmem:[%s4708_s19 + $0xac] sm:$0xf] }
 0x192   : > { %2994 = vst.msk [vmem:[#allocation2 + $0xc] sm:$0xf] %vm2990_vm14, %v2901_v42  ;;  %2158 = vrot.lane.b32.xlu1 %v2065_v43, %s4660_s24  ;;  %v2815_v43 = vor.u32 %v2814_v23, %v5738_v22  ;;  %v2832_v42 = vshll.u32 %v4244_v34, 16  ;;  %v2650_v63 = vshll.u32 %v4221_v46, 16  ;;  %v3205_v34 = vrot.slane %v5789_v26, 5 }
 0x193   : > { %2156 = vrot.lane.b32.xlu0 %v2062_v47, %s4660_s24  ;;  %v5753_v47 = vrot.slane %v2640_v29, 5  ;;  %v4288_v46 = vld [vmem:[%s4708_s19 + $0xa8] sm:$0xe] }
 0x194   : > { %v3232_v52 = vpop.permute.xlu1 %3231  ;;  %v2816_v59 = vrot.slane %v2815_v43, 4  ;;  %v2652_v12 = vrot.slane %v2650_v63, 5 }
 0x195   : > { %3328 = vst.msk [vmem:[#allocation2] sm:$0xf] %vm3327_vm15, %v3232_v52  ;;  %v2933_v55 = vpop.permute.xlu0 %2932  ;;  %v2636_v52 = vrot.slane %v2634_v33, 5  ;;  %v4264_v33 = vld [vmem:[%s4708_s19 + $0x48] sm:$0xe] }
 0x196   : > { %3010 = vst.msk [vmem:[#allocation2 + $0x4c] sm:$0xf] %vm2990_vm14, %v2933_v55  ;;  %2190 = vrot.lane.b32.xlu1 %v2121_v51, %s4660_s24  ;;  %v2633_v51 = vrot.slane %v2631_v32, 4  ;;  %v2826_v55 = vshll.u32 %v4243_v37, 16  ;;  %v4304_v45 = vrot.slane %v4264_v33, 9 }
 0x197   : > { %2188 = vrot.lane.b32.xlu0 %v2118_v53, %s4660_s24  ;;  %v2823_v53 = vshrl.u32 %v4243_v37, 16  ;;  %v3151_v37 = vrot.slane %v3149_v25, 4 }
 0x198   : > { %v3264_v2 = vpop.permute.xlu1 %3263  ;;  %v2637_v5 = vor.u32 %v2636_v52, %v2633_v51  ;;  %v2828_v8 = vrot.slane %v2826_v55, 5  ;;  %v3207_v52 = vrot.slane %v3205_v34, 4  ;;  %v3156_v55 = vrot.slane %v5807_v41, 5  ;;  %v4106_v41 = vld [vmem:[%s4708_s19 + $0xc4] sm:$0xf] }
 0x199   : > { %3344 = vst.msk [vmem:[#allocation2 + $0x40] sm:$0xf] %vm3327_vm15, %v3264_v2  ;;  %v3234_v3 = vpop.permute.xlu0 %3233  ;;  %v2647_v2 = vor.u32 %v2646_v48, %v5753_v47  ;;  %v2825_v7 = vrot.slane %v2823_v53, 4  ;;  %v5815_v48 = vld [vmem:[%s4708_s19 + $0xb8] sm:$0xf]  ;;  %v3150_v63 = vsel %vm4863_vm6, %v4304_v45, %v3149_v25 }
 0x19a   : > { %3329 = vst.msk [vmem:[#allocation2 + $0x4] sm:$0xf] %vm3327_vm15, %v3234_v3  ;;  %2351 = vrot.lane.b32.xlu1 %v4181_v61, %s4661_s25  ;;  %v2820_v61 = vrot.slane %v2818_v44, 5 }
 0x19b   : > { %2349 = vrot.lane.b32.xlu0 %v4180_v0, %s4661_s25  ;;  %v5763_v0 = vrot.slane %v2832_v42, 5  ;;  %v2648_v38 = vrot.slane %v2647_v2, 4  ;;  %v2829_v18 = vor.u32 %v2828_v8, %v2825_v7  ;;  %v4267_v2 = vld [vmem:[%s4708_s19 + $0x54] sm:$0xe] }
 0x19c   : > { %v3236_v13 = vpop.permute.xlu1 %3235 }
 0x19d   : > { %3330 = vst.msk [vmem:[#allocation2 + $0x8] sm:$0xf] %vm3327_vm15, %v3236_v13  ;;  %v3266_v16 = vpop.permute.xlu0 %3265  ;;  %v2839_v13 = vor.u32 %v2838_v54, %v5763_v0  ;;  %v2830_v30 = vrot.slane %v2829_v18, 4  ;;  %v3212_v54 = vrot.slane %v5815_v48, 5  ;;  %v4305_v18 = vrot.slane %v4267_v2, 9 }
 0x19e   : > { %3345 = vst.msk [vmem:[#allocation2 + $0x44] sm:$0xf] %vm3327_vm15, %v3266_v16  ;;  %2383 = vrot.lane.b32.xlu1 %v4197_v11, %s4661_s25  ;;  %v2821_v11 = vsel %vm4719_vm2, %v2816_v59, %v2820_v61  ;;  %v2811_v16 = vsel %vm4719_vm2, %v2806_v1, %v5738_v22  ;;  %v2653_v22 = vsel %vm4719_vm2, %v2648_v38, %v2652_v12  ;;  %v4102_v59 = vld [vmem:[%s4708_s19 + $0xb4] sm:$0xf]  ;;  %v4312_v1 = vrot.slane %v4288_v46, 9 }
 0x19f   : > { %2381 = vrot.lane.b32.xlu0 %v4196_v14, %s4661_s25  ;;  %v2842_v14 = vshll.u32 %v4245_v6, 16  ;;  %v2840_v23 = vrot.slane %v2839_v13, 4  ;;  %v2835_v44 = vsel %vm4719_vm2, %v2830_v30, %v5763_v0  ;;  %v4293_v0 = vld [vmem:[%s4708_s19 + $0xbc] sm:$0x1]  ;;  %v1752_v38 = vshrl.u32 %v4102_v59, 16 }
 0x1a0   : > { %v3268_v31 = vpop.permute.xlu1 %3267  ;;  %v1755_v12 = vshll.u32 %v4102_v59, 16  ;;  %v3214_v20 = vrot.slane %v3212_v54, 4  ;;  %v4105_v48 = vld [vmem:[%s4708_s19 + $0xc0] sm:$0xf] }
 0x1a1   : > { %3346 = vst.msk [vmem:[#allocation2 + $0x48] sm:$0xf] %vm3327_vm15, %v3268_v31  ;;  %v3238_v35 = vpop.permute.xlu0 %3237  ;;  %v4614_v19 = vld [vmem:[#allocation2] sm:$0xff]   ;;  %v2844_v24 = vrot.slane %v2842_v14, 5  ;;  %v4266_v31 = vld [vmem:[%s4708_s19 + $0x50] sm:$0x1] }
 0x1a2   : > { %3331 = vst.msk [vmem:[#allocation2 + $0xc] sm:$0xf] %vm3327_vm15, %v3238_v35  ;;  %2355 = vrot.lane.b32.xlu1 %v4183_v17, %s4661_s25  ;;  %4539 = vmatprep.mubr.msk.bf16.mxu0 %vm3499_vm0, %v4614_v19  ;;  %v2638_v17 = vrot.slane %v2637_v5, 4  ;;  %v4079_v35 = vld [vmem:[%s4708_s19 + $0x58] sm:$0xf]  ;;  %v3158_v14 = vrot.slane %v3156_v55, 4 }
 0x1a3   : > { %2353 = vrot.lane.b32.xlu0 %v4182_v21, %s4661_s25  ;;  %v4078_v19 = vld [vmem:[%s4708_s19 + $0x54] sm:$0xf]  ;;  %v2845_v36 = vsel %vm4719_vm2, %v2840_v23, %v2844_v24  ;;  %v1569_v42 = vshll.u32 %v4079_v35, 16  ;;  %v1573_v49 = vshrl.u32 %v4079_v35, 16 }
 0x1a4   : > { %v1840_v50 = vpop.permute.xlu1 %1839  ;;  %v2643_v29 = vsel %vm4719_vm2, %v2638_v17, %v5753_v47  ;;  %v1563_v51 = vshll.u32 %v4078_v19, 16  ;;  %v3206_v17 = vsel %vm4863_vm6, %v4312_v1, %v3205_v34  ;;  %v4104_v34 = vld [vmem:[%s4708_s19 + $0xbc] sm:$0x1]  ;;  %v1779_v1 = vshll.u32 %v4105_v48, 16 }
 0x1a5   : > { %1916 = vst.msk [vmem:[#allocation2 + $0x50] sm:$0xf] %vm1895_vm11, %v1840_v50  ;;  %v3270_v56 = vpop.permute.xlu0 %3269  ;;  %v4616_v57 = vld [vmem:[#allocation2 + $0x40] sm:$0xff]   ;;  %v1560_v50 = vshrl.u32 %v4078_v19, 16  ;;  %v5833_v5 = vrot.slane %v1569_v42, 5  ;;  %v1575_v6 = vrot.slane %v1573_v49, 4 }
 0x1a6   : > { %3347 = vst.msk [vmem:[#allocation2 + $0x4c] sm:$0xf] %vm3327_vm15, %v3270_v56  ;;  %2387 = vrot.lane.b32.xlu1 %v4199_v39, %s4661_s25  ;;  %4555 = vmatprep.mubr.msk.bf16.mxu1 %vm3499_vm0, %v4616_v57  ;;  %v3152_v39 = vrot.slane %v4266_v31, 5  ;;  %v4269_v57 = vld [vmem:[%s4708_s19 + $0x5c] sm:$0x1]  ;;  %v1565_v8 = vrot.slane %v1563_v51, 5 }
 0x1a7   : > { %2385 = vrot.lane.b32.xlu0 %v4198_v40, %s4661_s25  ;;  %v4290_v40 = vld [vmem:[%s4708_s19 + $0xb0] sm:$0x1]  ;;  %v1562_v7 = vrot.slane %v1560_v50, 4  ;;  %v1576_v24 = vor.u32 %v1575_v6, %v5833_v5  ;;  %v1754_v31 = vrot.slane %v1752_v38, 4  ;;  %v1771_v50 = vshll.u32 %v4104_v34, 16 }
 0x1a8   : > { %v1844_v3 = vpop.permute.xlu1 %1843  ;;  %v3208_v53 = vrot.slane %v4290_v40, 5  ;;  %v3153_v56 = vsel %vm4863_vm6, %v3151_v37, %v3152_v39  ;;  %v3157_v37 = vsel %vm4863_vm6, %v4305_v18, %v3156_v55  ;;  %v1785_v55 = vshll.u32 %v4106_v41, 16  ;;  %v4128_v34 = vld [vmem:[%s4708_s19 + $0x5c] sm:$0x1] }
 0x1a9   : > { %1918 = vst.msk [vmem:[#allocation2 + $0x58] sm:$0xf] %vm1895_vm11, %v1844_v3  ;;  %v1842_v9 = vpop.permute.xlu0 %1841  ;;  %v4617_v10 = vld [vmem:[#allocation2 + $0x8] sm:$0xff]   ;;  %v1566_v26 = vor.u32 %v1565_v8, %v1562_v7  ;;  %v1577_v46 = vrot.slane %v1576_v24, 4  ;;  %v4127_v24 = vld [vmem:[%s4708_s19 + $0x58] sm:$0xf] }
 0x1aa   : > { %1917 = vst.msk [vmem:[#allocation2 + $0x54] sm:$0xf] %vm1895_vm11, %v1842_v9  ;;  %2912 = vrot.lane.b32.xlu1 %v2629_v58, %s4662_s26  ;;  %4540 = vmatmul.mubr.msk.bf16.vlgmr.msra.gmra.mxu0 %vm3499_vm0, %v4617_v10  ;;  %v4103_v58 = vld [vmem:[%s4708_s19 + $0xb8] sm:$0xf]  ;;  %v4080_v9 = vld [vmem:[%s4708_s19 + $0x5c] sm:$0x1]  ;;  %v3209_v13 = vsel %vm4863_vm6, %v3207_v52, %v3208_v53 }
 0x1ab   : > { %2910 = vrot.lane.b32.xlu0 %v2619_v4, %s4662_s26  ;;  %v4291_v4 = vld [vmem:[%s4708_s19 + $0xb4] sm:$0xe]  ;;  %v1761_v10 = vshll.u32 %v4103_v58, 16  ;;  %v1579_v25 = vshll.u32 %v4080_v9, 16  ;;  %v1567_v42 = vrot.slane %v1566_v26, 4  ;;  %v1787_v8 = vrot.slane %v1785_v55, 5 }
 0x1ac   : > { %v2145_v15 = vpop.permute.xlu1 %2144  ;;  %v4313_v23 = vrot.slane %v4291_v4, 9  ;;  %v1773_v4 = vrot.slane %v1771_v50, 5 }
 0x1ad   : > { %2237 = vst.msk [vmem:[#allocation2 + $0x10] sm:$0xf] %vm2232_vm12, %v2145_v15  ;;  %v1846_v60 = vpop.permute.xlu0 %1845  ;;  %v4618_v21 = vld [vmem:[#allocation2 + $0x48] sm:$0xff]   ;;  %v3159_v15 = vrot.slane %v4269_v57, 5 }
 0x1ae   : > { %1919 = vst.msk [vmem:[#allocation2 + $0x5c] sm:$0xf] %vm1895_vm11, %v1846_v60  ;;  %2944 = vrot.lane.b32.xlu1 %v2821_v11, %s4662_s26  ;;  %4556 = vmatmul.mubr.msk.bf16.vlgmr.msra.gmra.mxu1 %vm3499_vm0, %v4618_v21  ;;  %v1765_v11 = vshrl.u32 %v4103_v58, 16  ;;  %v3215_v60 = vrot.slane %v4293_v0, 5  ;;  %v4082_v21 = vld [vmem:[%s4708_s19 + $0x64] sm:$0xf]  ;;  %v3213_v45 = vsel %vm4863_vm6, %v4313_v23, %v3212_v54  ;;  %v1572_v54 = vsel %vm4719_vm2, %v1567_v42, %v5833_v5 }
 0x1af   : > { %2942 = vrot.lane.b32.xlu0 %v2811_v16, %s4662_s26  ;;  %v3160_v33 = vsel %vm4863_vm6, %v3158_v14, %v3159_v15  ;;  %v1593_v35 = vshll.u32 %v4082_v21, 16  ;;  %v1597_v19 = vshrl.u32 %v4082_v21, 16  ;;  %v4083_v58 = vld [vmem:[%s4708_s19 + $0x68] sm:$0x1]  ;;  %v1781_v14 = vrot.slane %v1779_v1, 5 }
 0x1b0   : > { %v2177_v28 = vpop.permute.xlu1 %2176  ;;  %v1767_v30 = vrot.slane %v1765_v11, 4  ;;  %v1603_v7 = vshll.u32 %v4083_v58, 16  ;;  %v4150_v42 = vld [vmem:[%s4708_s19 + $0xb4] sm:$0xe]  ;;  %v4154_v58 = vld [vmem:[%s4708_s19 + $0xc4] sm:$0xf] }
 0x1b1   : > { %2253 = vst.msk [vmem:[#allocation2 + $0x50] sm:$0xf] %vm2232_vm12, %v2177_v28  ;;  %v2147_v32 = vpop.permute.xlu0 %2146  ;;  %v4081_v28 = vld [vmem:[%s4708_s19 + $0x60] sm:$0xf]  ;;  %v5868_v52 = vrot.slane %v1593_v35, 5  ;;  %v1599_v53 = vrot.slane %v1597_v19, 4 }
 0x1b2   : > { %2238 = vst.msk [vmem:[#allocation2 + $0x14] sm:$0xf] %vm2232_vm12, %v2147_v32  ;;  %2916 = vrot.lane.b32.xlu1 %v2653_v22, %s4662_s26  ;;  %v1757_v32 = vrot.slane %v1755_v12, 5  ;;  %v1584_v39 = vshrl.u32 %v4081_v28, 16  ;;  %v1587_v40 = vshll.u32 %v4081_v28, 16 }
 0x1b3   : > { %2914 = vrot.lane.b32.xlu0 %v2643_v29, %s4662_s26  ;;  %v5849_v29 = vrot.slane %v1761_v10, 5  ;;  %v1600_v6 = vor.u32 %v1599_v53, %v5868_v52  ;;  %v4107_v12 = vld [vmem:[%s4708_s19 + $0xc8] sm:$0x1]  ;;  %v4151_v35 = vld [vmem:[%s4708_s19 + $0xb8] sm:$0xf] }
 0x1b4   : > { %v2149_v43 = vpop.permute.xlu1 %2148  ;;  %v1758_v51 = vor.u32 %v1757_v32, %v1754_v31  ;;  %v1586_v59 = vrot.slane %v1584_v39, 4 }
 0x1b5   : > { %2239 = vst.msk [vmem:[#allocation2 + $0x18] sm:$0xf] %vm2232_vm12, %v2149_v43  ;;  %v2179_v47 = vpop.permute.xlu0 %2178  ;;  %v1768_v49 = vor.u32 %v1767_v30, %v5849_v29  ;;  %v2068_v30 = vrot.slane %v4127_v24, 5  ;;  %v4185_v24 = vld [vmem:[%s4708_s19 + $0x64] sm:$0xf] }
 0x1b6   : > { %2254 = vst.msk [vmem:[#allocation2 + $0x54] sm:$0xf] %vm2232_vm12, %v2179_v47  ;;  %2948 = vrot.lane.b32.xlu1 %v2845_v36, %s4662_s26  ;;  %v1581_v47 = vrot.slane %v1579_v25, 5  ;;  %v1759_v11 = vrot.slane %v1758_v51, 4 }
 0x1b7   : > { %2946 = vrot.lane.b32.xlu0 %v2835_v44, %s4662_s26  ;;  %v3216_v44 = vsel %vm4863_vm6, %v3214_v20, %v3215_v60  ;;  %v1795_v20 = vshll.u32 %v4107_v12, 16  ;;  %v2070_v39 = vrot.slane %v2068_v30, 4 }
 0x1b8   : > { %v2181_v61 = vpop.permute.xlu1 %2180  ;;  %v1582_v0 = vsel %vm4719_vm2, %v1577_v46, %v1581_v47  ;;  %v1764_v21 = vsel %vm4719_vm2, %v1759_v11, %v5849_v29  ;;  %v4152_v46 = vld [vmem:[%s4708_s19 + $0xbc] sm:$0x1]  ;;  %v4130_v47 = vld [vmem:[%s4708_s19 + $0x64] sm:$0xf] }
 0x1b9   : > { %2255 = vst.msk [vmem:[#allocation2 + $0x58] sm:$0xf] %vm2232_vm12, %v2181_v61  ;;  %v2151_v3 = vpop.permute.xlu0 %2150  ;;  %v1589_v61 = vrot.slane %v1587_v40, 5  ;;  %v1797_v29 = vrot.slane %v1795_v20, 5  ;;  %v2071_v40 = vrot.slane %v4128_v34, 5  ;;  %v2127_v51 = vrot.slane %v4152_v46, 5 }
 0x1ba   : > { %2240 = vst.msk [vmem:[#allocation2 + $0x1c] sm:$0xf] %vm2232_vm12, %v2151_v3  ;;  %3249 = vrot.lane.b32.xlu1 %v3153_v56, %s4663_s4  ;;  %v1789_v56 = vshrl.u32 %v4106_v41, 16  ;;  %v1769_v3 = vrot.slane %v1768_v49, 4  ;;  %v2124_v41 = vrot.slane %v4151_v35, 5 }
 0x1bb   : > { %3247 = vrot.lane.b32.xlu0 %v3150_v63, %s4663_s4  ;;  %v1776_v63 = vshrl.u32 %v4105_v48, 16  ;;  %v1590_v38 = vor.u32 %v1589_v61, %v1586_v59  ;;  %v2072_v49 = vsel %vm4863_vm6, %v2070_v39, %v2071_v40  ;;  %v4129_v61 = vld [vmem:[%s4708_s19 + $0x60] sm:$0xe]  ;;  %v4226_v46 = vld [vmem:[%s4708_s19 + $0x70] sm:$0xf] }
 0x1bc   : > { %v2342_v16 = vpop.permute.xlu1 %2341  ;;  %v1791_v9 = vrot.slane %v1789_v56, 4  ;;  %v1774_v5 = vsel %vm4719_vm2, %v1769_v3, %v1773_v4  ;;  %v2126_v50 = vrot.slane %v2124_v41, 4  ;;  %v4170_v56 = vrot.slane %v4150_v42, 9  ;;  %v4187_v42 = vld [vmem:[%s4708_s19 + $0x70] sm:$0xf] }
 0x1bd   : > { %2434 = vst.msk [vmem:[#allocation2 + $0x10] sm:$0xf] %vm2429_vm13, %v2342_v16  ;;  %v2183_v22 = vpop.permute.xlu0 %2182  ;;  %v1601_v16 = vrot.slane %v1600_v6, 4  ;;  %v4163_v4 = vrot.slane %v4129_v61, 9  ;;  %v4155_v6 = vld [vmem:[%s4708_s19 + $0xc8] sm:$0x1] }
 0x1be   : > { %2256 = vst.msk [vmem:[#allocation2 + $0x5c] sm:$0xf] %vm2232_vm12, %v2183_v22  ;;  %3281 = vrot.lane.b32.xlu1 %v3209_v13, %s4663_s4  ;;  %v1778_v13 = vrot.slane %v1776_v63, 4  ;;  %v1792_v18 = vor.u32 %v1791_v9, %v1787_v8  ;;  %v1591_v22 = vrot.slane %v1590_v38, 4  ;;  %v2128_v63 = vsel %vm4863_vm6, %v2126_v50, %v2127_v51  ;;  %v4225_v51 = vld [vmem:[%s4708_s19 + $0x6c] sm:$0xf] }
 0x1bf   : > { %3279 = vrot.lane.b32.xlu0 %v3206_v17, %s4663_s4  ;;  %v1605_v17 = vrot.slane %v1603_v7, 5  ;;  %v2125_v3 = vsel %vm4863_vm6, %v4170_v56, %v2124_v41  ;;  %v2134_v11 = vrot.slane %v4155_v6, 5  ;;  %v4201_v41 = vld [vmem:[%s4708_s19 + $0xc4] sm:$0xf]  ;;  %v2688_v61 = vshll.u32 %v4226_v46, 16 }
 0x1c0   : > { %v2374_v36 = vpop.permute.xlu1 %2373  ;;  %v1782_v23 = vor.u32 %v1781_v14, %v1778_v13  ;;  %v1793_v28 = vrot.slane %v1792_v18, 4  ;;  %v1596_v32 = vsel %vm4719_vm2, %v1591_v22, %v5868_v52  ;;  %v2075_v52 = vrot.slane %v4130_v47, 5  ;;  %v4223_v14 = vld [vmem:[%s4708_s19 + $0x64] sm:$0xf] }
 0x1c1   : > { %2450 = vst.msk [vmem:[#allocation2 + $0x50] sm:$0xf] %vm2429_vm13, %v2374_v36  ;;  %v2344_v43 = vpop.permute.xlu0 %2343  ;;  %v1606_v26 = vsel %vm4719_vm2, %v1601_v16, %v1605_v17  ;;  %v4126_v36 = vld [vmem:[%s4708_s19 + $0x54] sm:$0xe]  ;;  %v2664_v17 = vshll.u32 %v4223_v14, 16  ;;  %v2668_v18 = vshrl.u32 %v4223_v14, 16 }
 0x1c2   : > { %2435 = vst.msk [vmem:[#allocation2 + $0x14] sm:$0xf] %vm2429_vm13, %v2344_v43  ;;  %3253 = vrot.lane.b32.xlu1 %v3160_v33, %s4663_s4  ;;  %v1783_v33 = vrot.slane %v1782_v23, 4  ;;  %v2077_v1 = vrot.slane %v2075_v52, 4  ;;  %v2076_v12 = vsel %vm4863_vm6, %v4163_v4, %v2075_v52  ;;  %v4186_v52 = vld [vmem:[%s4708_s19 + $0x6c] sm:$0xf] }
 0x1c3   : > { %3251 = vrot.lane.b32.xlu0 %v3157_v37, %s4663_s4  ;;  %v1798_v37 = vsel %vm4719_vm2, %v1793_v28, %v1797_v29  ;;  %v4247_v28 = vld [vmem:[%s4708_s19 + $0xc4] sm:$0xf]  ;;  %v4246_v29 = vld [vmem:[%s4708_s19 + $0xc0] sm:$0xf] }
 0x1c4   : > { %v2346_v57 = vpop.permute.xlu1 %2345  ;;  %v2847_v39 = vshrl.u32 %v4246_v29, 16  ;;  %v2850_v40 = vshll.u32 %v4246_v29, 16 }
 0x1c5   : > { %2436 = vst.msk [vmem:[#allocation2 + $0x18] sm:$0xf] %vm2429_vm13, %v2346_v57  ;;  %v2376_v2 = vpop.permute.xlu0 %2375  ;;  %v4131_v57 = vld [vmem:[%s4708_s19 + $0x68] sm:$0x1] }
 0x1c6   : > { %2451 = vst.msk [vmem:[#allocation2 + $0x54] sm:$0xf] %vm2429_vm13, %v2376_v2  ;;  %3285 = vrot.lane.b32.xlu1 %v3216_v44, %s4663_s4  ;;  %v1788_v44 = vsel %vm4719_vm2, %v1783_v33, %v1787_v8  ;;  %v2078_v2 = vrot.slane %v4131_v57, 5  ;;  %v4153_v8 = vld [vmem:[%s4708_s19 + $0xc0] sm:$0xe]  ;;  %v2849_v56 = vrot.slane %v2847_v39, 4 }
 0x1c7   : > { %3283 = vrot.lane.b32.xlu0 %v3213_v45, %s4663_s4  ;;  %v4162_v45 = vrot.slane %v4126_v36, 9  ;;  %v4171_v13 = vrot.slane %v4153_v8, 9  ;;  %v2856_v36 = vshll.u32 %v4247_v28, 16  ;;  %v2852_v57 = vrot.slane %v2850_v40, 5  ;;  %v4203_v8 = vld [vmem:[%s4708_s19 + $0xd0] sm:$0xf] }
 0x1c8   : > { %v2378_v10 = vpop.permute.xlu1 %2377  ;;  %v2079_v9 = vsel %vm4863_vm6, %v2077_v1, %v2078_v2  ;;  %v2679_v2 = vshrl.u32 %v4225_v51, 16 }
 0x1c9   : > { %2452 = vst.msk [vmem:[#allocation2 + $0x58] sm:$0xf] %vm2429_vm13, %v2378_v10  ;;  %v2348_v15 = vpop.permute.xlu0 %2347  ;;  %v2069_v55 = vsel %vm4863_vm6, %v4162_v45, %v2068_v30  ;;  %v4200_v45 = vld [vmem:[%s4708_s19 + $0xc0] sm:$0xf] }
 0x1ca   : > { %2437 = vst.msk [vmem:[#allocation2 + $0x1c] sm:$0xf] %vm2429_vm13, %v2348_v15  ;;  %1825 = vrot.lane.b32.xlu1 %v1582_v0, %s4659_s23  ;;  %v2131_v0 = vrot.slane %v4154_v58, 5 }
 0x1cb   : > { %1823 = vrot.lane.b32.xlu0 %v1572_v54, %s4659_s23 }
 0x1cc   : > { %v2903_v60 = vpop.permute.xlu1 %2902  ;;  %v2133_v10 = vrot.slane %v2131_v0, 4 }
 0x1cd   : > { %2995 = vst.msk [vmem:[#allocation2 + $0x10] sm:$0xf] %vm2990_vm14, %v2903_v60  ;;  %v2380_v25 = vpop.permute.xlu0 %2379  ;;  %v2132_v60 = vsel %vm4863_vm6, %v4171_v13, %v2131_v0  ;;  %v2682_v0 = vshll.u32 %v4225_v51, 16  ;;  %v5995_v13 = vrot.slane %v2688_v61, 5  ;;  %v4295_v61 = vld [vmem:[%s4708_s19 + $0xc4] sm:$0xf] }
 0x1ce   : > { %2453 = vst.msk [vmem:[#allocation2 + $0x5c] sm:$0xf] %vm2429_vm13, %v2380_v25  ;;  %1857 = vrot.lane.b32.xlu1 %v1774_v5, %s4659_s23  ;;  %v4222_v5 = vld [vmem:[%s4708_s19 + $0x60] sm:$0xf]  ;;  %v2135_v16 = vsel %vm4863_vm6, %v2133_v10, %v2134_v11  ;;  %v5959_v25 = vrot.slane %v2664_v17, 5 }
 0x1cf   : > { %1855 = vrot.lane.b32.xlu0 %v1764_v21, %s4659_s23  ;;  %v2655_v22 = vshrl.u32 %v4222_v5, 16  ;;  %v2658_v23 = vshll.u32 %v4222_v5, 16  ;;  %v4227_v17 = vld [vmem:[%s4708_s19 + $0x74] sm:$0x1] }
 0x1d0   : > { %v2935_v31 = vpop.permute.xlu1 %2934 }
 0x1d1   : > { %3011 = vst.msk [vmem:[#allocation2 + $0x50] sm:$0xf] %vm2990_vm14, %v2935_v31  ;;  %v2905_v19 = vpop.permute.xlu0 %2904  ;;  %v4184_v31 = vld [vmem:[%s4708_s19 + $0x60] sm:$0xf]  ;;  %v2657_v34 = vrot.slane %v2655_v22, 4  ;;  %v2660_v35 = vrot.slane %v2658_v23, 5 }
 0x1d2   : > { %2996 = vst.msk [vmem:[#allocation2 + $0x14] sm:$0xf] %vm2990_vm14, %v2905_v19  ;;  %1829 = vrot.lane.b32.xlu1 %v1606_v26, %s4659_s23  ;;  %v2670_v26 = vrot.slane %v2668_v18, 4  ;;  %v4224_v19 = vld [vmem:[%s4708_s19 + $0x68] sm:$0x1]  ;;  %v2681_v18 = vrot.slane %v2679_v2, 4 }
 0x1d3   : > { %1827 = vrot.lane.b32.xlu0 %v1596_v32, %s4659_s23  ;;  %v2661_v50 = vor.u32 %v2660_v35, %v2657_v34 }
 0x1d4   : > { %v2907_v43 = vpop.permute.xlu1 %2906 }
 0x1d5   : > { %2997 = vst.msk [vmem:[#allocation2 + $0x18] sm:$0xf] %vm2990_vm14, %v2907_v43  ;;  %v2937_v48 = vpop.permute.xlu0 %2936  ;;  %v2671_v43 = vor.u32 %v2670_v26, %v5959_v25 }
 0x1d6   : > { %3012 = vst.msk [vmem:[#allocation2 + $0x54] sm:$0xf] %vm2990_vm14, %v2937_v48  ;;  %1861 = vrot.lane.b32.xlu1 %v1798_v37, %s4659_s23  ;;  %v2860_v37 = vshrl.u32 %v4247_v28, 16 }
 0x1d7   : > { %1859 = vrot.lane.b32.xlu0 %v1788_v44, %s4659_s23  ;;  %v2672_v58 = vrot.slane %v2671_v43, 4 }
 0x1d8   : > { %v2939_v53 = vpop.permute.xlu1 %2938 }
 0x1d9   : > { %3013 = vst.msk [vmem:[#allocation2 + $0x58] sm:$0xf] %vm2990_vm14, %v2939_v53  ;;  %v2909_v59 = vpop.permute.xlu0 %2908  ;;  %v5980_v53 = vrot.slane %v2856_v36, 5  ;;  %v4251_v36 = vld [vmem:[%s4708_s19 + $0xd4] sm:$0x1] }
 0x1da   : > { %2998 = vst.msk [vmem:[#allocation2 + $0x1c] sm:$0xf] %vm2990_vm14, %v2909_v59  ;;  %2162 = vrot.lane.b32.xlu1 %v2072_v49, %s4660_s24  ;;  %v2674_v49 = vshll.u32 %v4224_v19, 16  ;;  %v4248_v59 = vld [vmem:[%s4708_s19 + $0xc8] sm:$0x1] }
 0x1db   : > { %2160 = vrot.lane.b32.xlu0 %v2069_v55, %s4660_s24  ;;  %v2862_v55 = vrot.slane %v2860_v37, 4  ;;  %v2866_v11 = vshll.u32 %v4248_v59, 16  ;;  %v4272_v59 = vld [vmem:[%s4708_s19 + $0x68] sm:$0x1] }
 0x1dc   : > { %v3240_v54 = vpop.permute.xlu1 %3239  ;;  %v2676_v6 = vrot.slane %v2674_v49, 5  ;;  %v4271_v49 = vld [vmem:[%s4708_s19 + $0x64] sm:$0xf] }
 0x1dd   : > { %3332 = vst.msk [vmem:[#allocation2 + $0x10] sm:$0xf] %vm3327_vm15, %v3240_v54  ;;  %v2941_v7 = vpop.permute.xlu0 %2940  ;;  %v4250_v54 = vld [vmem:[%s4708_s19 + $0xd0] sm:$0xf]  ;;  %v2863_v10 = vor.u32 %v2862_v55, %v5980_v53  ;;  %v2868_v29 = vrot.slane %v2866_v11, 5  ;;  %v3163_v55 = vrot.slane %v4271_v49, 5 }
 0x1de   : > { %3014 = vst.msk [vmem:[#allocation2 + $0x5c] sm:$0xf] %vm2990_vm14, %v2941_v7  ;;  %2194 = vrot.lane.b32.xlu1 %v2128_v63, %s4660_s24  ;;  %v2692_v63 = vshrl.u32 %v4226_v46, 16  ;;  %v4249_v7 = vld [vmem:[%s4708_s19 + $0xcc] sm:$0xf]  ;;  %v2884_v5 = vshrl.u32 %v4250_v54, 16 }
 0x1df   : > { %2192 = vrot.lane.b32.xlu0 %v2125_v3, %s4660_s24  ;;  %v2864_v28 = vrot.slane %v2863_v10, 4  ;;  %v4294_v11 = vld [vmem:[%s4708_s19 + $0xc0] sm:$0xe] }
 0x1e0   : > { %v3272_v38 = vpop.permute.xlu1 %3271  ;;  %v2694_v14 = vrot.slane %v2692_v63, 4 }
 0x1e1   : > { %3348 = vst.msk [vmem:[#allocation2 + $0x50] sm:$0xf] %vm3327_vm15, %v3272_v38  ;;  %v3242_v15 = vpop.permute.xlu0 %3241  ;;  %v2853_v38 = vor.u32 %v2852_v57, %v2849_v56  ;;  %v2869_v40 = vsel %vm4719_vm2, %v2864_v28, %v2868_v29  ;;  %v4299_v29 = vld [vmem:[%s4708_s19 + $0xd4] sm:$0x1] }
 0x1e2   : > { %3333 = vst.msk [vmem:[#allocation2 + $0x14] sm:$0xf] %vm3327_vm15, %v3242_v15  ;;  %2166 = vrot.lane.b32.xlu1 %v2079_v9, %s4660_s24  ;;  %v2662_v9 = vrot.slane %v2661_v50, 4  ;;  %v2880_v15 = vshll.u32 %v4250_v54, 16  ;;  %v3166_v54 = vrot.slane %v4272_v59, 5 }
 0x1e3   : > { %2164 = vrot.lane.b32.xlu0 %v2076_v12, %s4660_s24  ;;  %v4202_v12 = vld [vmem:[%s4708_s19 + $0xcc] sm:$0xf]  ;;  %v2854_v35 = vrot.slane %v2853_v38, 4 }
 0x1e4   : > { %v3244_v20 = vpop.permute.xlu1 %3243  ;;  %v2667_v26 = vsel %vm4719_vm2, %v2662_v9, %v5959_v25  ;;  %v4274_v9 = vld [vmem:[%s4708_s19 + $0x70] sm:$0xf] }
 0x1e5   : > { %3334 = vst.msk [vmem:[#allocation2 + $0x18] sm:$0xf] %vm3327_vm15, %v3244_v20  ;;  %v3274_v21 = vpop.permute.xlu0 %3273  ;;  %v2684_v20 = vrot.slane %v2682_v0, 5  ;;  %v3165_v0 = vrot.slane %v3163_v55, 4 }
 0x1e6   : > { %3349 = vst.msk [vmem:[#allocation2 + $0x54] sm:$0xf] %vm3327_vm15, %v3274_v21  ;;  %2198 = vrot.lane.b32.xlu1 %v2135_v16, %s4660_s24  ;;  %v2874_v21 = vshll.u32 %v4249_v7, 16 }
 0x1e7   : > { %2196 = vrot.lane.b32.xlu0 %v2132_v60, %s4660_s24  ;;  %v2871_v60 = vshrl.u32 %v4249_v7, 16  ;;  %v2685_v19 = vor.u32 %v2684_v20, %v2681_v18  ;;  %v3167_v27 = vsel %vm4863_vm6, %v3165_v0, %v3166_v54  ;;  %v4273_v20 = vld [vmem:[%s4708_s19 + $0x6c] sm:$0xe] }
 0x1e8   : > { %v3276_v30 = vpop.permute.xlu1 %3275  ;;  %v2876_v39 = vrot.slane %v2874_v21, 5  ;;  %v4307_v28 = vrot.slane %v4273_v20, 9 }
 0x1e9   : > { %3350 = vst.msk [vmem:[#allocation2 + $0x58] sm:$0xf] %vm3327_vm15, %v3276_v30  ;;  %v3246_v32 = vpop.permute.xlu0 %3245  ;;  %v4619_v33 = vld [vmem:[#allocation2 + $0x10] sm:$0xff]   ;;  %v2695_v30 = vor.u32 %v2694_v14, %v5995_v13  ;;  %v2873_v37 = vrot.slane %v2871_v60, 4 }
 0x1ea   : > { %3335 = vst.msk [vmem:[#allocation2 + $0x1c] sm:$0xf] %vm3327_vm15, %v3246_v32  ;;  %2359 = vrot.lane.b32.xlu1 %v4185_v24, %s4661_s25  ;;  %4543 = vmatprep.mubr.msk.bf16.mxu0 %vm3499_vm0, %v4619_v33  ;;  %v2677_v24 = vsel %vm4719_vm2, %v2672_v58, %v2676_v6  ;;  %v2882_v32 = vrot.slane %v2880_v15, 5  ;;  %v2886_v33 = vrot.slane %v2884_v5, 4  ;;  %v4314_v5 = vrot.slane %v4294_v11, 9 }
 0x1eb   : > { %2357 = vrot.lane.b32.xlu0 %v4184_v31, %s4661_s25  ;;  %v2698_v31 = vshll.u32 %v4227_v17, 16  ;;  %v4298_v17 = vld [vmem:[%s4708_s19 + $0xd0] sm:$0xf] }
 0x1ec   : > { %v1818_v44 = vpop.permute.xlu1 %1817 }
 0x1ed   : > { %1905 = vst.msk [vmem:[#allocation2 + $0x24] sm:$0xf] %vm1895_vm11, %v1818_v44  ;;  %v3278_v47 = vpop.permute.xlu0 %3277  ;;  %v4620_v48 = vld [vmem:[#allocation2 + $0x50] sm:$0xff]   ;;  %v2700_v43 = vrot.slane %v2698_v31, 5  ;;  %v2887_v44 = vor.u32 %v2886_v33, %v2882_v32  ;;  %v4297_v31 = vld [vmem:[%s4708_s19 + $0xcc] sm:$0xe] }
 0x1ee   : > { %3351 = vst.msk [vmem:[#allocation2 + $0x5c] sm:$0xf] %vm3327_vm15, %v3278_v47  ;;  %2391 = vrot.lane.b32.xlu1 %v4201_v41, %s4661_s25  ;;  %4559 = vmatprep.mubr.msk.bf16.mxu1 %vm3499_vm0, %v4620_v48  ;;  %v2696_v41 = vrot.slane %v2695_v30, 4  ;;  %v2859_v47 = vsel %vm4719_vm2, %v2854_v35, %v5980_v53  ;;  %v2686_v48 = vrot.slane %v2685_v19, 4 }
 0x1ef   : > { %2389 = vrot.lane.b32.xlu0 %v4200_v45, %s4661_s25  ;;  %v2890_v45 = vshll.u32 %v4251_v36, 16  ;;  %v4315_v36 = vrot.slane %v4297_v31, 9 }
 0x1f0   : > { %v1850_v1 = vpop.permute.xlu1 %1849  ;;  %v2701_v51 = vsel %vm4719_vm2, %v2696_v41, %v2700_v43  ;;  %v2691_v57 = vsel %vm4719_vm2, %v2686_v48, %v5995_v13  ;;  %v3170_v13 = vrot.slane %v4274_v9, 5 }
 0x1f1   : > { %1921 = vst.msk [vmem:[#allocation2 + $0x64] sm:$0xf] %vm1895_vm11, %v1850_v1  ;;  %v1848_v3 = vpop.permute.xlu0 %1847  ;;  %v4621_v4 = vld [vmem:[#allocation2 + $0x18] sm:$0xff]   ;;  %v2892_v53 = vrot.slane %v2890_v45, 5  ;;  %v4270_v1 = vld [vmem:[%s4708_s19 + $0x60] sm:$0xe] }
 0x1f2   : > { %1920 = vst.msk [vmem:[#allocation2 + $0x60] sm:$0xf] %vm1895_vm11, %v1848_v3  ;;  %2363 = vrot.lane.b32.xlu1 %v4187_v42, %s4661_s25  ;;  %4544 = vmatmul.mubr.msk.bf16.gmra.mxu0 %vm3499_vm0, %v4621_v4  ;;  %v2877_v42 = vor.u32 %v2876_v39, %v2873_v37  ;;  %v3219_v3 = vrot.slane %v4295_v61, 5  ;;  %v4306_v7 = vrot.slane %v4270_v1, 9  ;;  %v3172_v21 = vrot.slane %v3170_v13, 4 }
 0x1f3   : > { %2361 = vrot.lane.b32.xlu0 %v4186_v52, %s4661_s25  ;;  %v2888_v52 = vrot.slane %v2887_v44, 4  ;;  %v3171_v19 = vsel %vm4863_vm6, %v4307_v28, %v3170_v13 }
 0x1f4   : > { %v1822_v16 = vpop.permute.xlu1 %1821  ;;  %v2878_v58 = vrot.slane %v2877_v42, 4  ;;  %v3221_v38 = vrot.slane %v3219_v3, 4  ;;  %v3164_v15 = vsel %vm4863_vm6, %v4306_v7, %v3163_v55 }
 0x1f5   : > { %1907 = vst.msk [vmem:[#allocation2 + $0x2c] sm:$0xf] %vm1895_vm11, %v1822_v16  ;;  %v1820_v22 = vpop.permute.xlu0 %1819  ;;  %v4622_v23 = vld [vmem:[#allocation2 + $0x58] sm:$0xff]   ;;  %v2893_v2 = vsel %vm4719_vm2, %v2888_v52, %v2892_v53  ;;  %v4275_v16 = vld [vmem:[%s4708_s19 + $0x74] sm:$0x1] }
 0x1f6   : > { %1906 = vst.msk [vmem:[#allocation2 + $0x28] sm:$0xf] %vm1895_vm11, %v1820_v22  ;;  %2395 = vrot.lane.b32.xlu1 %v4203_v8, %s4661_s25  ;;  %4560 = vmatmul.mubr.msk.bf16.gmra.mxu1 %vm3499_vm0, %v4622_v23  ;;  %v2883_v6 = vsel %vm4719_vm2, %v2878_v58, %v2882_v32  ;;  %v4296_v8 = vld [vmem:[%s4708_s19 + $0xc8] sm:$0x1]  ;;  %v3173_v22 = vrot.slane %v4275_v16, 5  ;;  %v3226_v23 = vrot.slane %v4298_v17, 5 }
 0x1f7   : > { %2393 = vrot.lane.b32.xlu0 %v4202_v12, %s4661_s25  ;;  %v3222_v12 = vrot.slane %v4296_v8, 5 }
 0x1f8   : > { %v1854_v34 = vpop.permute.xlu1 %1853  ;;  %v3174_v32 = vsel %vm4863_vm6, %v3172_v21, %v3173_v22  ;;  %v3228_v33 = vrot.slane %v3226_v23, 4 }
 0x1f9   : > { %1923 = vst.msk [vmem:[#allocation2 + $0x6c] sm:$0xf] %vm1895_vm11, %v1854_v34  ;;  %v1852_v25 = vpop.permute.xlu0 %1851  ;;  %v3223_v60 = vsel %vm4863_vm6, %v3221_v38, %v3222_v12  ;;  %v3229_v34 = vrot.slane %v4299_v29, 5 }
 0x1fa   : > { %1922 = vst.msk [vmem:[#allocation2 + $0x68] sm:$0xf] %vm1895_vm11, %v1852_v25  ;;  %2920 = vrot.lane.b32.xlu1 %v2677_v24, %s4662_s26 }
 0x1fb   : > { %2918 = vrot.lane.b32.xlu0 %v2667_v26, %s4662_s26  ;;  %v3220_v26 = vsel %vm4863_vm6, %v4314_v5, %v3219_v3  ;;  %v3230_v39 = vsel %vm4863_vm6, %v3228_v33, %v3229_v34 }
 0x1fc   : > { %v2155_v46 = vpop.permute.xlu1 %2154 }
 0x1fd   : > { %2242 = vst.msk [vmem:[#allocation2 + $0x24] sm:$0xf] %vm2232_vm12, %v2155_v46  ;;  %v2153_v50 = vpop.permute.xlu0 %2152 }
 0x1fe   : > { %2241 = vst.msk [vmem:[#allocation2 + $0x20] sm:$0xf] %vm2232_vm12, %v2153_v50  ;;  %2952 = vrot.lane.b32.xlu1 %v2869_v40, %s4662_s26  ;;  %v3227_v40 = vsel %vm4863_vm6, %v4315_v36, %v3226_v23 }
 0x1ff   : > { %2950 = vrot.lane.b32.xlu0 %v2859_v47, %s4662_s26 }
 0x200   : > { %v2187_v56 = vpop.permute.xlu1 %2186 }
 0x201   : > { %2258 = vst.msk [vmem:[#allocation2 + $0x64] sm:$0xf] %vm2232_vm12, %v2187_v56  ;;  %v2185_v63 = vpop.permute.xlu0 %2184 }
 0x202   : > { %2257 = vst.msk [vmem:[#allocation2 + $0x60] sm:$0xf] %vm2232_vm12, %v2185_v63  ;;  %2924 = vrot.lane.b32.xlu1 %v2701_v51, %s4662_s26 }
 0x203   : > { %2922 = vrot.lane.b32.xlu0 %v2691_v57, %s4662_s26 }
 0x204   : > { %v2159_v4 = vpop.permute.xlu1 %2158 }
 0x205   : > { %2244 = vst.msk [vmem:[#allocation2 + $0x2c] sm:$0xf] %vm2232_vm12, %v2159_v4  ;;  %v2157_v10 = vpop.permute.xlu0 %2156 }
 0x206   : > { %2243 = vst.msk [vmem:[#allocation2 + $0x28] sm:$0xf] %vm2232_vm12, %v2157_v10  ;;  %2956 = vrot.lane.b32.xlu1 %v2893_v2, %s4662_s26 }
 0x207   : > { %2954 = vrot.lane.b32.xlu0 %v2883_v6, %s4662_s26 }
 0x208   : > { %v2191_v14 = vpop.permute.xlu1 %2190 }
 0x209   : > { %2260 = vst.msk [vmem:[#allocation2 + $0x6c] sm:$0xf] %vm2232_vm12, %v2191_v14  ;;  %v2189_v18 = vpop.permute.xlu0 %2188 }
 0x20a   : > { %2259 = vst.msk [vmem:[#allocation2 + $0x68] sm:$0xf] %vm2232_vm12, %v2189_v18  ;;  %3257 = vrot.lane.b32.xlu1 %v3167_v27, %s4663_s4 }
 0x20b   : > { %3255 = vrot.lane.b32.xlu0 %v3164_v15, %s4663_s4 }
 0x20c   : > { %v2352_v24 = vpop.permute.xlu1 %2351 }
 0x20d   : > { %2439 = vst.msk [vmem:[#allocation2 + $0x24] sm:$0xf] %vm2429_vm13, %v2352_v24  ;;  %v2350_v30 = vpop.permute.xlu0 %2349  ;;  %v6133_v24 = vld [vmem:[%s6220_s2] ss:$0 sm:$0xff] }
 0x20e   : > { %2438 = vst.msk [vmem:[#allocation2 + $0x20] sm:$0xf] %vm2429_vm13, %v2350_v30  ;;  %3289 = vrot.lane.b32.xlu1 %v3223_v60, %s4663_s4 }
 0x20f   : > { %3287 = vrot.lane.b32.xlu0 %v3220_v26, %s4663_s4 }
 0x210   : > { %v2384_v35 = vpop.permute.xlu1 %2383 }
 0x211   : > { %2455 = vst.msk [vmem:[#allocation2 + $0x64] sm:$0xf] %vm2429_vm13, %v2384_v35  ;;  %v2382_v37 = vpop.permute.xlu0 %2381 }
 0x212   : > { %2454 = vst.msk [vmem:[#allocation2 + $0x60] sm:$0xf] %vm2429_vm13, %v2382_v37  ;;  %3261 = vrot.lane.b32.xlu1 %v3174_v32, %s4663_s4 }
 0x213   : > { %3259 = vrot.lane.b32.xlu0 %v3171_v19, %s4663_s4 }
 0x214   : > { %v2356_v25 = vpop.permute.xlu1 %2355 }
 0x215   : > { %2441 = vst.msk [vmem:[#allocation2 + $0x2c] sm:$0xf] %vm2429_vm13, %v2356_v25  ;;  %v2354_v41 = vpop.permute.xlu0 %2353 }
 0x216   : > { %2440 = vst.msk [vmem:[#allocation2 + $0x28] sm:$0xf] %vm2429_vm13, %v2354_v41  ;;  %3293 = vrot.lane.b32.xlu1 %v3230_v39, %s4663_s4 }
 0x217   : > { %3291 = vrot.lane.b32.xlu0 %v3227_v40, %s4663_s4 }
 0x218   : > { %v2388_v43 = vpop.permute.xlu1 %2387 }
 0x219   : > { %2457 = vst.msk [vmem:[#allocation2 + $0x6c] sm:$0xf] %vm2429_vm13, %v2388_v43  ;;  %v2386_v44 = vpop.permute.xlu0 %2385 }
 0x21a   : > { %2456 = vst.msk [vmem:[#allocation2 + $0x68] sm:$0xf] %vm2429_vm13, %v2386_v44 }
 0x21c   : > { %v2913_v45 = vpop.permute.xlu1 %2912 }
 0x21d   : > { %3000 = vst.msk [vmem:[#allocation2 + $0x24] sm:$0xf] %vm2990_vm14, %v2913_v45  ;;  %v2911_v62 = vpop.permute.xlu0 %2910 }
 0x21e   : > { %2999 = vst.msk [vmem:[#allocation2 + $0x20] sm:$0xf] %vm2990_vm14, %v2911_v62 }
 0x220   : > { %v2945_v46 = vpop.permute.xlu1 %2944 }
 0x221   : > { %3016 = vst.msk [vmem:[#allocation2 + $0x64] sm:$0xf] %vm2990_vm14, %v2945_v46  ;;  %v2943_v47 = vpop.permute.xlu0 %2942 }
 0x222   : > { %3015 = vst.msk [vmem:[#allocation2 + $0x60] sm:$0xf] %vm2990_vm14, %v2943_v47 }
 0x224   : > { %v2917_v48 = vpop.permute.xlu1 %2916 }
 0x225   : > { %3002 = vst.msk [vmem:[#allocation2 + $0x2c] sm:$0xf] %vm2990_vm14, %v2917_v48  ;;  %v2915_v42 = vpop.permute.xlu0 %2914 }
 0x226   : > { %3001 = vst.msk [vmem:[#allocation2 + $0x28] sm:$0xf] %vm2990_vm14, %v2915_v42 }
 0x228   : > { %v2949_v49 = vpop.permute.xlu1 %2948 }
 0x229   : > { %3018 = vst.msk [vmem:[#allocation2 + $0x6c] sm:$0xf] %vm2990_vm14, %v2949_v49  ;;  %v2947_v50 = vpop.permute.xlu0 %2946 }
 0x22a   : > { %3017 = vst.msk [vmem:[#allocation2 + $0x68] sm:$0xf] %vm2990_vm14, %v2947_v50 }
 0x22c   : > { %v3250_v51 = vpop.permute.xlu1 %3249 }
 0x22d   : > { %3337 = vst.msk [vmem:[#allocation2 + $0x24] sm:$0xf] %vm3327_vm15, %v3250_v51  ;;  %v3248_v52 = vpop.permute.xlu0 %3247 }
 0x22e   : > { %3336 = vst.msk [vmem:[#allocation2 + $0x20] sm:$0xf] %vm3327_vm15, %v3248_v52 }
 0x230   : > { %v3282_v53 = vpop.permute.xlu1 %3281 }
 0x231   : > { %3353 = vst.msk [vmem:[#allocation2 + $0x64] sm:$0xf] %vm3327_vm15, %v3282_v53  ;;  %v3280_v55 = vpop.permute.xlu0 %3279 }
 0x232   : > { %3352 = vst.msk [vmem:[#allocation2 + $0x60] sm:$0xf] %vm3327_vm15, %v3280_v55 }
 0x234   : > { %v3254_v56 = vpop.permute.xlu1 %3253 }
 0x235   : > { %3339 = vst.msk [vmem:[#allocation2 + $0x2c] sm:$0xf] %vm3327_vm15, %v3254_v56  ;;  %v3252_v57 = vpop.permute.xlu0 %3251  ;;  %v4623_v58 = vld [vmem:[#allocation2 + $0x20] sm:$0xff]  }
 0x236   : > { %3338 = vst.msk [vmem:[#allocation2 + $0x28] sm:$0xf] %vm3327_vm15, %v3252_v57  ;;  %4547 = vmatprep.mubr.msk.bf16.mxu0 %vm3499_vm0, %v4623_v58 }
 0x238   : > { %v3286_v59 = vpop.permute.xlu1 %3285 }
 0x239   : > { %3355 = vst.msk [vmem:[#allocation2 + $0x6c] sm:$0xf] %vm3327_vm15, %v3286_v59  ;;  %v3284_v61 = vpop.permute.xlu0 %3283  ;;  %v4624_v63 = vld [vmem:[#allocation2 + $0x60] sm:$0xff]  }
 0x23a   : > { %3354 = vst.msk [vmem:[#allocation2 + $0x68] sm:$0xf] %vm3327_vm15, %v3284_v61  ;;  %4563 = vmatprep.mubr.msk.bf16.mxu1 %vm3499_vm0, %v4624_v63 }
 0x23c   : > { %v1826_v1 = vpop.permute.xlu1 %1825 }
 0x23d   : > { %1909 = vst.msk [vmem:[#allocation2 + $0x34] sm:$0xf] %vm1895_vm11, %v1826_v1  ;;  %v1824_v2 = vpop.permute.xlu0 %1823  ;;  %v4625_v0 = vld [vmem:[#allocation2 + $0x28] sm:$0xff]  }
 0x23e   : > { %1908 = vst.msk [vmem:[#allocation2 + $0x30] sm:$0xf] %vm1895_vm11, %v1824_v2  ;;  %4548 = vmatmul.mubr.msk.bf16.gmra.mxu0 %vm3499_vm0, %v4625_v0 }
 0x240   : > { %v1858_v54 = vpop.permute.xlu1 %1857 }
 0x241   : > { %1925 = vst.msk [vmem:[#allocation2 + $0x74] sm:$0xf] %vm1895_vm11, %v1858_v54  ;;  %v1856_v3 = vpop.permute.xlu0 %1855  ;;  %v4626_v4 = vld [vmem:[#allocation2 + $0x68] sm:$0xff]  }
 0x242   : > { %1924 = vst.msk [vmem:[#allocation2 + $0x70] sm:$0xf] %vm1895_vm11, %v1856_v3  ;;  %4564 = vmatmul.mubr.msk.bf16.gmra.mxu1 %vm3499_vm0, %v4626_v4 }
 0x244   : > { %v1830_v6 = vpop.permute.xlu1 %1829 }
 0x245   : > { %1911 = vst.msk [vmem:[#allocation2 + $0x3c] sm:$0xf] %vm1895_vm11, %v1830_v6  ;;  %v1828_v7 = vpop.permute.xlu0 %1827 }
 0x246   : > { %1910 = vst.msk [vmem:[#allocation2 + $0x38] sm:$0xf] %vm1895_vm11, %v1828_v7 }
 0x248   : > { %v1862_v8 = vpop.permute.xlu1 %1861 }
 0x249   : > { %1927 = vst.msk [vmem:[#allocation2 + $0x7c] sm:$0xf] %vm1895_vm11, %v1862_v8  ;;  %v1860_v9 = vpop.permute.xlu0 %1859 }
 0x24a   : > { %1926 = vst.msk [vmem:[#allocation2 + $0x78] sm:$0xf] %vm1895_vm11, %v1860_v9 }
 0x24c   : > { %v2163_v10 = vpop.permute.xlu1 %2162 }
 0x24d   : > { %2246 = vst.msk [vmem:[#allocation2 + $0x34] sm:$0xf] %vm2232_vm12, %v2163_v10  ;;  %v2161_v11 = vpop.permute.xlu0 %2160 }
 0x24e   : > { %2245 = vst.msk [vmem:[#allocation2 + $0x30] sm:$0xf] %vm2232_vm12, %v2161_v11 }
 0x250   : > { %v2195_v27 = vpop.permute.xlu1 %2194 }
 0x251   : > { %2262 = vst.msk [vmem:[#allocation2 + $0x74] sm:$0xf] %vm2232_vm12, %v2195_v27  ;;  %v2193_v38 = vpop.permute.xlu0 %2192 }
 0x252   : > { %2261 = vst.msk [vmem:[#allocation2 + $0x70] sm:$0xf] %vm2232_vm12, %v2193_v38 }
 0x254   : > { %v2167_v12 = vpop.permute.xlu1 %2166 }
 0x255   : > { %2248 = vst.msk [vmem:[#allocation2 + $0x3c] sm:$0xf] %vm2232_vm12, %v2167_v12  ;;  %v2165_v13 = vpop.permute.xlu0 %2164 }
 0x256   : > { %2247 = vst.msk [vmem:[#allocation2 + $0x38] sm:$0xf] %vm2232_vm12, %v2165_v13 }
 0x258   : > { %v2199_v14 = vpop.permute.xlu1 %2198 }
 0x259   : > { %2264 = vst.msk [vmem:[#allocation2 + $0x7c] sm:$0xf] %vm2232_vm12, %v2199_v14  ;;  %v2197_v15 = vpop.permute.xlu0 %2196 }
 0x25a   : > { %2263 = vst.msk [vmem:[#allocation2 + $0x78] sm:$0xf] %vm2232_vm12, %v2197_v15 }
 0x25c   : > { %v2360_v5 = vpop.permute.xlu1 %2359 }
 0x25d   : > { %2443 = vst.msk [vmem:[#allocation2 + $0x34] sm:$0xf] %vm2429_vm13, %v2360_v5  ;;  %v2358_v16 = vpop.permute.xlu0 %2357 }
 0x25e   : > { %2442 = vst.msk [vmem:[#allocation2 + $0x30] sm:$0xf] %vm2429_vm13, %v2358_v16 }
 0x260   : > { %v2392_v17 = vpop.permute.xlu1 %2391 }
 0x261   : > { %2459 = vst.msk [vmem:[#allocation2 + $0x74] sm:$0xf] %vm2429_vm13, %v2392_v17  ;;  %v2390_v18 = vpop.permute.xlu0 %2389 }
 0x262   : > { %2458 = vst.msk [vmem:[#allocation2 + $0x70] sm:$0xf] %vm2429_vm13, %v2390_v18 }
 0x264   : > { %v2364_v20 = vpop.permute.xlu1 %2363 }
 0x265   : > { %2445 = vst.msk [vmem:[#allocation2 + $0x3c] sm:$0xf] %vm2429_vm13, %v2364_v20  ;;  %v2362_v60 = vpop.permute.xlu0 %2361 }
 0x266   : > { %2444 = vst.msk [vmem:[#allocation2 + $0x38] sm:$0xf] %vm2429_vm13, %v2362_v60 }
 0x268   : > { %v2396_v21 = vpop.permute.xlu1 %2395 }
 0x269   : > { %2461 = vst.msk [vmem:[#allocation2 + $0x7c] sm:$0xf] %vm2429_vm13, %v2396_v21  ;;  %v2394_v22 = vpop.permute.xlu0 %2393 }
 0x26a   : > { %2460 = vst.msk [vmem:[#allocation2 + $0x78] sm:$0xf] %vm2429_vm13, %v2394_v22  ;;  %v4541_v23 = vpop.f32.mrf.mxu0 }
 0x26b   : > { %v3595_v30 = vadd.f32 %v4541_v23, %v6133_v24 }
 0x26c   : > { %v2921_v26 = vpop.permute.xlu1 %2920  ;;  %v3586_v29 = vpop.f32.mrf.mxu0 }
 0x26d   : > { %3004 = vst.msk [vmem:[#allocation2 + $0x34] sm:$0xf] %vm2990_vm14, %v2921_v26  ;;  %v2919_v28 = vpop.permute.xlu0 %2918  ;;  %v3587_v33 = vadd.f32 %v6133_v24, %v3586_v29  ;;  %v3715_v37 = vmax.f32 %v3595_v30, 0.0 }
 0x26e   : > { %3003 = vst.msk [vmem:[#allocation2 + $0x30] sm:$0xf] %vm2990_vm14, %v2919_v28  ;;  %v4542_v31 = vpop.f32.mrf.mxu0  ;;  %v4557_v32 = vpop.f32.mrf.mxu1 }
 0x26f   : > { %v3598_v34 = vadd.f32 %v4542_v31, %v6133_v24  ;;  %v3659_v41 = vadd.f32 %v4557_v32, %v6133_v24  ;;  %v3713_v43 = vmax.f32 %v3587_v33, 0.0 }
 0x270   : > { %v2953_v35 = vpop.permute.xlu1 %2952  ;;  %v3589_v36 = vpop.f32.mrf.mxu0 }
 0x271   : > { %3020 = vst.msk [vmem:[#allocation2 + $0x74] sm:$0xf] %vm2990_vm14, %v2953_v35  ;;  %v2951_v19 = vpop.permute.xlu0 %2950  ;;  %v3716_v39 = vmax.f32 %v3598_v34, 0.0  ;;  %v3590_v25 = vadd.f32 %v6133_v24, %v3589_v36  ;;  %v3650_v40 = vpop.f32.mrf.mxu1  ;;  %v3731_v51 = vmax.f32 %v3659_v41, 0.0 }
 0x272   : > { %3019 = vst.msk [vmem:[#allocation2 + $0x70] sm:$0xf] %vm2990_vm14, %v2951_v19  ;;  %v3651_v47 = vadd.f32 %v6133_v24, %v3650_v40 }
 0x273   : > { %v4427_v44 = vpack.c.bf16 %v3716_v39, %v3715_v37  ;;  %v3714_v45 = vmax.f32 %v3590_v25, 0.0  ;;  %v4558_v62 = vpop.f32.mrf.mxu1 }
 0x274   : > { %v2925_v46 = vpop.permute.xlu1 %2924  ;;  %v3662_v48 = vadd.f32 %v4558_v62, %v6133_v24  ;;  %v3729_v56 = vmax.f32 %v3651_v47, 0.0 }
 0x275   : > { %3006 = vst.msk [vmem:[#allocation2 + $0x3c] sm:$0xf] %vm2990_vm14, %v2925_v46  ;;  %v2923_v42 = vpop.permute.xlu0 %2922  ;;  %4499 = vst [vmem:[%s6147_s16 + $0x8] sm:$0xff] %v4427_v44   ;;  %v4422_v49 = vpack.c.bf16 %v3714_v45, %v3713_v43  ;;  %v3653_v50 = vpop.f32.mrf.mxu1 }
 0x276   : > { %3005 = vst.msk [vmem:[#allocation2 + $0x38] sm:$0xf] %vm2990_vm14, %v2923_v42  ;;  %v3732_v52 = vmax.f32 %v3662_v48, 0.0  ;;  %v3654_v53 = vadd.f32 %v6133_v24, %v3653_v50 }
 0x277   : > { %4423 = vst [vmem:[%s6147_s16] sm:$0xff] %v4422_v49  }
 0x278   : > { %v2957_v55 = vpop.permute.xlu1 %2956  ;;  %v4467_v57 = vpack.c.bf16 %v3732_v52, %v3731_v51  ;;  %v3730_v58 = vmax.f32 %v3654_v53, 0.0 }
 0x279   : > { %3022 = vst.msk [vmem:[#allocation2 + $0x7c] sm:$0xf] %vm2990_vm14, %v2957_v55  ;;  %v2955_v59 = vpop.permute.xlu0 %2954 }
 0x27a   : > { %3021 = vst.msk [vmem:[#allocation2 + $0x78] sm:$0xf] %vm2990_vm14, %v2955_v59  ;;  %4507 = vst [vmem:[%s6147_s16 + $0x48] sm:$0xff] %v4467_v57   ;;  %v4462_v61 = vpack.c.bf16 %v3730_v58, %v3729_v56 }
 0x27c   : > { %v3258_v63 = vpop.permute.xlu1 %3257  ;;  %4506 = vst [vmem:[%s6147_s16 + $0x40] sm:$0xff] %v4462_v61  }
 0x27d   : > { %3341 = vst.msk [vmem:[#allocation2 + $0x34] sm:$0xf] %vm3327_vm15, %v3258_v63  ;;  %v3256_v1 = vpop.permute.xlu0 %3255 }
 0x27e   : > { %3340 = vst.msk [vmem:[#allocation2 + $0x30] sm:$0xf] %vm3327_vm15, %v3256_v1 }
 0x280   : > { %v3290_v2 = vpop.permute.xlu1 %3289 }
 0x281   : > { %3357 = vst.msk [vmem:[#allocation2 + $0x74] sm:$0xf] %vm3327_vm15, %v3290_v2  ;;  %v3288_v0 = vpop.permute.xlu0 %3287 }
 0x282   : > { %3356 = vst.msk [vmem:[#allocation2 + $0x70] sm:$0xf] %vm3327_vm15, %v3288_v0 }
 0x284   : > { %v3262_v54 = vpop.permute.xlu1 %3261 }
 0x285   : > { %3343 = vst.msk [vmem:[#allocation2 + $0x3c] sm:$0xf] %vm3327_vm15, %v3262_v54  ;;  %v3260_v3 = vpop.permute.xlu0 %3259  ;;  %v4627_v4 = vld [vmem:[#allocation2 + $0x30] sm:$0xff]  }
 0x286   : > { %3342 = vst.msk [vmem:[#allocation2 + $0x38] sm:$0xf] %vm3327_vm15, %v3260_v3  ;;  %4551 = vmatprep.mubr.msk.bf16.mxu0 %vm3499_vm0, %v4627_v4 }
 0x288   : > { %v3294_v6 = vpop.permute.xlu1 %3293 }
 0x289   : > { %3359 = vst.msk [vmem:[#allocation2 + $0x7c] sm:$0xf] %vm3327_vm15, %v3294_v6  ;;  %v3292_v7 = vpop.permute.xlu0 %3291  ;;  %v4628_v8 = vld [vmem:[#allocation2 + $0x70] sm:$0xff]  }
 0x28a   : > { %3358 = vst.msk [vmem:[#allocation2 + $0x78] sm:$0xf] %vm3327_vm15, %v3292_v7  ;;  %4567 = vmatprep.mubr.msk.bf16.mxu1 %vm3499_vm0, %v4628_v8 }
 0x28d   : > { %v4629_v9 = vld [vmem:[#allocation2 + $0x38] sm:$0xff]  }
 0x28e   : > { %4552 = vmatmul.mubr.msk.bf16.gmra.mxu0 %vm3499_vm0, %v4629_v9 }
 0x291   : > { %v4630_v10 = vld [vmem:[#allocation2 + $0x78] sm:$0xff]  }
 0x292   : > { %4568 = vmatmul.mubr.msk.bf16.gmra.mxu1 %vm3499_vm0, %v4630_v10 }
 0x2b2   : > { %v4545_v11 = vpop.f32.mrf.mxu0 }
 0x2b3   : > { %v3611_v38 = vadd.f32 %v4545_v11, %v6133_v24 }
 0x2b4   : > { %v3602_v27 = vpop.f32.mrf.mxu0 }
 0x2b5   : > { %v3603_v12 = vadd.f32 %v6133_v24, %v3602_v27  ;;  %v3719_v17 = vmax.f32 %v3611_v38, 0.0 }
 0x2b6   : > { %v4546_v13 = vpop.f32.mrf.mxu0  ;;  %v4561_v14 = vpop.f32.mrf.mxu1 }
 0x2b7   : > { %v3614_v15 = vadd.f32 %v4546_v13, %v6133_v24  ;;  %v3675_v20 = vadd.f32 %v4561_v14, %v6133_v24  ;;  %v3717_v21 = vmax.f32 %v3603_v12, 0.0 }
 0x2b8   : > { %v3605_v5 = vpop.f32.mrf.mxu0  ;;  %v3666_v16 = vpop.f32.mrf.mxu1 }
 0x2b9   : > { %v3720_v18 = vmax.f32 %v3614_v15, 0.0  ;;  %v3606_v60 = vadd.f32 %v6133_v24, %v3605_v5  ;;  %v3667_v28 = vadd.f32 %v6133_v24, %v3666_v16  ;;  %v3735_v31 = vmax.f32 %v3675_v20, 0.0 }
 0x2ba   : > { %v4562_v22 = vpop.f32.mrf.mxu1 }
 0x2bb   : > { %v4437_v23 = vpack.c.bf16 %v3720_v18, %v3719_v17  ;;  %v3718_v26 = vmax.f32 %v3606_v60, 0.0  ;;  %v3678_v29 = vadd.f32 %v4562_v22, %v6133_v24  ;;  %v3733_v35 = vmax.f32 %v3667_v28, 0.0 }
 0x2bc   : > { %v3669_v30 = vpop.f32.mrf.mxu1 }
 0x2bd   : > { %4501 = vst [vmem:[%s6147_s16 + $0x18] sm:$0xff] %v4437_v23   ;;  %v4432_v32 = vpack.c.bf16 %v3718_v26, %v3717_v21  ;;  %v3736_v33 = vmax.f32 %v3678_v29, 0.0  ;;  %v3670_v34 = vadd.f32 %v6133_v24, %v3669_v30 }
 0x2bf   : > { %4500 = vst [vmem:[%s6147_s16 + $0x10] sm:$0xff] %v4432_v32   ;;  %v4477_v19 = vpack.c.bf16 %v3736_v33, %v3735_v31  ;;  %v3734_v36 = vmax.f32 %v3670_v34, 0.0 }
 0x2c1   : > { %4509 = vst [vmem:[%s6147_s16 + $0x58] sm:$0xff] %v4477_v19   ;;  %v4472_v37 = vpack.c.bf16 %v3734_v36, %v3733_v35 }
 0x2c3   : > { %4508 = vst [vmem:[%s6147_s16 + $0x50] sm:$0xff] %v4472_v37  }
 0x2fe   : > { %v4549_v39 = vpop.f32.mrf.mxu0 }
 0x2ff   : > { %v3627_v40 = vadd.f32 %v4549_v39, %v6133_v24 }
 0x300   : > { %v3618_v25 = vpop.f32.mrf.mxu0 }
 0x301   : > { %v3619_v41 = vadd.f32 %v6133_v24, %v3618_v25  ;;  %v3723_v47 = vmax.f32 %v3627_v40, 0.0 }
 0x302   : > { %v4550_v43 = vpop.f32.mrf.mxu0  ;;  %v4565_v44 = vpop.f32.mrf.mxu1 }
 0x303   : > { %v3630_v45 = vadd.f32 %v4550_v43, %v6133_v24  ;;  %v3691_v42 = vadd.f32 %v4565_v44, %v6133_v24  ;;  %v3721_v50 = vmax.f32 %v3619_v41, 0.0 }
 0x304   : > { %v3621_v62 = vpop.f32.mrf.mxu0  ;;  %v3682_v46 = vpop.f32.mrf.mxu1 }
 0x305   : > { %v3724_v48 = vmax.f32 %v3630_v45, 0.0  ;;  %v3622_v49 = vadd.f32 %v6133_v24, %v3621_v62  ;;  %v3683_v55 = vadd.f32 %v6133_v24, %v3682_v46  ;;  %v3739_v58 = vmax.f32 %v3691_v42, 0.0 }
 0x306   : > { %v4566_v51 = vpop.f32.mrf.mxu1 }
 0x307   : > { %v4447_v52 = vpack.c.bf16 %v3724_v48, %v3723_v47  ;;  %v3722_v53 = vmax.f32 %v3622_v49, 0.0  ;;  %v3694_v56 = vadd.f32 %v4566_v51, %v6133_v24  ;;  %v3737_v1 = vmax.f32 %v3683_v55, 0.0 }
 0x308   : > { %v3685_v57 = vpop.f32.mrf.mxu1 }
 0x309   : > { %4503 = vst [vmem:[%s6147_s16 + $0x28] sm:$0xff] %v4447_v52   ;;  %v4442_v59 = vpack.c.bf16 %v3722_v53, %v3721_v50  ;;  %v3740_v61 = vmax.f32 %v3694_v56, 0.0  ;;  %v3686_v63 = vadd.f32 %v6133_v24, %v3685_v57 }
 0x30b   : > { %4502 = vst [vmem:[%s6147_s16 + $0x20] sm:$0xff] %v4442_v59   ;;  %v4487_v2 = vpack.c.bf16 %v3740_v61, %v3739_v58  ;;  %v3738_v0 = vmax.f32 %v3686_v63, 0.0 }
 0x30d   : > { %4511 = vst [vmem:[%s6147_s16 + $0x68] sm:$0xff] %v4487_v2   ;;  %v4482_v54 = vpack.c.bf16 %v3738_v0, %v3737_v1 }
 0x30f   : > { %4510 = vst [vmem:[%s6147_s16 + $0x60] sm:$0xff] %v4482_v54  }
 0x34e   : > { %v4553_v3 = vpop.f32.mrf.mxu0 }
 0x34f   : > { %v3643_v6 = vadd.f32 %v4553_v3, %v6133_v24 }
 0x350   : > { %v3634_v4 = vpop.f32.mrf.mxu0 }
 0x351   : > { %v3635_v7 = vadd.f32 %v6133_v24, %v3634_v4  ;;  %v3727_v38 = vmax.f32 %v3643_v6, 0.0 }
 0x352   : > { %v4554_v8 = vpop.f32.mrf.mxu0  ;;  %v4569_v9 = vpop.f32.mrf.mxu1 }
 0x353   : > { %v3646_v10 = vadd.f32 %v4554_v8, %v6133_v24  ;;  %v3707_v13 = vadd.f32 %v4569_v9, %v6133_v24  ;;  %v3725_v15 = vmax.f32 %v3635_v7, 0.0 }
 0x354   : > { %v3637_v11 = vpop.f32.mrf.mxu0  ;;  %v3698_v27 = vpop.f32.mrf.mxu1 }
 0x355   : > { %v3728_v12 = vmax.f32 %v3646_v10, 0.0  ;;  %v3638_v14 = vadd.f32 %v6133_v24, %v3637_v11  ;;  %v3699_v18 = vadd.f32 %v6133_v24, %v3698_v27  ;;  %v3743_v21 = vmax.f32 %v3707_v13, 0.0 }
 0x356   : > { %v4570_v5 = vpop.f32.mrf.mxu1 }
 0x357   : > { %v4457_v16 = vpack.c.bf16 %v3728_v12, %v3727_v38  ;;  %v3726_v17 = vmax.f32 %v3638_v14, 0.0  ;;  %v3710_v20 = vadd.f32 %v4570_v5, %v6133_v24  ;;  %v3741_v28 = vmax.f32 %v3699_v18, 0.0 }
 0x358   : > { %v3701_v60 = vpop.f32.mrf.mxu1 }
 0x359   : > { %4505 = vst [vmem:[%s6147_s16 + $0x38] sm:$0xff] %v4457_v16   ;;  %v4452_v22 = vpack.c.bf16 %v3726_v17, %v3725_v15  ;;  %v3744_v23 = vmax.f32 %v3710_v20, 0.0  ;;  %v3702_v26 = vadd.f32 %v6133_v24, %v3701_v60 }
 0x35b   : > { %4504 = vst [vmem:[%s6147_s16 + $0x30] sm:$0xff] %v4452_v22   ;;  %v4497_v29 = vpack.c.bf16 %v3744_v23, %v3743_v21  ;;  %v3742_v30 = vmax.f32 %v3702_v26, 0.0 }
 0x35d   : > { %4513 = vst [vmem:[%s6147_s16 + $0x78] sm:$0xff] %v4497_v29   ;;  %v4492_v31 = vpack.c.bf16 %v3742_v30, %v3741_v28 }
 0x35f   : > { %4512 = vst [vmem:[%s6147_s16 + $0x70] sm:$0xff] %v4492_v31  }
 0x360 PF: > { %s13_s14 = sadd.s32 1, %s4654_s14   ;;  %s6226_s12 = smov %s4650_s13 }
 0x361   : > { %p10_p5 = scmp.ge.s32.totalorder %s13_s14, 4   ;;  %s6227_s13 = smov %s6229_s15 }
 0x363   :  { %12 = sbr.rel (!%p10_p5) target bundleno = 2 (0x2), region = 65 }

</bundles_post_ra>
